<compile_context>
chip_gen: v6e
topology: v6e:2x2x1
jax: 0.10.0
libtpu: 0.0.40
codegen_flags: <defaults>
</compile_context>

<pallas_src>
import jax
import jax.numpy as jnp
from jax.experimental import pallas as pl
from jax.experimental.pallas import tpu as pltpu


INPUT_SIZE = 512
HIDDEN_SIZE = 256
NUM_CLASSES = 4


def _round_up(x, m):
    return (x + m - 1) // m * m


def _permute_gates(w, hidden):
    """Permute gate columns from PyTorch order [i,f,g,o] to [i,f,o,g]."""
    return jnp.concatenate(
        [w[..., 0:2 * hidden], w[..., 3 * hidden:4 * hidden],
         w[..., 2 * hidden:3 * hidden]], axis=-1)


def _choose_batch_block(b_pad):
    """Batch block size (multiple of 8); >=2 blocks when batch is big enough
    so v7x's second TensorCore gets a shard. v5e/v6e (1 TC) are unaffected."""
    if b_pad >= 16 and (b_pad // 2) % 8 == 0:
        return b_pad // 2
    return b_pad


def make_lstm_kernel(seq_len, t_blk, hidden, unroll):
    """Builds the recurrence kernel for one (batch block, time block) grid cell.

    gx_ref  : (t_blk, b_blk, 4H) bf16  precomputed x @ W_ih + b (gate-permuted)
    w_hh_ref: (H, 4H)            bf16  recurrent weights (grid-invariant)
    h_ref   : (b_blk, H)         f32   output ref; doubles as resident h state
    c_ref   : (b_blk, H)         f32   VMEM scratch cell state
    """
    needs_mask = (seq_len % t_blk) != 0

    def kernel(gx_ref, w_hh_ref, h_ref, c_ref):
        tb = pl.program_id(1)

        @pl.when(tb == 0)
        def _():
            h_ref[...] = jnp.zeros_like(h_ref)
            c_ref[...] = jnp.zeros_like(c_ref)

        # Hoisted out of step(): load W_hh once per grid step, not once per
        # unrolled iteration (keeps the vld slot off redundant weight loads).
        w = w_hh_ref[...]
        # TODO(synk): hold W_hh stationary in the MXU across timesteps via
        # pltpu.matmul_push_rhs / matmul_acc_lhs / matmul_pop (v6e/v7x win);
        # kept as jnp.dot here for lowering portability across generations.

        def step(i, carry):
            h, c = carry
            # Only the sequentially-dependent matmul stays on the critical
            # path; bf16 operands, f32 accumulation.
            gates = gx_ref[i].astype(jnp.float32) + jnp.dot(
                h.astype(jnp.bfloat16), w, preferred_element_type=jnp.float32)
            # Gate columns pre-permuted offline to [i, f, o, g]: one sigmoid
            # over a contiguous (B, 3H) slab, one tanh over (B, H); the
            # divide runs on the EUP via approximate reciprocal.
            sig = pl.reciprocal(1.0 + jnp.exp(-gates[:, :3 * hidden]),
                                approx=True)
            i_g = sig[:, 0 * hidden:1 * hidden]
            f_g = sig[:, 1 * hidden:2 * hidden]
            o_g = sig[:, 2 * hidden:3 * hidden]
            g_g = jnp.tanh(gates[:, 3 * hidden:4 * hidden])
            c_new = f_g * c + i_g * g_g
            h_new = o_g * jnp.tanh(c_new)
            if needs_mask:
                # Zero-padded tail timesteps: keep state unchanged.
                valid = (tb * t_blk + i) < seq_len
                h_new = jnp.where(valid, h_new, h)
                c_new = jnp.where(valid, c_new, c)
            return h_new, c_new

        h, c = jax.lax.fori_loop(0, t_blk, step, (h_ref[...], c_ref[...]),
                                 unroll=unroll)
        h_ref[...] = h
        c_ref[...] = c

    return kernel


@jax.jit
def crimenet_forward(x, w_ih, w_hh, b, w_fc, b_fc):
    """x: (B, T, INPUT_SIZE) float32 -> logits (B, NUM_CLASSES) float32.

    Params are in PyTorch gate order [i, f, g, o]; permutation to the
    kernel-friendly [i, f, o, g] layout is done once here.
    """
    B, T, D = x.shape
    H = w_hh.shape[0]

    # One-time offline gate-column permutation.
    w_ih_p = _permute_gates(w_ih, H)
    w_hh_p = _permute_gates(w_hh, H)
    b_p = _permute_gates(b, H)

    # ---- Hoisted input projection (no sequential dependency): one large
    # (T*B, D) @ (D, 4H) bf16 matmul with f32 accumulation, bias folded in,
    # then cast to bf16 for streaming into the kernel.
    x_tbd = jnp.transpose(x, (1, 0, 2))                         # (T, B, D) time-major
    gx = jnp.dot(x_tbd.reshape(T * B, D).astype(jnp.bfloat16),
                 w_ih_p.astype(jnp.bfloat16),
                 preferred_element_type=jnp.float32) + b_p       # (T*B, 4H) f32
    gx = gx.astype(jnp.bfloat16).reshape(T, B, 4 * H)

    # Pad batch to a multiple of 8 (full f32 sublane occupancy, unmasked
    # output stores) and time to a multiple of the fixed time block.
    B_pad = _round_up(B, 8)
    t_blk = min(T, 32)
    T_pad = _round_up(T, t_blk)
    if (B_pad, T_pad) != (B, T):
        gx = jnp.pad(gx, ((0, T_pad - T), (0, B_pad - B), (0, 0)))

    b_blk = _choose_batch_block(B_pad)
    num_b_blocks = B_pad // b_blk
    num_t_blocks = T_pad // t_blk
    unroll = True if t_blk <= 16 else 8   # partial unroll bounds code bloat

    # VMEM budget: double-buffered bf16 gx block + (double-buffered) bf16 W_hh
    # + f32 h/c state, with headroom; capped at v7x's 64 MiB.
    gx_block_bytes = t_blk * b_blk * 4 * H * 2
    w_hh_bytes = H * 4 * H * 2
    state_bytes = 8 * b_blk * H * 4
    vmem_limit = int(min(max(2 * gx_block_bytes + 2 * w_hh_bytes + state_bytes
                             + (2 << 20), 16 << 20), 64 << 20))

    grid_spec = pltpu.PrefetchScalarGridSpec(
        num_scalar_prefetch=0,
        grid=(num_b_blocks, num_t_blocks),
        in_specs=[
            # t_blk timesteps of precomputed input gates for this batch block.
            pl.BlockSpec((t_blk, b_blk, 4 * H), lambda bi, tb: (tb, bi, 0)),
            # W_hh is grid-invariant -> fetched once, stays resident in VMEM.
            # TODO(synk): pipeline_mode=pl.Buffered(1) would drop the unused
            # second 512 KiB weight buffer; left at the default for lowering
            # portability.
            pl.BlockSpec((H, 4 * H), lambda bi, tb: (0, 0)),
        ],
        # Output doubles as the resident h state: lane-dense (b_blk, 256),
        # one block per batch block (constant across the time axis).
        out_specs=pl.BlockSpec((b_blk, H), lambda bi, tb: (bi, 0)),
        scratch_shapes=[pltpu.VMEM((b_blk, H), jnp.float32)],    # cell state
    )

    h_last = pl.pallas_call(
        make_lstm_kernel(T, t_blk, H, unroll),
        out_shape=jax.ShapeDtypeStruct((B_pad, H), jnp.float32),
        grid_spec=grid_spec,
        compiler_params=pltpu.CompilerParams(
            # Batch is embarrassingly parallel (v7x megacore shard); time is a
            # true recurrence.
            dimension_semantics=("parallel", "arbitrary"),
            vmem_limit_bytes=vmem_limit),
    )(gx, w_hh_p.astype(jnp.bfloat16))

    # Dropout is identity at inference.
    # TODO(synk): training-mode dropout (Bernoulli mask via pltpu.prng_*) not emitted.
    # Tiny fc head (256 -> 4) left to XLA: a 4-lane output inside the kernel
    # would force masked partial stores and waste an MXU pass.
    return h_last[:B] @ w_fc + b_fc


def init_params(key, input_size=INPUT_SIZE, hidden=HIDDEN_SIZE,
                num_classes=NUM_CLASSES):
    """Deterministic params matching torch.nn.LSTM / nn.Linear shapes.

    PyTorch stores weight_ih_l0 as (4H, input) and weight_hh_l0 as (4H, H);
    we keep the transposed (in, out) layout for row-major matmuls. Gate order
    is PyTorch's [i, f, g, o]; the wrapper permutes internally.
    """
    k1, k2, k3, k4, k5, k6 = jax.random.split(key, 6)
    s_lstm = 1.0 / jnp.sqrt(hidden)
    s_fc = 1.0 / jnp.sqrt(hidden)
    w_ih = jax.random.uniform(k1, (input_size, 4 * hidden), jnp.float32,
                              -s_lstm, s_lstm)
    w_hh = jax.random.uniform(k2, (hidden, 4 * hidden), jnp.float32,
                              -s_lstm, s_lstm)
    b_ih = jax.random.uniform(k3, (4 * hidden,), jnp.float32, -s_lstm, s_lstm)
    b_hh = jax.random.uniform(k4, (4 * hidden,), jnp.float32, -s_lstm, s_lstm)
    b = (b_ih + b_hh).reshape(1, 4 * hidden)
    w_fc = jax.random.uniform(k5, (hidden, num_classes), jnp.float32,
                              -s_fc, s_fc)
    b_fc = jax.random.uniform(k6, (1, num_classes), jnp.float32, -s_fc, s_fc)
    return w_ih, w_hh, b, w_fc, b_fc


def reference_forward(x, w_ih, w_hh, b, w_fc, b_fc):
    """Pure-JAX f32 LSTM reference (PyTorch gate order i,f,g,o)."""
    B, T, D = x.shape
    H = w_hh.shape[0]

    def step(carry, x_t):
        h, c = carry
        gates = x_t @ w_ih + h @ w_hh + b
        i_g = jax.nn.sigmoid(gates[:, 0 * H:1 * H])
        f_g = jax.nn.sigmoid(gates[:, 1 * H:2 * H])
        g_g = jnp.tanh(gates[:, 2 * H:3 * H])
        o_g = jax.nn.sigmoid(gates[:, 3 * H:4 * H])
        c = f_g * c + i_g * g_g
        h = o_g * jnp.tanh(c)
        return (h, c), None

    h0 = jnp.zeros((B, H), jnp.float32)
    c0 = jnp.zeros((B, H), jnp.float32)
    (h_last, _), _ = jax.lax.scan(step, (h0, c0),
                                  jnp.transpose(x, (1, 0, 2)))
    return h_last @ w_fc + b_fc


if __name__ == "__main__":
    key = jax.random.PRNGKey(0)
    k_param, k_x = jax.random.split(key)

    B, T = 2, 8
    x = jax.random.normal(k_x, (B, T, INPUT_SIZE), jnp.float32)
    params = init_params(k_param)

    logits = crimenet_forward(x, *params)
    logits = jax.block_until_ready(logits)

    ref = reference_forward(x, *params)
    assert logits.shape == (B, NUM_CLASSES)
    max_diff = jnp.max(jnp.abs(logits - ref))
    assert jnp.allclose(logits, ref, rtol=2e-2, atol=2e-2), (
        f"mismatch: max abs diff {max_diff}")

    print("KERNEL_OK")
</pallas_src>

<mosaic_0001>
module attributes {stable_mosaic.version = 11 : i64} {
  func.func @kernel(%arg0: i32, %arg1: i32, %arg2: memref<8x8x1024xbf16, #tpu.memory_space<vmem>>, %arg3: memref<256x1024xbf16, #tpu.memory_space<vmem>>, %arg4: memref<8x256xf32, #tpu.memory_space<vmem>>, %arg5: memref<8x256xf32, #tpu.memory_space<vmem>>) attributes {dimension_semantics = [#tpu.dimension_semantics<parallel>, #tpu.dimension_semantics<arbitrary>], iteration_bounds = array<i64: 1, 1>, scalar_prefetch = 0 : i64, scratch_operands = 1 : i64, tpu.core_type = #tpu.core_type<tc>, window_params = [{transform_indices = @transform_0, window_bounds = array<i64: 8, 8, 1024>}, {pipeline_mode = #tpu.pipeline_mode<synchronous>, transform_indices = @transform_1, window_bounds = array<i64: 256, 1024>}, {transform_indices = @transform_2, window_bounds = array<i64: 8, 256>}]} {
    %c0_i32 = arith.constant 0 : i32
    %0 = arith.cmpi eq, %arg1, %c0_i32 : i32
    %1 = arith.extui %0 : i1 to i32
    %c0_i32_0 = arith.constant 0 : i32
    %2 = arith.cmpi ne, %1, %c0_i32_0 : i32
    scf.if %2 {
      %cst_50 = arith.constant 0.000000e+00 : f32
      %200 = vector.broadcast %cst_50 : f32 to vector<8x256xf32>
      %c0_51 = arith.constant 0 : index
      %c0_52 = arith.constant 0 : index
      %201 = vector.load %arg4[%c0_51, %c0_52] : memref<8x256xf32, #tpu.memory_space<vmem>>, vector<8x256xf32>
      tpu.vector_store %arg4[%c0_51, %c0_52], %200 {strides = array<i32>} : memref<8x256xf32, #tpu.memory_space<vmem>>, vector<8x256xf32>,
      %cst_53 = arith.constant 0.000000e+00 : f32
      %202 = vector.broadcast %cst_53 : f32 to vector<8x256xf32>
      %c0_54 = arith.constant 0 : index
      %c0_55 = arith.constant 0 : index
      %203 = vector.load %arg5[%c0_54, %c0_55] : memref<8x256xf32, #tpu.memory_space<vmem>>, vector<8x256xf32>
      tpu.vector_store %arg5[%c0_54, %c0_55], %202 {strides = array<i32>} : memref<8x256xf32, #tpu.memory_space<vmem>>, vector<8x256xf32>,
    } else {
    }
    %c0 = arith.constant 0 : index
    %c0_1 = arith.constant 0 : index
    %3 = vector.load %arg3[%c0, %c0_1] : memref<256x1024xbf16, #tpu.memory_space<vmem>>, vector<256x1024xbf16>
    %c0_2 = arith.constant 0 : index
    %c0_3 = arith.constant 0 : index
    %4 = vector.load %arg4[%c0_2, %c0_3] : memref<8x256xf32, #tpu.memory_space<vmem>>, vector<8x256xf32>
    %c0_4 = arith.constant 0 : index
    %c0_5 = arith.constant 0 : index
    %5 = vector.load %arg5[%c0_4, %c0_5] : memref<8x256xf32, #tpu.memory_space<vmem>>, vector<8x256xf32>
    %c0_i32_6 = arith.constant 0 : i32
    %6 = arith.index_cast %c0_i32_6 : i32 to index
    %c0_7 = arith.constant 0 : index
    %c0_8 = arith.constant 0 : index
    %7 = vector.load %arg2[%6, %c0_7, %c0_8] : memref<8x8x1024xbf16, #tpu.memory_space<vmem>>, vector<1x8x1024xbf16>
    %8 = vector.shape_cast %7 : vector<1x8x1024xbf16> to vector<8x1024xbf16>
    %9 = arith.extf %8 : vector<8x1024xbf16> to vector<8x1024xf32>
    %10 = arith.truncf %4 : vector<8x256xf32> to vector<8x256xbf16>
    %cst = arith.constant dense<0.000000e+00> : vector<8x1024xf32>
    %11 = tpu.matmul %10, %3, %cst {dimension_numbers = #tpu.dot_dimension_numbers<[1], [0], [0], [1], [0, 0, 1, 1], [], []>} : vector<8x256xbf16>, vector<256x1024xbf16>, vector<8x1024xf32> -> vector<8x1024xf32>
    %12 = arith.addf %9, %11 : vector<8x1024xf32>
    %13 = vector.extract_strided_slice %12 {offsets = [0, 0], sizes = [8, 768], strides = [1, 1]} : vector<8x1024xf32> to vector<8x768xf32>
    %cst_9 = arith.constant 0.000000e+00 : f32
    %14 = vector.broadcast %cst_9 : f32 to vector<8x768xf32>
    %15 = arith.subf %14, %13 : vector<8x768xf32>
    %16 = math.exp %15 : vector<8x768xf32>
    %cst_10 = arith.constant 1.000000e+00 : f32
    %17 = vector.broadcast %cst_10 : f32 to vector<8x768xf32>
    %18 = arith.addf %17, %16 : vector<8x768xf32>
    %19 = tpu.reciprocal %18 {approx = true} : vector<8x768xf32> -> vector<8x768xf32>
    %20 = vector.extract_strided_slice %19 {offsets = [0, 0], sizes = [8, 256], strides = [1, 1]} : vector<8x768xf32> to vector<8x256xf32>
    %21 = vector.extract_strided_slice %19 {offsets = [0, 256], sizes = [8, 256], strides = [1, 1]} : vector<8x768xf32> to vector<8x256xf32>
    %22 = vector.extract_strided_slice %19 {offsets = [0, 512], sizes = [8, 256], strides = [1, 1]} : vector<8x768xf32> to vector<8x256xf32>
    %23 = vector.extract_strided_slice %12 {offsets = [0, 768], sizes = [8, 256], strides = [1, 1]} : vector<8x1024xf32> to vector<8x256xf32>
    %24 = math.tanh %23 : vector<8x256xf32>
    %25 = arith.mulf %21, %5 : vector<8x256xf32>
    %26 = arith.mulf %20, %24 : vector<8x256xf32>
    %27 = arith.addf %25, %26 : vector<8x256xf32>
    %28 = math.tanh %27 : vector<8x256xf32>
    %29 = arith.mulf %22, %28 : vector<8x256xf32>
    %c1_i32 = arith.constant 1 : i32
    %30 = arith.index_cast %c1_i32 : i32 to index
    %c0_11 = arith.constant 0 : index
    %c0_12 = arith.constant 0 : index
    %31 = vector.load %arg2[%30, %c0_11, %c0_12] : memref<8x8x1024xbf16, #tpu.memory_space<vmem>>, vector<1x8x1024xbf16>
    %32 = vector.shape_cast %31 : vector<1x8x1024xbf16> to vector<8x1024xbf16>
    %33 = arith.extf %32 : vector<8x1024xbf16> to vector<8x1024xf32>
    %34 = arith.truncf %29 : vector<8x256xf32> to vector<8x256xbf16>
    %cst_13 = arith.constant dense<0.000000e+00> : vector<8x1024xf32>
    %35 = tpu.matmul %34, %3, %cst_13 {dimension_numbers = #tpu.dot_dimension_numbers<[1], [0], [0], [1], [0, 0, 1, 1], [], []>} : vector<8x256xbf16>, vector<256x1024xbf16>, vector<8x1024xf32> -> vector<8x1024xf32>
    %36 = arith.addf %33, %35 : vector<8x1024xf32>
    %37 = vector.extract_strided_slice %36 {offsets = [0, 0], sizes = [8, 768], strides = [1, 1]} : vector<8x1024xf32> to vector<8x768xf32>
    %cst_14 = arith.constant 0.000000e+00 : f32
    %38 = vector.broadcast %cst_14 : f32 to vector<8x768xf32>
    %39 = arith.subf %38, %37 : vector<8x768xf32>
    %40 = math.exp %39 : vector<8x768xf32>
    %cst_15 = arith.constant 1.000000e+00 : f32
    %41 = vector.broadcast %cst_15 : f32 to vector<8x768xf32>
    %42 = arith.addf %41, %40 : vector<8x768xf32>
    %43 = tpu.reciprocal %42 {approx = true} : vector<8x768xf32> -> vector<8x768xf32>
    %44 = vector.extract_strided_slice %43 {offsets = [0, 0], sizes = [8, 256], strides = [1, 1]} : vector<8x768xf32> to vector<8x256xf32>
    %45 = vector.extract_strided_slice %43 {offsets = [0, 256], sizes = [8, 256], strides = [1, 1]} : vector<8x768xf32> to vector<8x256xf32>
    %46 = vector.extract_strided_slice %43 {offsets = [0, 512], sizes = [8, 256], strides = [1, 1]} : vector<8x768xf32> to vector<8x256xf32>
    %47 = vector.extract_strided_slice %36 {offsets = [0, 768], sizes = [8, 256], strides = [1, 1]} : vector<8x1024xf32> to vector<8x256xf32>
    %48 = math.tanh %47 : vector<8x256xf32>
    %49 = arith.mulf %45, %27 : vector<8x256xf32>
    %50 = arith.mulf %44, %48 : vector<8x256xf32>
    %51 = arith.addf %49, %50 : vector<8x256xf32>
    %52 = math.tanh %51 : vector<8x256xf32>
    %53 = arith.mulf %46, %52 : vector<8x256xf32>
    %c2_i32 = arith.constant 2 : i32
    %54 = arith.index_cast %c2_i32 : i32 to index
    %c0_16 = arith.constant 0 : index
    %c0_17 = arith.constant 0 : index
    %55 = vector.load %arg2[%54, %c0_16, %c0_17] : memref<8x8x1024xbf16, #tpu.memory_space<vmem>>, vector<1x8x1024xbf16>
    %56 = vector.shape_cast %55 : vector<1x8x1024xbf16> to vector<8x1024xbf16>
    %57 = arith.extf %56 : vector<8x1024xbf16> to vector<8x1024xf32>
    %58 = arith.truncf %53 : vector<8x256xf32> to vector<8x256xbf16>
    %cst_18 = arith.constant dense<0.000000e+00> : vector<8x1024xf32>
    %59 = tpu.matmul %58, %3, %cst_18 {dimension_numbers = #tpu.dot_dimension_numbers<[1], [0], [0], [1], [0, 0, 1, 1], [], []>} : vector<8x256xbf16>, vector<256x1024xbf16>, vector<8x1024xf32> -> vector<8x1024xf32>
    %60 = arith.addf %57, %59 : vector<8x1024xf32>
    %61 = vector.extract_strided_slice %60 {offsets = [0, 0], sizes = [8, 768], strides = [1, 1]} : vector<8x1024xf32> to vector<8x768xf32>
    %cst_19 = arith.constant 0.000000e+00 : f32
    %62 = vector.broadcast %cst_19 : f32 to vector<8x768xf32>
    %63 = arith.subf %62, %61 : vector<8x768xf32>
    %64 = math.exp %63 : vector<8x768xf32>
    %cst_20 = arith.constant 1.000000e+00 : f32
    %65 = vector.broadcast %cst_20 : f32 to vector<8x768xf32>
    %66 = arith.addf %65, %64 : vector<8x768xf32>
    %67 = tpu.reciprocal %66 {approx = true} : vector<8x768xf32> -> vector<8x768xf32>
    %68 = vector.extract_strided_slice %67 {offsets = [0, 0], sizes = [8, 256], strides = [1, 1]} : vector<8x768xf32> to vector<8x256xf32>
    %69 = vector.extract_strided_slice %67 {offsets = [0, 256], sizes = [8, 256], strides = [1, 1]} : vector<8x768xf32> to vector<8x256xf32>
    %70 = vector.extract_strided_slice %67 {offsets = [0, 512], sizes = [8, 256], strides = [1, 1]} : vector<8x768xf32> to vector<8x256xf32>
    %71 = vector.extract_strided_slice %60 {offsets = [0, 768], sizes = [8, 256], strides = [1, 1]} : vector<8x1024xf32> to vector<8x256xf32>
    %72 = math.tanh %71 : vector<8x256xf32>
    %73 = arith.mulf %69, %51 : vector<8x256xf32>
    %74 = arith.mulf %68, %72 : vector<8x256xf32>
    %75 = arith.addf %73, %74 : vector<8x256xf32>
    %76 = math.tanh %75 : vector<8x256xf32>
    %77 = arith.mulf %70, %76 : vector<8x256xf32>
    %c3_i32 = arith.constant 3 : i32
    %78 = arith.index_cast %c3_i32 : i32 to index
    %c0_21 = arith.constant 0 : index
    %c0_22 = arith.constant 0 : index
    %79 = vector.load %arg2[%78, %c0_21, %c0_22] : memref<8x8x1024xbf16, #tpu.memory_space<vmem>>, vector<1x8x1024xbf16>
    %80 = vector.shape_cast %79 : vector<1x8x1024xbf16> to vector<8x1024xbf16>
    %81 = arith.extf %80 : vector<8x1024xbf16> to vector<8x1024xf32>
    %82 = arith.truncf %77 : vector<8x256xf32> to vector<8x256xbf16>
    %cst_23 = arith.constant dense<0.000000e+00> : vector<8x1024xf32>
    %83 = tpu.matmul %82, %3, %cst_23 {dimension_numbers = #tpu.dot_dimension_numbers<[1], [0], [0], [1], [0, 0, 1, 1], [], []>} : vector<8x256xbf16>, vector<256x1024xbf16>, vector<8x1024xf32> -> vector<8x1024xf32>
    %84 = arith.addf %81, %83 : vector<8x1024xf32>
    %85 = vector.extract_strided_slice %84 {offsets = [0, 0], sizes = [8, 768], strides = [1, 1]} : vector<8x1024xf32> to vector<8x768xf32>
    %cst_24 = arith.constant 0.000000e+00 : f32
    %86 = vector.broadcast %cst_24 : f32 to vector<8x768xf32>
    %87 = arith.subf %86, %85 : vector<8x768xf32>
    %88 = math.exp %87 : vector<8x768xf32>
    %cst_25 = arith.constant 1.000000e+00 : f32
    %89 = vector.broadcast %cst_25 : f32 to vector<8x768xf32>
    %90 = arith.addf %89, %88 : vector<8x768xf32>
    %91 = tpu.reciprocal %90 {approx = true} : vector<8x768xf32> -> vector<8x768xf32>
    %92 = vector.extract_strided_slice %91 {offsets = [0, 0], sizes = [8, 256], strides = [1, 1]} : vector<8x768xf32> to vector<8x256xf32>
    %93 = vector.extract_strided_slice %91 {offsets = [0, 256], sizes = [8, 256], strides = [1, 1]} : vector<8x768xf32> to vector<8x256xf32>
    %94 = vector.extract_strided_slice %91 {offsets = [0, 512], sizes = [8, 256], strides = [1, 1]} : vector<8x768xf32> to vector<8x256xf32>
    %95 = vector.extract_strided_slice %84 {offsets = [0, 768], sizes = [8, 256], strides = [1, 1]} : vector<8x1024xf32> to vector<8x256xf32>
    %96 = math.tanh %95 : vector<8x256xf32>
    %97 = arith.mulf %93, %75 : vector<8x256xf32>
    %98 = arith.mulf %92, %96 : vector<8x256xf32>
    %99 = arith.addf %97, %98 : vector<8x256xf32>
    %100 = math.tanh %99 : vector<8x256xf32>
    %101 = arith.mulf %94, %100 : vector<8x256xf32>
    %c4_i32 = arith.constant 4 : i32
    %102 = arith.index_cast %c4_i32 : i32 to index
    %c0_26 = arith.constant 0 : index
    %c0_27 = arith.constant 0 : index
    %103 = vector.load %arg2[%102, %c0_26, %c0_27] : memref<8x8x1024xbf16, #tpu.memory_space<vmem>>, vector<1x8x1024xbf16>
    %104 = vector.shape_cast %103 : vector<1x8x1024xbf16> to vector<8x1024xbf16>
    %105 = arith.extf %104 : vector<8x1024xbf16> to vector<8x1024xf32>
    %106 = arith.truncf %101 : vector<8x256xf32> to vector<8x256xbf16>
    %cst_28 = arith.constant dense<0.000000e+00> : vector<8x1024xf32>
    %107 = tpu.matmul %106, %3, %cst_28 {dimension_numbers = #tpu.dot_dimension_numbers<[1], [0], [0], [1], [0, 0, 1, 1], [], []>} : vector<8x256xbf16>, vector<256x1024xbf16>, vector<8x1024xf32> -> vector<8x1024xf32>
    %108 = arith.addf %105, %107 : vector<8x1024xf32>
    %109 = vector.extract_strided_slice %108 {offsets = [0, 0], sizes = [8, 768], strides = [1, 1]} : vector<8x1024xf32> to vector<8x768xf32>
    %cst_29 = arith.constant 0.000000e+00 : f32
    %110 = vector.broadcast %cst_29 : f32 to vector<8x768xf32>
    %111 = arith.subf %110, %109 : vector<8x768xf32>
    %112 = math.exp %111 : vector<8x768xf32>
    %cst_30 = arith.constant 1.000000e+00 : f32
    %113 = vector.broadcast %cst_30 : f32 to vector<8x768xf32>
    %114 = arith.addf %113, %112 : vector<8x768xf32>
    %115 = tpu.reciprocal %114 {approx = true} : vector<8x768xf32> -> vector<8x768xf32>
    %116 = vector.extract_strided_slice %115 {offsets = [0, 0], sizes = [8, 256], strides = [1, 1]} : vector<8x768xf32> to vector<8x256xf32>
    %117 = vector.extract_strided_slice %115 {offsets = [0, 256], sizes = [8, 256], strides = [1, 1]} : vector<8x768xf32> to vector<8x256xf32>
    %118 = vector.extract_strided_slice %115 {offsets = [0, 512], sizes = [8, 256], strides = [1, 1]} : vector<8x768xf32> to vector<8x256xf32>
    %119 = vector.extract_strided_slice %108 {offsets = [0, 768], sizes = [8, 256], strides = [1, 1]} : vector<8x1024xf32> to vector<8x256xf32>
    %120 = math.tanh %119 : vector<8x256xf32>
    %121 = arith.mulf %117, %99 : vector<8x256xf32>
    %122 = arith.mulf %116, %120 : vector<8x256xf32>
    %123 = arith.addf %121, %122 : vector<8x256xf32>
    %124 = math.tanh %123 : vector<8x256xf32>
    %125 = arith.mulf %118, %124 : vector<8x256xf32>
    %c5_i32 = arith.constant 5 : i32
    %126 = arith.index_cast %c5_i32 : i32 to index
    %c0_31 = arith.constant 0 : index
    %c0_32 = arith.constant 0 : index
    %127 = vector.load %arg2[%126, %c0_31, %c0_32] : memref<8x8x1024xbf16, #tpu.memory_space<vmem>>, vector<1x8x1024xbf16>
    %128 = vector.shape_cast %127 : vector<1x8x1024xbf16> to vector<8x1024xbf16>
    %129 = arith.extf %128 : vector<8x1024xbf16> to vector<8x1024xf32>
    %130 = arith.truncf %125 : vector<8x256xf32> to vector<8x256xbf16>
    %cst_33 = arith.constant dense<0.000000e+00> : vector<8x1024xf32>
    %131 = tpu.matmul %130, %3, %cst_33 {dimension_numbers = #tpu.dot_dimension_numbers<[1], [0], [0], [1], [0, 0, 1, 1], [], []>} : vector<8x256xbf16>, vector<256x1024xbf16>, vector<8x1024xf32> -> vector<8x1024xf32>
    %132 = arith.addf %129, %131 : vector<8x1024xf32>
    %133 = vector.extract_strided_slice %132 {offsets = [0, 0], sizes = [8, 768], strides = [1, 1]} : vector<8x1024xf32> to vector<8x768xf32>
    %cst_34 = arith.constant 0.000000e+00 : f32
    %134 = vector.broadcast %cst_34 : f32 to vector<8x768xf32>
    %135 = arith.subf %134, %133 : vector<8x768xf32>
    %136 = math.exp %135 : vector<8x768xf32>
    %cst_35 = arith.constant 1.000000e+00 : f32
    %137 = vector.broadcast %cst_35 : f32 to vector<8x768xf32>
    %138 = arith.addf %137, %136 : vector<8x768xf32>
    %139 = tpu.reciprocal %138 {approx = true} : vector<8x768xf32> -> vector<8x768xf32>
    %140 = vector.extract_strided_slice %139 {offsets = [0, 0], sizes = [8, 256], strides = [1, 1]} : vector<8x768xf32> to vector<8x256xf32>
    %141 = vector.extract_strided_slice %139 {offsets = [0, 256], sizes = [8, 256], strides = [1, 1]} : vector<8x768xf32> to vector<8x256xf32>
    %142 = vector.extract_strided_slice %139 {offsets = [0, 512], sizes = [8, 256], strides = [1, 1]} : vector<8x768xf32> to vector<8x256xf32>
    %143 = vector.extract_strided_slice %132 {offsets = [0, 768], sizes = [8, 256], strides = [1, 1]} : vector<8x1024xf32> to vector<8x256xf32>
    %144 = math.tanh %143 : vector<8x256xf32>
    %145 = arith.mulf %141, %123 : vector<8x256xf32>
    %146 = arith.mulf %140, %144 : vector<8x256xf32>
    %147 = arith.addf %145, %146 : vector<8x256xf32>
    %148 = math.tanh %147 : vector<8x256xf32>
    %149 = arith.mulf %142, %148 : vector<8x256xf32>
    %c6_i32 = arith.constant 6 : i32
    %150 = arith.index_cast %c6_i32 : i32 to index
    %c0_36 = arith.constant 0 : index
    %c0_37 = arith.constant 0 : index
    %151 = vector.load %arg2[%150, %c0_36, %c0_37] : memref<8x8x1024xbf16, #tpu.memory_space<vmem>>, vector<1x8x1024xbf16>
    %152 = vector.shape_cast %151 : vector<1x8x1024xbf16> to vector<8x1024xbf16>
    %153 = arith.extf %152 : vector<8x1024xbf16> to vector<8x1024xf32>
    %154 = arith.truncf %149 : vector<8x256xf32> to vector<8x256xbf16>
    %cst_38 = arith.constant dense<0.000000e+00> : vector<8x1024xf32>
    %155 = tpu.matmul %154, %3, %cst_38 {dimension_numbers = #tpu.dot_dimension_numbers<[1], [0], [0], [1], [0, 0, 1, 1], [], []>} : vector<8x256xbf16>, vector<256x1024xbf16>, vector<8x1024xf32> -> vector<8x1024xf32>
    %156 = arith.addf %153, %155 : vector<8x1024xf32>
    %157 = vector.extract_strided_slice %156 {offsets = [0, 0], sizes = [8, 768], strides = [1, 1]} : vector<8x1024xf32> to vector<8x768xf32>
    %cst_39 = arith.constant 0.000000e+00 : f32
    %158 = vector.broadcast %cst_39 : f32 to vector<8x768xf32>
    %159 = arith.subf %158, %157 : vector<8x768xf32>
    %160 = math.exp %159 : vector<8x768xf32>
    %cst_40 = arith.constant 1.000000e+00 : f32
    %161 = vector.broadcast %cst_40 : f32 to vector<8x768xf32>
    %162 = arith.addf %161, %160 : vector<8x768xf32>
    %163 = tpu.reciprocal %162 {approx = true} : vector<8x768xf32> -> vector<8x768xf32>
    %164 = vector.extract_strided_slice %163 {offsets = [0, 0], sizes = [8, 256], strides = [1, 1]} : vector<8x768xf32> to vector<8x256xf32>
    %165 = vector.extract_strided_slice %163 {offsets = [0, 256], sizes = [8, 256], strides = [1, 1]} : vector<8x768xf32> to vector<8x256xf32>
    %166 = vector.extract_strided_slice %163 {offsets = [0, 512], sizes = [8, 256], strides = [1, 1]} : vector<8x768xf32> to vector<8x256xf32>
    %167 = vector.extract_strided_slice %156 {offsets = [0, 768], sizes = [8, 256], strides = [1, 1]} : vector<8x1024xf32> to vector<8x256xf32>
    %168 = math.tanh %167 : vector<8x256xf32>
    %169 = arith.mulf %165, %147 : vector<8x256xf32>
    %170 = arith.mulf %164, %168 : vector<8x256xf32>
    %171 = arith.addf %169, %170 : vector<8x256xf32>
    %172 = math.tanh %171 : vector<8x256xf32>
    %173 = arith.mulf %166, %172 : vector<8x256xf32>
    %c7_i32 = arith.constant 7 : i32
    %174 = arith.index_cast %c7_i32 : i32 to index
    %c0_41 = arith.constant 0 : index
    %c0_42 = arith.constant 0 : index
    %175 = vector.load %arg2[%174, %c0_41, %c0_42] : memref<8x8x1024xbf16, #tpu.memory_space<vmem>>, vector<1x8x1024xbf16>
    %176 = vector.shape_cast %175 : vector<1x8x1024xbf16> to vector<8x1024xbf16>
    %177 = arith.extf %176 : vector<8x1024xbf16> to vector<8x1024xf32>
    %178 = arith.truncf %173 : vector<8x256xf32> to vector<8x256xbf16>
    %cst_43 = arith.constant dense<0.000000e+00> : vector<8x1024xf32>
    %179 = tpu.matmul %178, %3, %cst_43 {dimension_numbers = #tpu.dot_dimension_numbers<[1], [0], [0], [1], [0, 0, 1, 1], [], []>} : vector<8x256xbf16>, vector<256x1024xbf16>, vector<8x1024xf32> -> vector<8x1024xf32>
    %180 = arith.addf %177, %179 : vector<8x1024xf32>
    %181 = vector.extract_strided_slice %180 {offsets = [0, 0], sizes = [8, 768], strides = [1, 1]} : vector<8x1024xf32> to vector<8x768xf32>
    %cst_44 = arith.constant 0.000000e+00 : f32
    %182 = vector.broadcast %cst_44 : f32 to vector<8x768xf32>
    %183 = arith.subf %182, %181 : vector<8x768xf32>
    %184 = math.exp %183 : vector<8x768xf32>
    %cst_45 = arith.constant 1.000000e+00 : f32
    %185 = vector.broadcast %cst_45 : f32 to vector<8x768xf32>
    %186 = arith.addf %185, %184 : vector<8x768xf32>
    %187 = tpu.reciprocal %186 {approx = true} : vector<8x768xf32> -> vector<8x768xf32>
    %188 = vector.extract_strided_slice %187 {offsets = [0, 0], sizes = [8, 256], strides = [1, 1]} : vector<8x768xf32> to vector<8x256xf32>
    %189 = vector.extract_strided_slice %187 {offsets = [0, 256], sizes = [8, 256], strides = [1, 1]} : vector<8x768xf32> to vector<8x256xf32>
    %190 = vector.extract_strided_slice %187 {offsets = [0, 512], sizes = [8, 256], strides = [1, 1]} : vector<8x768xf32> to vector<8x256xf32>
    %191 = vector.extract_strided_slice %180 {offsets = [0, 768], sizes = [8, 256], strides = [1, 1]} : vector<8x1024xf32> to vector<8x256xf32>
    %192 = math.tanh %191 : vector<8x256xf32>
    %193 = arith.mulf %189, %171 : vector<8x256xf32>
    %194 = arith.mulf %188, %192 : vector<8x256xf32>
    %195 = arith.addf %193, %194 : vector<8x256xf32>
    %196 = math.tanh %195 : vector<8x256xf32>
    %197 = arith.mulf %190, %196 : vector<8x256xf32>
    %c8_i32 = arith.constant 8 : i32
    %c0_46 = arith.constant 0 : index
    %c0_47 = arith.constant 0 : index
    %198 = vector.load %arg4[%c0_46, %c0_47] : memref<8x256xf32, #tpu.memory_space<vmem>>, vector<8x256xf32>
    tpu.vector_store %arg4[%c0_46, %c0_47], %197 {strides = array<i32>} : memref<8x256xf32, #tpu.memory_space<vmem>>, vector<8x256xf32>,
    %c0_48 = arith.constant 0 : index
    %c0_49 = arith.constant 0 : index
    %199 = vector.load %arg5[%c0_48, %c0_49] : memref<8x256xf32, #tpu.memory_space<vmem>>, vector<8x256xf32>
    tpu.vector_store %arg5[%c0_48, %c0_49], %195 {strides = array<i32>} : memref<8x256xf32, #tpu.memory_space<vmem>>, vector<8x256xf32>,
    return
  }
  func.func @transform_0(%arg0: i32, %arg1: i32) -> (i32, i32, i32) {
    %c0_i32 = arith.constant 0 : i32
    %c0_i32_0 = arith.constant 0 : i32
    return %arg1, %arg0, %c0_i32 : i32, i32, i32
  }
  func.func @transform_1(%arg0: i32, %arg1: i32) -> (i32, i32) {
    %c0_i32 = arith.constant 0 : i32
    %c0_i32_0 = arith.constant 0 : i32
    %c0_i32_1 = arith.constant 0 : i32
    return %c0_i32, %c0_i32_0 : i32, i32
  }
  func.func @transform_2(%arg0: i32, %arg1: i32) -> (i32, i32) {
    %c0_i32 = arith.constant 0 : i32
    %c0_i32_0 = arith.constant 0 : i32
    return %arg0, %c0_i32 : i32, i32
  }
}

</mosaic_0001>

<bundles_post_ra>
// kernel: crimenet_forward.1
= control target key start
LH: loop header
LB: loop body
LE: loop exit
PB: predicated region body
PF: predicated region fallthrough
CT: control target
= control target key end

     0   :  { %v4934_v14 = vmov 0.0|0.0   ;;  %s4931_s1 = inlined_call_operand.vmem [shape: bf16[256,1024], index: 1, kind: input, shape index: {}]   ;;  %s4932_s0 = inlined_call_operand.vmem [shape: bf16[8,8,1024], index: 0, kind: input, shape index: {}]   ;;  %s4933_s2 = inlined_call_operand.vmem [shape: f32[8,256], index: 2, kind: output, shape index: {}]  }
   0x1   :  { %v75_v0 = vld [vmem:[%s4931_s1 + $0x1c0] sm:$0xff]  ;;  %v76_v2 = vld [vmem:[%s4931_s1 + $0x1c8] sm:$0xff]  ;;  %837 = vmatprep.mubr.bf16.mxu0 %v4934_v14  ;;  %878 = vmatprep.mubr.bf16.mxu1 %v4934_v14 }
   0x2   :  { %v79_v1 = vld [vmem:[%s4931_s1 + $0x1e0] sm:$0xff]  ;;  %v80_v4 = vld [vmem:[%s4931_s1 + $0x1e8] sm:$0xff] }
   0x3   :  { %v3068_v3 = vcombine.high %v75_v0, %v79_v1  ;;  %v3073_v5 = vcombine.low %v75_v0, %v79_v1  ;;  %v67_v6 = vld [vmem:[%s4931_s1 + $0x180] sm:$0xff]  ;;  %v3081_v8 = vcombine.high %v76_v2, %v80_v4  ;;  %v3083_v9 = vcombine.low %v76_v2, %v80_v4  ;;  %v68_v11 = vld [vmem:[%s4931_s1 + $0x188] sm:$0xff] }
   0x4   :  { %v71_v7 = vld [vmem:[%s4931_s1 + $0x1a0] sm:$0xff]  ;;  %v72_v12 = vld [vmem:[%s4931_s1 + $0x1a8] sm:$0xff] }
   0x5   :  { %5206 = vst [vmem:[#allocation3_spill] sm:$0xff] %v3068_v3  ;;  %5207 = vst [vmem:[#allocation4_spill] sm:$0xff] %v3073_v5  ;;  %v3085_v10 = vcombine.high %v67_v6, %v71_v7  ;;  %v59_v13 = vld [vmem:[%s4931_s1 + $0x140] sm:$0xff]  ;;  %805 = vmatprep.subr.bf16.mxu0 %v3068_v3  ;;  %v3098_v15 = vcombine.high %v68_v11, %v72_v12  ;;  %v60_v17 = vld [vmem:[%s4931_s1 + $0x148] sm:$0xff]  ;;  %846 = vmatprep.subr.bf16.mxu1 %v3081_v8 }
   0x6   :  { %5208 = vst [vmem:[#allocation5_spill] sm:$0xff] %v3081_v8  ;;  %5209 = vst [vmem:[#allocation6_spill] sm:$0xff] %v3083_v9  ;;  %v63_v16 = vld [vmem:[%s4931_s1 + $0x160] sm:$0xff]  ;;  %v64_v18 = vld [vmem:[%s4931_s1 + $0x168] sm:$0xff]  ;;  %806 = vmatpush1.bf16.msra.mxu0 %v3073_v5  ;;  %v3112_v19 = vcombine.low %v67_v6, %v71_v7  ;;  %847 = vmatpush1.bf16.msra.mxu1 %v3083_v9  ;;  %v3116_v20 = vcombine.low %v68_v11, %v72_v12 }
   0x7   :  { %5210 = vst [vmem:[#allocation7_spill] sm:$0xff] %v3085_v10  ;;  %5211 = vst [vmem:[#allocation8_spill] sm:$0xff] %v3098_v15  ;;  %807 = vmatprep.subr.bf16.mxu0 %v3085_v10  ;;  %v3118_v21 = vcombine.high %v59_v13, %v63_v16  ;;  %848 = vmatprep.subr.bf16.mxu1 %v3098_v15  ;;  %v3121_v22 = vcombine.high %v60_v17, %v64_v18  ;;  %v51_v23 = vld [vmem:[%s4931_s1 + $0x100] sm:$0xff]  ;;  %v52_v25 = vld [vmem:[%s4931_s1 + $0x108] sm:$0xff] }
   0x8   :  { %5212 = vst [vmem:[#allocation9_spill] sm:$0xff] %v3112_v19  ;;  %5213 = vst [vmem:[#allocation10_spill] sm:$0xff] %v3116_v20  ;;  %v55_v24 = vld [vmem:[%s4931_s1 + $0x120] sm:$0xff]  ;;  %v56_v26 = vld [vmem:[%s4931_s1 + $0x128] sm:$0xff]  ;;  %v3136_v27 = vcombine.low %v59_v13, %v63_v16  ;;  %v3140_v28 = vcombine.low %v60_v17, %v64_v18 }
   0x9   :  { %5214 = vst [vmem:[#allocation11_spill] sm:$0xff] %v3118_v21  ;;  %5215 = vst [vmem:[#allocation12_spill] sm:$0xff] %v3121_v22  ;;  %v3142_v29 = vcombine.high %v51_v23, %v55_v24  ;;  %v3145_v30 = vcombine.high %v52_v25, %v56_v26  ;;  %v43_v31 = vld [vmem:[%s4931_s1 + $0xc0] sm:$0xff]  ;;  %v44_v33 = vld [vmem:[%s4931_s1 + $0xc8] sm:$0xff]  ;;  %v3160_v35 = vcombine.low %v51_v23, %v55_v24 }
   0xa   :  { %808 = vmatpush1.bf16.msra.mxu0 %v3112_v19  ;;  %5216 = vst [vmem:[#allocation13_spill] sm:$0xff] %v3136_v27  ;;  %849 = vmatpush1.bf16.msra.mxu1 %v3116_v20  ;;  %5217 = vst [vmem:[#allocation14_spill] sm:$0xff] %v3140_v28  ;;  %v47_v32 = vld [vmem:[%s4931_s1 + $0xe0] sm:$0xff]  ;;  %v48_v34 = vld [vmem:[%s4931_s1 + $0xe8] sm:$0xff]  ;;  %v3164_v36 = vcombine.low %v52_v25, %v56_v26 }
   0xb   :  { %809 = vmatprep.subr.bf16.mxu0 %v3118_v21  ;;  %5218 = vst [vmem:[#allocation15_spill] sm:$0xff] %v3142_v29  ;;  %850 = vmatprep.subr.bf16.mxu1 %v3121_v22  ;;  %5219 = vst [vmem:[#allocation16_spill] sm:$0xff] %v3145_v30  ;;  %v3166_v37 = vcombine.high %v43_v31, %v47_v32  ;;  %v3169_v38 = vcombine.high %v44_v33, %v48_v34  ;;  %v35_v39 = vld [vmem:[%s4931_s1 + $0x80] sm:$0xff]  ;;  %v36_v41 = vld [vmem:[%s4931_s1 + $0x88] sm:$0xff] }
   0xc   :  { %5220 = vst [vmem:[#allocation17_spill] sm:$0xff] %v3160_v35  ;;  %5221 = vst [vmem:[#allocation18_spill] sm:$0xff] %v3164_v36  ;;  %v39_v40 = vld [vmem:[%s4931_s1 + $0xa0] sm:$0xff]  ;;  %v40_v42 = vld [vmem:[%s4931_s1 + $0xa8] sm:$0xff]  ;;  %v3184_v43 = vcombine.low %v43_v31, %v47_v32  ;;  %v3188_v44 = vcombine.low %v44_v33, %v48_v34 }
   0xd   :  { %5222 = vst [vmem:[#allocation19_spill] sm:$0xff] %v3166_v37  ;;  %5223 = vst [vmem:[#allocation20_spill] sm:$0xff] %v3169_v38  ;;  %v3190_v45 = vcombine.high %v35_v39, %v39_v40  ;;  %v3193_v46 = vcombine.high %v36_v41, %v40_v42  ;;  %v27_v47 = vld [vmem:[%s4931_s1 + $0x40] sm:$0xff]  ;;  %v28_v49 = vld [vmem:[%s4931_s1 + $0x48] sm:$0xff]  ;;  %v3208_v51 = vcombine.low %v35_v39, %v39_v40 }
   0xe   :  { %810 = vmatpush1.bf16.msra.mxu0 %v3136_v27  ;;  %851 = vmatpush1.bf16.msra.mxu1 %v3140_v28  ;;  %5224 = vst [vmem:[#allocation21_spill] sm:$0xff] %v3184_v43  ;;  %5225 = vst [vmem:[#allocation22_spill] sm:$0xff] %v3188_v44  ;;  %v31_v48 = vld [vmem:[%s4931_s1 + $0x60] sm:$0xff]  ;;  %v32_v50 = vld [vmem:[%s4931_s1 + $0x68] sm:$0xff]  ;;  %v3212_v52 = vcombine.low %v36_v41, %v40_v42 }
   0xf   :  { %811 = vmatprep.subr.bf16.mxu0 %v3142_v29  ;;  %852 = vmatprep.subr.bf16.mxu1 %v3145_v30  ;;  %5226 = vst [vmem:[#allocation23_spill] sm:$0xff] %v3190_v45  ;;  %5227 = vst [vmem:[#allocation24_spill] sm:$0xff] %v3193_v46  ;;  %v3214_v53 = vcombine.high %v27_v47, %v31_v48  ;;  %v3217_v54 = vcombine.high %v28_v49, %v32_v50  ;;  %v19_v55 = vld [vmem:[%s4931_s1] sm:$0xff]  ;;  %v20_v57 = vld [vmem:[%s4931_s1 + $0x8] sm:$0xff] }
  0x10   :  { %5228 = vst [vmem:[#allocation25_spill] sm:$0xff] %v3208_v51  ;;  %5229 = vst [vmem:[#allocation26_spill] sm:$0xff] %v3212_v52  ;;  %v23_v56 = vld [vmem:[%s4931_s1 + $0x20] sm:$0xff]  ;;  %v24_v58 = vld [vmem:[%s4931_s1 + $0x28] sm:$0xff]  ;;  %v3232_v59 = vcombine.low %v27_v47, %v31_v48  ;;  %v3236_v60 = vcombine.low %v28_v49, %v32_v50 }
  0x11   :  { %5230 = vst [vmem:[#allocation27_spill] sm:$0xff] %v3214_v53  ;;  %5231 = vst [vmem:[#allocation28_spill] sm:$0xff] %v3217_v54  ;;  %v3238_v61 = vcombine.high %v19_v55, %v23_v56  ;;  %v3241_v62 = vcombine.high %v20_v57, %v24_v58  ;;  %v139_v63 = vld [vmem:[%s4931_s1 + $0x3c0] sm:$0xff]  ;;  %v140_v1 = vld [vmem:[%s4931_s1 + $0x3c8] sm:$0xff]  ;;  %v3256_v4 = vcombine.low %v19_v55, %v23_v56 }
  0x12   :  { %812 = vmatpush1.bf16.msra.mxu0 %v3160_v35  ;;  %853 = vmatpush1.bf16.msra.mxu1 %v3164_v36  ;;  %5232 = vst [vmem:[#allocation29_spill] sm:$0xff] %v3232_v59  ;;  %5233 = vst [vmem:[#allocation30_spill] sm:$0xff] %v3236_v60  ;;  %v143_v0 = vld [vmem:[%s4931_s1 + $0x3e0] sm:$0xff]  ;;  %v144_v2 = vld [vmem:[%s4931_s1 + $0x3e8] sm:$0xff]  ;;  %v3260_v6 = vcombine.low %v20_v57, %v24_v58 }
  0x13   :  { %813 = vmatprep.subr.bf16.mxu0 %v3166_v37  ;;  %854 = vmatprep.subr.bf16.mxu1 %v3169_v38  ;;  %5234 = vst [vmem:[#allocation31_spill] sm:$0xff] %v3238_v61  ;;  %5235 = vst [vmem:[#allocation32_spill] sm:$0xff] %v3241_v62  ;;  %v3262_v7 = vcombine.high %v139_v63, %v143_v0  ;;  %v3265_v11 = vcombine.high %v140_v1, %v144_v2  ;;  %v131_v12 = vld [vmem:[%s4931_s1 + $0x380] sm:$0xff]  ;;  %v132_v16 = vld [vmem:[%s4931_s1 + $0x388] sm:$0xff] }
  0x14   :  { %5236 = vst [vmem:[#allocation33_spill] sm:$0xff] %v3256_v4  ;;  %5237 = vst [vmem:[#allocation34_spill] sm:$0xff] %v3260_v6  ;;  %v135_v13 = vld [vmem:[%s4931_s1 + $0x3a0] sm:$0xff]  ;;  %v136_v17 = vld [vmem:[%s4931_s1 + $0x3a8] sm:$0xff]  ;;  %v3280_v18 = vcombine.low %v139_v63, %v143_v0  ;;  %v3284_v23 = vcombine.low %v140_v1, %v144_v2 }
  0x15   :  { %5238 = vst [vmem:[#allocation35_spill] sm:$0xff] %v3262_v7  ;;  %5239 = vst [vmem:[#allocation36_spill] sm:$0xff] %v3265_v11  ;;  %v3286_v24 = vcombine.high %v131_v12, %v135_v13  ;;  %v3289_v25 = vcombine.high %v132_v16, %v136_v17  ;;  %v123_v26 = vld [vmem:[%s4931_s1 + $0x340] sm:$0xff]  ;;  %v124_v32 = vld [vmem:[%s4931_s1 + $0x348] sm:$0xff]  ;;  %v3304_v34 = vcombine.low %v131_v12, %v135_v13 }
  0x16   :  { %814 = vmatpush1.bf16.msra.mxu0 %v3184_v43  ;;  %855 = vmatpush1.bf16.msra.mxu1 %v3188_v44  ;;  %5240 = vst [vmem:[#allocation37_spill] sm:$0xff] %v3280_v18  ;;  %5241 = vst [vmem:[#allocation38_spill] sm:$0xff] %v3284_v23  ;;  %v127_v31 = vld [vmem:[%s4931_s1 + $0x360] sm:$0xff]  ;;  %v128_v33 = vld [vmem:[%s4931_s1 + $0x368] sm:$0xff]  ;;  %v3308_v39 = vcombine.low %v132_v16, %v136_v17 }
  0x17   :  { %815 = vmatprep.subr.bf16.mxu0 %v3190_v45  ;;  %856 = vmatprep.subr.bf16.mxu1 %v3193_v46  ;;  %5242 = vst [vmem:[#allocation39_spill] sm:$0xff] %v3286_v24  ;;  %5243 = vst [vmem:[#allocation40_spill] sm:$0xff] %v3289_v25  ;;  %v3310_v40 = vcombine.high %v123_v26, %v127_v31  ;;  %v3313_v41 = vcombine.high %v124_v32, %v128_v33  ;;  %v115_v42 = vld [vmem:[%s4931_s1 + $0x300] sm:$0xff]  ;;  %v116_v48 = vld [vmem:[%s4931_s1 + $0x308] sm:$0xff] }
  0x18   :  { %5244 = vst [vmem:[#allocation41_spill] sm:$0xff] %v3304_v34  ;;  %5245 = vst [vmem:[#allocation42_spill] sm:$0xff] %v3308_v39  ;;  %v119_v47 = vld [vmem:[%s4931_s1 + $0x320] sm:$0xff]  ;;  %v120_v49 = vld [vmem:[%s4931_s1 + $0x328] sm:$0xff]  ;;  %v3328_v50 = vcombine.low %v123_v26, %v127_v31  ;;  %v3332_v55 = vcombine.low %v124_v32, %v128_v33 }
  0x19   :  { %5246 = vst [vmem:[#allocation43_spill] sm:$0xff] %v3310_v40  ;;  %5247 = vst [vmem:[#allocation44_spill] sm:$0xff] %v3313_v41  ;;  %v3334_v56 = vcombine.high %v115_v42, %v119_v47  ;;  %v3337_v57 = vcombine.high %v116_v48, %v120_v49  ;;  %v107_v58 = vld [vmem:[%s4931_s1 + $0x2c0] sm:$0xff]  ;;  %v108_v0 = vld [vmem:[%s4931_s1 + $0x2c8] sm:$0xff]  ;;  %v3352_v2 = vcombine.low %v115_v42, %v119_v47 }
  0x1a   :  { %816 = vmatpush1.bf16.msra.mxu0 %v3208_v51  ;;  %857 = vmatpush1.bf16.msra.mxu1 %v3212_v52  ;;  %5248 = vst [vmem:[#allocation45_spill] sm:$0xff] %v3328_v50  ;;  %5249 = vst [vmem:[#allocation46_spill] sm:$0xff] %v3332_v55  ;;  %v111_v63 = vld [vmem:[%s4931_s1 + $0x2e0] sm:$0xff]  ;;  %v112_v1 = vld [vmem:[%s4931_s1 + $0x2e8] sm:$0xff]  ;;  %v3356_v12 = vcombine.low %v116_v48, %v120_v49 }
  0x1b   :  { %817 = vmatprep.subr.bf16.mxu0 %v3214_v53  ;;  %858 = vmatprep.subr.bf16.mxu1 %v3217_v54  ;;  %5250 = vst [vmem:[#allocation47_spill] sm:$0xff] %v3334_v56  ;;  %5251 = vst [vmem:[#allocation48_spill] sm:$0xff] %v3337_v57  ;;  %v3358_v13 = vcombine.high %v107_v58, %v111_v63  ;;  %v3361_v16 = vcombine.high %v108_v0, %v112_v1  ;;  %v99_v17 = vld [vmem:[%s4931_s1 + $0x280] sm:$0xff]  ;;  %v100_v31 = vld [vmem:[%s4931_s1 + $0x288] sm:$0xff] }
  0x1c   :  { %5252 = vst [vmem:[#allocation49_spill] sm:$0xff] %v3352_v2  ;;  %5253 = vst [vmem:[#allocation50_spill] sm:$0xff] %v3356_v12  ;;  %v103_v26 = vld [vmem:[%s4931_s1 + $0x2a0] sm:$0xff]  ;;  %v104_v32 = vld [vmem:[%s4931_s1 + $0x2a8] sm:$0xff]  ;;  %v3376_v33 = vcombine.low %v107_v58, %v111_v63  ;;  %v3380_v42 = vcombine.low %v108_v0, %v112_v1 }
  0x1d   :  { %5254 = vst [vmem:[#allocation51_spill] sm:$0xff] %v3358_v13  ;;  %5255 = vst [vmem:[#allocation52_spill] sm:$0xff] %v3361_v16  ;;  %v3382_v47 = vcombine.high %v99_v17, %v103_v26  ;;  %v3385_v48 = vcombine.high %v100_v31, %v104_v32  ;;  %v91_v49 = vld [vmem:[%s4931_s1 + $0x240] sm:$0xff]  ;;  %v92_v63 = vld [vmem:[%s4931_s1 + $0x248] sm:$0xff]  ;;  %v3400_v1 = vcombine.low %v99_v17, %v103_v26 }
  0x1e   :  { %818 = vmatpush1.bf16.msra.mxu0 %v3232_v59  ;;  %859 = vmatpush1.bf16.msra.mxu1 %v3236_v60  ;;  %5256 = vst [vmem:[#allocation53_spill] sm:$0xff] %v3376_v33  ;;  %5257 = vst [vmem:[#allocation54_spill] sm:$0xff] %v3380_v42  ;;  %v95_v58 = vld [vmem:[%s4931_s1 + $0x260] sm:$0xff]  ;;  %v96_v0 = vld [vmem:[%s4931_s1 + $0x268] sm:$0xff]  ;;  %v3404_v14 = vcombine.low %v100_v31, %v104_v32 }
  0x1f   :  { %819 = vmatprep.subr.bf16.mxu0 %v3238_v61  ;;  %860 = vmatprep.subr.bf16.mxu1 %v3241_v62  ;;  %5258 = vst [vmem:[#allocation55_spill] sm:$0xff] %v3382_v47  ;;  %5259 = vst [vmem:[#allocation56_spill] sm:$0xff] %v3385_v48  ;;  %v87_v17 = vld [vmem:[%s4931_s1 + $0x220] sm:$0xff]  ;;  %v84_v26 = vld [vmem:[%s4931_s1 + $0x208] sm:$0xff]  ;;  %v3424_v32 = vcombine.low %v91_v49, %v95_v58 }
  0x20   :  { %5260 = vst [vmem:[#allocation57_spill] sm:$0xff] %v3400_v1  ;;  %5261 = vst [vmem:[#allocation58_spill] sm:$0xff] %v3404_v14  ;;  %v88_v31 = vld [vmem:[%s4931_s1 + $0x228] sm:$0xff] }
  0x21   :  { %5264 = vst [vmem:[#allocation61_spill] sm:$0xff] %v3424_v32 }
  0x22   :  { %820 = vmatpush1.bf16.msra.mxu0 %v3256_v4  ;;  %861 = vmatpush1.bf16.msra.mxu1 %v3260_v6 }
  0x23   :  { %821 = vmatprep.subr.bf16.mxu0 %v3262_v7  ;;  %862 = vmatprep.subr.bf16.mxu1 %v3265_v11 }
  0x26   :  { %822 = vmatpush2.bf16.msra.mxu0 %v3280_v18  ;;  %863 = vmatpush2.bf16.msra.mxu1 %v3284_v23 }
  0x27   :  { %823 = vmatprep.subr.bf16.mxu0 %v3286_v24  ;;  %864 = vmatprep.subr.bf16.mxu1 %v3289_v25 }
  0x2a   :  { %824 = vmatpush2.bf16.msra.mxu0 %v3304_v34  ;;  %865 = vmatpush2.bf16.msra.mxu1 %v3308_v39 }
  0x2b   :  { %825 = vmatprep.subr.bf16.mxu0 %v3310_v40  ;;  %866 = vmatprep.subr.bf16.mxu1 %v3313_v41 }
  0x2e   :  { %826 = vmatpush2.bf16.msra.mxu0 %v3328_v50  ;;  %867 = vmatpush2.bf16.msra.mxu1 %v3332_v55 }
  0x2f   :  { %827 = vmatprep.subr.bf16.mxu0 %v3334_v56  ;;  %868 = vmatprep.subr.bf16.mxu1 %v3337_v57 }
  0x32   :  { %828 = vmatpush2.bf16.msra.mxu0 %v3352_v2  ;;  %869 = vmatpush2.bf16.msra.mxu1 %v3356_v12  ;;  %v83_v12 = vld [vmem:[%s4931_s1 + $0x200] sm:$0xff]  ;;  %v53_v2 = vld [vmem:[%s4931_s1 + $0x110] sm:$0xff] }
  0x33   :  { %829 = vmatprep.subr.bf16.mxu0 %v3358_v13  ;;  %870 = vmatprep.subr.bf16.mxu1 %v3361_v16  ;;  %v3406_v16 = vcombine.high %v91_v49, %v95_v58  ;;  %v3409_v13 = vcombine.high %v92_v63, %v96_v0  ;;  %v81_v49 = vld [vmem:[%s4931_s1 + $0x1f0] sm:$0xff]  ;;  %v78_v58 = vld [vmem:[%s4931_s1 + $0x1d8] sm:$0xff] }
  0x35   :  { %5262 = vst [vmem:[#allocation59_spill] sm:$0xff] %v3406_v16  ;;  %5263 = vst [vmem:[#allocation60_spill] sm:$0xff] %v3409_v13 }
  0x36   :  { %830 = vmatpush2.bf16.msra.mxu0 %v3376_v33  ;;  %871 = vmatpush2.bf16.msra.mxu1 %v3380_v42  ;;  %v3433_v42 = vcombine.high %v84_v26, %v88_v31  ;;  %v77_v33 = vld [vmem:[%s4931_s1 + $0x1d0] sm:$0xff] }
  0x37   :  { %831 = vmatprep.subr.bf16.mxu0 %v3382_v47  ;;  %872 = vmatprep.subr.bf16.mxu1 %v3385_v48  ;;  %v3428_v48 = vcombine.low %v92_v63, %v96_v0  ;;  %v3430_v47 = vcombine.high %v83_v12, %v87_v17  ;;  %v82_v63 = vld [vmem:[%s4931_s1 + $0x1f8] sm:$0xff]  ;;  %v3448_v0 = vcombine.low %v83_v12, %v87_v17  ;;  %v73_v12 = vld [vmem:[%s4931_s1 + $0x1b0] sm:$0xff] }
  0x38   :  { %5267 = vst [vmem:[#allocation64_spill] sm:$0xff] %v3433_v42  ;;  %v70_v17 = vld [vmem:[%s4931_s1 + $0x198] sm:$0xff] }
  0x39   :  { %5265 = vst [vmem:[#allocation62_spill] sm:$0xff] %v3428_v48  ;;  %5266 = vst [vmem:[#allocation63_spill] sm:$0xff] %v3430_v47 }
  0x3a   :  { %832 = vmatpush2.bf16.msra.mxu0 %v3400_v1  ;;  %873 = vmatpush2.bf16.msra.mxu1 %v3404_v14  ;;  %5268 = vst [vmem:[#allocation65_spill] sm:$0xff] %v3448_v0  ;;  %v3457_v14 = vcombine.high %v78_v58, %v82_v63  ;;  %v69_v1 = vld [vmem:[%s4931_s1 + $0x190] sm:$0xff] }
  0x3b   :  { %833 = vmatprep.subr.bf16.mxu0 %v3406_v16  ;;  %874 = vmatprep.subr.bf16.mxu1 %v3409_v13  ;;  %v3452_v13 = vcombine.low %v84_v26, %v88_v31  ;;  %v3454_v16 = vcombine.high %v77_v33, %v81_v49  ;;  %v74_v26 = vld [vmem:[%s4931_s1 + $0x1b8] sm:$0xff]  ;;  %v3472_v31 = vcombine.low %v77_v33, %v81_v49  ;;  %v65_v33 = vld [vmem:[%s4931_s1 + $0x170] sm:$0xff]  ;;  %v5276_v49 = vmov 0.0|0.0  }
  0x3c   :  { %5271 = vst [vmem:[#allocation68_spill] sm:$0xff] %v3457_v14 }
  0x3d   :  { %5269 = vst [vmem:[#allocation66_spill] sm:$0xff] %v3452_v13  ;;  %5270 = vst [vmem:[#allocation67_spill] sm:$0xff] %v3454_v16 }
  0x3e   :  { %834 = vmatpush2.bf16.msra.mxu0 %v3424_v32  ;;  %875 = vmatpush2.bf16.msra.mxu1 %v3428_v48  ;;  %5272 = vst [vmem:[#allocation69_spill] sm:$0xff] %v3472_v31  ;;  %v3481_v48 = vcombine.high %v70_v17, %v74_v26  ;;  %v61_v32 = vld [vmem:[%s4931_s1 + $0x150] sm:$0xff] }
  0x3f   :  { %835 = vmatprep.subr.bf16.mxu0 %v3430_v47  ;;  %876 = vmatprep.subr.bf16.mxu1 %v3433_v42  ;;  %v3476_v42 = vcombine.low %v78_v58, %v82_v63  ;;  %v3478_v47 = vcombine.high %v69_v1, %v73_v12  ;;  %v62_v58 = vld [vmem:[%s4931_s1 + $0x158] sm:$0xff] }
  0x40   :  { %5275 = vst [vmem:[#allocation72_spill] sm:$0xff] %v3481_v48  ;;  %v66_v63 = vld [vmem:[%s4931_s1 + $0x178] sm:$0xff] }
  0x41   :  { %5273 = vst [vmem:[#allocation70_spill] sm:$0xff] %v3476_v42  ;;  %5274 = vst [vmem:[#allocation71_spill] sm:$0xff] %v3478_v47 }
  0x42   :  { %836 = vmatpush2.bf16.msra.mxu0 %v3448_v0  ;;  %877 = vmatpush2.bf16.msra.mxu1 %v3452_v13  ;;  %v3504_v13 = vcombine.high %v61_v32, %v65_v33  ;;  %v3507_v0 = vcombine.high %v62_v58, %v66_v63 }
  0x43   :  { %887 = vmatprep.subr.bf16.mxu0 %v3454_v16  ;;  %928 = vmatprep.subr.bf16.mxu1 %v3457_v14  ;;  %v3498_v14 = vcombine.low %v69_v1, %v73_v12  ;;  %v3502_v16 = vcombine.low %v70_v17, %v74_v26  ;;  %v57_v1 = vld [vmem:[%s4931_s1 + $0x130] sm:$0xff]  ;;  %v54_v12 = vld [vmem:[%s4931_s1 + $0x118] sm:$0xff]  ;;  %v3524_v26 = vcombine.low %v61_v32, %v65_v33 }
  0x44   :  { %5279 = vst [vmem:[#allocation75_spill] sm:$0xff] %v3504_v13  ;;  %5280 = vst [vmem:[#allocation76_spill] sm:$0xff] %v3507_v0  ;;  %v58_v17 = vld [vmem:[%s4931_s1 + $0x138] sm:$0xff]  ;;  %v49_v32 = vld [vmem:[%s4931_s1 + $0xf0] sm:$0xff] }
  0x45   :  { %838 = vmatmul.mubr.bf16.vlgmr.msra.gmra.mxu0 %v5276_v49  ;;  %879 = vmatmul.mubr.bf16.vlgmr.msra.gmra.mxu1 %v5276_v49  ;;  %5277 = vst [vmem:[#allocation73_spill] sm:$0xff] %v3498_v14  ;;  %5278 = vst [vmem:[#allocation74_spill] sm:$0xff] %v3502_v16  ;;  %v46_v33 = vld [vmem:[%s4931_s1 + $0xd8] sm:$0xff] }
  0x46   :  { %888 = vmatpush1.bf16.msra.mxu0 %v3472_v31  ;;  %929 = vmatpush1.bf16.msra.mxu1 %v3476_v42  ;;  %5281 = vst [vmem:[#allocation77_spill] sm:$0xff] %v3524_v26  ;;  %v3533_v42 = vcombine.high %v54_v12, %v58_v17  ;;  %v45_v31 = vld [vmem:[%s4931_s1 + $0xd0] sm:$0xff] }
  0x47   :  { %889 = vmatprep.subr.bf16.mxu0 %v3478_v47  ;;  %930 = vmatprep.subr.bf16.mxu1 %v3481_v48  ;;  %v3528_v48 = vcombine.low %v62_v58, %v66_v63  ;;  %v3530_v47 = vcombine.high %v53_v2, %v57_v1  ;;  %v50_v58 = vld [vmem:[%s4931_s1 + $0xf8] sm:$0xff]  ;;  %v3548_v63 = vcombine.low %v53_v2, %v57_v1  ;;  %v41_v2 = vld [vmem:[%s4931_s1 + $0xb0] sm:$0xff] }
  0x48   :  { %919 = vmatprep.mubr.bf16.mxu0 %v5276_v49  ;;  %960 = vmatprep.mubr.bf16.mxu1 %v5276_v49  ;;  %5284 = vst [vmem:[#allocation80_spill] sm:$0xff] %v3533_v42  ;;  %v38_v1 = vld [vmem:[%s4931_s1 + $0x98] sm:$0xff] }
  0x49   :  { %5282 = vst [vmem:[#allocation78_spill] sm:$0xff] %v3528_v48  ;;  %5283 = vst [vmem:[#allocation79_spill] sm:$0xff] %v3530_v47 }
  0x4a   :  { %890 = vmatpush1.bf16.msra.mxu0 %v3498_v14  ;;  %931 = vmatpush1.bf16.msra.mxu1 %v3502_v16  ;;  %5285 = vst [vmem:[#allocation81_spill] sm:$0xff] %v3548_v63  ;;  %v3557_v16 = vcombine.high %v46_v33, %v50_v58  ;;  %v37_v14 = vld [vmem:[%s4931_s1 + $0x90] sm:$0xff] }
  0x4b   :  { %891 = vmatprep.subr.bf16.mxu0 %v3504_v13  ;;  %932 = vmatprep.subr.bf16.mxu1 %v3507_v0  ;;  %v3552_v0 = vcombine.low %v54_v12, %v58_v17  ;;  %v3554_v13 = vcombine.high %v45_v31, %v49_v32  ;;  %v42_v12 = vld [vmem:[%s4931_s1 + $0xb8] sm:$0xff]  ;;  %v3572_v17 = vcombine.low %v45_v31, %v49_v32  ;;  %v33_v31 = vld [vmem:[%s4931_s1 + $0x70] sm:$0xff] }
  0x4c   :  { %5288 = vst [vmem:[#allocation84_spill] sm:$0xff] %v3557_v16  ;;  %v30_v32 = vld [vmem:[%s4931_s1 + $0x58] sm:$0xff] }
  0x4d   :  { %5286 = vst [vmem:[#allocation82_spill] sm:$0xff] %v3552_v0  ;;  %5287 = vst [vmem:[#allocation83_spill] sm:$0xff] %v3554_v13 }
  0x4e   :  { %892 = vmatpush1.bf16.msra.mxu0 %v3524_v26  ;;  %933 = vmatpush1.bf16.msra.mxu1 %v3528_v48  ;;  %5289 = vst [vmem:[#allocation85_spill] sm:$0xff] %v3572_v17  ;;  %v3581_v48 = vcombine.high %v38_v1, %v42_v12  ;;  %v29_v26 = vld [vmem:[%s4931_s1 + $0x50] sm:$0xff] }
  0x4f   :  { %893 = vmatprep.subr.bf16.mxu0 %v3530_v47  ;;  %934 = vmatprep.subr.bf16.mxu1 %v3533_v42  ;;  %v3576_v42 = vcombine.low %v46_v33, %v50_v58  ;;  %v3578_v47 = vcombine.high %v37_v14, %v41_v2  ;;  %v34_v33 = vld [vmem:[%s4931_s1 + $0x78] sm:$0xff]  ;;  %v3596_v58 = vcombine.low %v37_v14, %v41_v2  ;;  %v25_v14 = vld [vmem:[%s4931_s1 + $0x30] sm:$0xff] }
  0x50   :  { %5292 = vst [vmem:[#allocation88_spill] sm:$0xff] %v3581_v48  ;;  %v22_v2 = vld [vmem:[%s4931_s1 + $0x18] sm:$0xff] }
  0x51   :  { %5290 = vst [vmem:[#allocation86_spill] sm:$0xff] %v3576_v42  ;;  %5291 = vst [vmem:[#allocation87_spill] sm:$0xff] %v3578_v47 }
  0x52   :  { %894 = vmatpush1.bf16.msra.mxu0 %v3548_v63  ;;  %935 = vmatpush1.bf16.msra.mxu1 %v3552_v0  ;;  %5293 = vst [vmem:[#allocation89_spill] sm:$0xff] %v3596_v58  ;;  %v3605_v0 = vcombine.high %v30_v32, %v34_v33  ;;  %v21_v63 = vld [vmem:[%s4931_s1 + $0x10] sm:$0xff] }
  0x53   :  { %895 = vmatprep.subr.bf16.mxu0 %v3554_v13  ;;  %936 = vmatprep.subr.bf16.mxu1 %v3557_v16  ;;  %v3600_v16 = vcombine.low %v38_v1, %v42_v12  ;;  %v3602_v13 = vcombine.high %v29_v26, %v33_v31  ;;  %v26_v1 = vld [vmem:[%s4931_s1 + $0x38] sm:$0xff]  ;;  %v3620_v12 = vcombine.low %v29_v26, %v33_v31  ;;  %v145_v26 = vld [vmem:[%s4931_s1 + $0x3f0] sm:$0xff] }
  0x54   :  { %5296 = vst [vmem:[#allocation92_spill] sm:$0xff] %v3605_v0  ;;  %v142_v31 = vld [vmem:[%s4931_s1 + $0x3d8] sm:$0xff] }
  0x55   :  { %5294 = vst [vmem:[#allocation90_spill] sm:$0xff] %v3600_v16  ;;  %5295 = vst [vmem:[#allocation91_spill] sm:$0xff] %v3602_v13 }
  0x56   :  { %896 = vmatpush1.bf16.msra.mxu0 %v3572_v17  ;;  %937 = vmatpush1.bf16.msra.mxu1 %v3576_v42  ;;  %5297 = vst [vmem:[#allocation93_spill] sm:$0xff] %v3620_v12  ;;  %v3629_v42 = vcombine.high %v22_v2, %v26_v1  ;;  %v141_v17 = vld [vmem:[%s4931_s1 + $0x3d0] sm:$0xff] }
  0x57   :  { %897 = vmatprep.subr.bf16.mxu0 %v3578_v47  ;;  %938 = vmatprep.subr.bf16.mxu1 %v3581_v48  ;;  %v3624_v48 = vcombine.low %v30_v32, %v34_v33  ;;  %v3626_v47 = vcombine.high %v21_v63, %v25_v14  ;;  %v146_v32 = vld [vmem:[%s4931_s1 + $0x3f8] sm:$0xff]  ;;  %v3644_v33 = vcombine.low %v21_v63, %v25_v14  ;;  %v137_v63 = vld [vmem:[%s4931_s1 + $0x3b0] sm:$0xff] }
  0x58   :  { %5300 = vst [vmem:[#allocation96_spill] sm:$0xff] %v3629_v42  ;;  %v134_v14 = vld [vmem:[%s4931_s1 + $0x398] sm:$0xff] }
  0x59   :  { %5298 = vst [vmem:[#allocation94_spill] sm:$0xff] %v3624_v48  ;;  %5299 = vst [vmem:[#allocation95_spill] sm:$0xff] %v3626_v47 }
  0x5a   :  { %898 = vmatpush1.bf16.msra.mxu0 %v3596_v58  ;;  %939 = vmatpush1.bf16.msra.mxu1 %v3600_v16  ;;  %5301 = vst [vmem:[#allocation97_spill] sm:$0xff] %v3644_v33  ;;  %v3653_v16 = vcombine.high %v142_v31, %v146_v32  ;;  %v133_v58 = vld [vmem:[%s4931_s1 + $0x390] sm:$0xff] }
  0x5b   :  { %899 = vmatprep.subr.bf16.mxu0 %v3602_v13  ;;  %940 = vmatprep.subr.bf16.mxu1 %v3605_v0  ;;  %v3648_v0 = vcombine.low %v22_v2, %v26_v1  ;;  %v3650_v13 = vcombine.high %v141_v17, %v145_v26  ;;  %v138_v2 = vld [vmem:[%s4931_s1 + $0x3b8] sm:$0xff]  ;;  %v3668_v1 = vcombine.low %v141_v17, %v145_v26  ;;  %v129_v17 = vld [vmem:[%s4931_s1 + $0x370] sm:$0xff] }
  0x5c   :  { %5304 = vst [vmem:[#allocation100_spill] sm:$0xff] %v3653_v16  ;;  %v126_v26 = vld [vmem:[%s4931_s1 + $0x358] sm:$0xff] }
  0x5d   :  { %5302 = vst [vmem:[#allocation98_spill] sm:$0xff] %v3648_v0  ;;  %5303 = vst [vmem:[#allocation99_spill] sm:$0xff] %v3650_v13 }
  0x5e   :  { %900 = vmatpush1.bf16.msra.mxu0 %v3620_v12  ;;  %941 = vmatpush1.bf16.msra.mxu1 %v3624_v48  ;;  %5305 = vst [vmem:[#allocation101_spill] sm:$0xff] %v3668_v1  ;;  %v3677_v48 = vcombine.high %v134_v14, %v138_v2  ;;  %v125_v12 = vld [vmem:[%s4931_s1 + $0x350] sm:$0xff] }
  0x5f   :  { %901 = vmatprep.subr.bf16.mxu0 %v3626_v47  ;;  %942 = vmatprep.subr.bf16.mxu1 %v3629_v42  ;;  %v3672_v42 = vcombine.low %v142_v31, %v146_v32  ;;  %v3674_v47 = vcombine.high %v133_v58, %v137_v63  ;;  %v130_v31 = vld [vmem:[%s4931_s1 + $0x378] sm:$0xff]  ;;  %v3692_v32 = vcombine.low %v133_v58, %v137_v63  ;;  %v121_v58 = vld [vmem:[%s4931_s1 + $0x330] sm:$0xff] }
  0x60   :  { %5308 = vst [vmem:[#allocation104_spill] sm:$0xff] %v3677_v48  ;;  %v118_v63 = vld [vmem:[%s4931_s1 + $0x318] sm:$0xff] }
  0x61   :  { %5306 = vst [vmem:[#allocation102_spill] sm:$0xff] %v3672_v42  ;;  %5307 = vst [vmem:[#allocation103_spill] sm:$0xff] %v3674_v47 }
  0x62   :  { %902 = vmatpush1.bf16.msra.mxu0 %v3644_v33  ;;  %943 = vmatpush1.bf16.msra.mxu1 %v3648_v0  ;;  %5309 = vst [vmem:[#allocation105_spill] sm:$0xff] %v3692_v32  ;;  %v3701_v0 = vcombine.high %v126_v26, %v130_v31  ;;  %v117_v33 = vld [vmem:[%s4931_s1 + $0x310] sm:$0xff] }
  0x63   :  { %903 = vmatprep.subr.bf16.mxu0 %v3650_v13  ;;  %944 = vmatprep.subr.bf16.mxu1 %v3653_v16  ;;  %v3696_v16 = vcombine.low %v134_v14, %v138_v2  ;;  %v3698_v13 = vcombine.high %v125_v12, %v129_v17  ;;  %v122_v14 = vld [vmem:[%s4931_s1 + $0x338] sm:$0xff]  ;;  %v3716_v2 = vcombine.low %v125_v12, %v129_v17  ;;  %v113_v12 = vld [vmem:[%s4931_s1 + $0x2f0] sm:$0xff] }
  0x64   :  { %5312 = vst [vmem:[#allocation108_spill] sm:$0xff] %v3701_v0  ;;  %v110_v17 = vld [vmem:[%s4931_s1 + $0x2d8] sm:$0xff] }
  0x65   :  { %5310 = vst [vmem:[#allocation106_spill] sm:$0xff] %v3696_v16  ;;  %5311 = vst [vmem:[#allocation107_spill] sm:$0xff] %v3698_v13 }
  0x66   :  { %904 = vmatpush2.bf16.msra.mxu0 %v3668_v1  ;;  %945 = vmatpush2.bf16.msra.mxu1 %v3672_v42  ;;  %5313 = vst [vmem:[#allocation109_spill] sm:$0xff] %v3716_v2  ;;  %v3725_v42 = vcombine.high %v118_v63, %v122_v14  ;;  %v109_v1 = vld [vmem:[%s4931_s1 + $0x2d0] sm:$0xff] }
  0x67   :  { %905 = vmatprep.subr.bf16.mxu0 %v3674_v47  ;;  %946 = vmatprep.subr.bf16.mxu1 %v3677_v48  ;;  %v3720_v48 = vcombine.low %v126_v26, %v130_v31  ;;  %v3722_v47 = vcombine.high %v117_v33, %v121_v58  ;;  %v114_v26 = vld [vmem:[%s4931_s1 + $0x2f8] sm:$0xff]  ;;  %v3740_v31 = vcombine.low %v117_v33, %v121_v58  ;;  %v105_v33 = vld [vmem:[%s4931_s1 + $0x2b0] sm:$0xff] }
  0x68   :  { %5316 = vst [vmem:[#allocation112_spill] sm:$0xff] %v3725_v42  ;;  %v102_v58 = vld [vmem:[%s4931_s1 + $0x298] sm:$0xff] }
  0x69   :  { %5314 = vst [vmem:[#allocation110_spill] sm:$0xff] %v3720_v48  ;;  %5315 = vst [vmem:[#allocation111_spill] sm:$0xff] %v3722_v47 }
  0x6a   :  { %906 = vmatpush2.bf16.msra.mxu0 %v3692_v32  ;;  %947 = vmatpush2.bf16.msra.mxu1 %v3696_v16  ;;  %5317 = vst [vmem:[#allocation113_spill] sm:$0xff] %v3740_v31  ;;  %v3749_v16 = vcombine.high %v110_v17, %v114_v26  ;;  %v101_v32 = vld [vmem:[%s4931_s1 + $0x290] sm:$0xff] }
  0x6b   :  { %907 = vmatprep.subr.bf16.mxu0 %v3698_v13  ;;  %948 = vmatprep.subr.bf16.mxu1 %v3701_v0  ;;  %v3744_v0 = vcombine.low %v118_v63, %v122_v14  ;;  %v3746_v13 = vcombine.high %v109_v1, %v113_v12  ;;  %v106_v63 = vld [vmem:[%s4931_s1 + $0x2b8] sm:$0xff]  ;;  %v3764_v14 = vcombine.low %v109_v1, %v113_v12  ;;  %v97_v1 = vld [vmem:[%s4931_s1 + $0x270] sm:$0xff] }
  0x6c   :  { %5320 = vst [vmem:[#allocation116_spill] sm:$0xff] %v3749_v16  ;;  %v94_v12 = vld [vmem:[%s4931_s1 + $0x258] sm:$0xff] }
  0x6d   :  { %5318 = vst [vmem:[#allocation114_spill] sm:$0xff] %v3744_v0  ;;  %5319 = vst [vmem:[#allocation115_spill] sm:$0xff] %v3746_v13 }
  0x6e   :  { %908 = vmatpush2.bf16.msra.mxu0 %v3716_v2  ;;  %949 = vmatpush2.bf16.msra.mxu1 %v3720_v48  ;;  %5321 = vst [vmem:[#allocation117_spill] sm:$0xff] %v3764_v14  ;;  %v3773_v48 = vcombine.high %v102_v58, %v106_v63  ;;  %v93_v2 = vld [vmem:[%s4931_s1 + $0x250] sm:$0xff] }
  0x6f   :  { %909 = vmatprep.subr.bf16.mxu0 %v3722_v47  ;;  %950 = vmatprep.subr.bf16.mxu1 %v3725_v42  ;;  %v3768_v42 = vcombine.low %v110_v17, %v114_v26  ;;  %v3770_v47 = vcombine.high %v101_v32, %v105_v33  ;;  %v98_v17 = vld [vmem:[%s4931_s1 + $0x278] sm:$0xff]  ;;  %v3788_v26 = vcombine.low %v101_v32, %v105_v33  ;;  %v89_v32 = vld [vmem:[%s4931_s1 + $0x230] sm:$0xff] }
  0x70   :  { %5324 = vst [vmem:[#allocation120_spill] sm:$0xff] %v3773_v48  ;;  %v86_v33 = vld [vmem:[%s4931_s1 + $0x218] sm:$0xff] }
  0x71   :  { %5322 = vst [vmem:[#allocation118_spill] sm:$0xff] %v3768_v42  ;;  %5323 = vst [vmem:[#allocation119_spill] sm:$0xff] %v3770_v47 }
  0x72   :  { %910 = vmatpush2.bf16.msra.mxu0 %v3740_v31  ;;  %951 = vmatpush2.bf16.msra.mxu1 %v3744_v0  ;;  %5325 = vst [vmem:[#allocation121_spill] sm:$0xff] %v3788_v26  ;;  %v3797_v0 = vcombine.high %v94_v12, %v98_v17  ;;  %v85_v31 = vld [vmem:[%s4931_s1 + $0x210] sm:$0xff] }
  0x73   :  { %911 = vmatprep.subr.bf16.mxu0 %v3746_v13  ;;  %952 = vmatprep.subr.bf16.mxu1 %v3749_v16  ;;  %v3792_v16 = vcombine.low %v102_v58, %v106_v63  ;;  %v3794_v13 = vcombine.high %v93_v2, %v97_v1  ;;  %v90_v58 = vld [vmem:[%s4931_s1 + $0x238] sm:$0xff]  ;;  %v3812_v63 = vcombine.low %v93_v2, %v97_v1  ;;  %v5337_v1 = vld [vmem:[#allocation51_spill] sm:$0xff] }
  0x74   :  { %5328 = vst [vmem:[#allocation124_spill] sm:$0xff] %v3797_v0  ;;  %v3828_v2 = vcombine.low %v86_v33, %v90_v58 }
  0x75   :  { %5326 = vst [vmem:[#allocation122_spill] sm:$0xff] %v3792_v16  ;;  %5327 = vst [vmem:[#allocation123_spill] sm:$0xff] %v3794_v13 }
  0x76   :  { %912 = vmatpush2.bf16.msra.mxu0 %v3764_v14  ;;  %953 = vmatpush2.bf16.msra.mxu1 %v3768_v42  ;;  %5329 = vst [vmem:[#allocation125_spill] sm:$0xff] %v3812_v63  ;;  %v3821_v42 = vcombine.high %v86_v33, %v90_v58  ;;  %v3824_v14 = vcombine.low %v85_v31, %v89_v32  ;;  %5334 = vst [vmem:[#allocation130_spill] sm:$0xff] %v3828_v2  ;;  %v5341_v33 = vld [vmem:[#allocation55_spill] sm:$0xff]  ;;  %v5342_v58 = vld [vmem:[#allocation56_spill] sm:$0xff] }
  0x77   :  { %913 = vmatprep.subr.bf16.mxu0 %v3770_v47  ;;  %954 = vmatprep.subr.bf16.mxu1 %v3773_v48  ;;  %v3816_v48 = vcombine.low %v94_v12, %v98_v17  ;;  %v3818_v47 = vcombine.high %v85_v31, %v89_v32  ;;  %v5336_v31 = vld [vmem:[#allocation50_spill] sm:$0xff]  ;;  %v5338_v12 = vld [vmem:[#allocation52_spill] sm:$0xff]  ;;  %v5339_v17 = vld [vmem:[#allocation53_spill] sm:$0xff] }
  0x78   :  { %5332 = vst [vmem:[#allocation128_spill] sm:$0xff] %v3821_v42  ;;  %5333 = vst [vmem:[#allocation129_spill] sm:$0xff] %v3824_v14  ;;  %v5340_v32 = vld [vmem:[#allocation54_spill] sm:$0xff] }
  0x79   :  { %5330 = vst [vmem:[#allocation126_spill] sm:$0xff] %v3816_v48  ;;  %5331 = vst [vmem:[#allocation127_spill] sm:$0xff] %v3818_v47 }
  0x7a   :  { %914 = vmatpush2.bf16.msra.mxu0 %v3788_v26  ;;  %955 = vmatpush2.bf16.msra.mxu1 %v3792_v16 }
  0x7b   :  { %915 = vmatprep.subr.bf16.mxu0 %v3794_v13  ;;  %956 = vmatprep.subr.bf16.mxu1 %v3797_v0 }
  0x7e   :  { %916 = vmatpush2.bf16.msra.mxu0 %v3812_v63  ;;  %957 = vmatpush2.bf16.msra.mxu1 %v3816_v48 }
  0x7f   :  { %917 = vmatprep.subr.bf16.mxu0 %v3818_v47  ;;  %958 = vmatprep.subr.bf16.mxu1 %v3821_v42 }
  0x82   :  { %918 = vmatpush2.bf16.msra.mxu0 %v3824_v14  ;;  %959 = vmatpush2.bf16.msra.mxu1 %v3828_v2 }
  0x83   :  { %1034 = vmatprep.subr.bf16.mxu0 %v3068_v3  ;;  %1075 = vmatprep.subr.bf16.mxu1 %v3081_v8 }
  0x85   :  { %920 = vmatmul.mubr.bf16.vlgmr.msra.gmra.mxu0 %v5276_v49  ;;  %961 = vmatmul.mubr.bf16.vlgmr.msra.gmra.mxu1 %v5276_v49  ;;  %v5335_v49 = vld [vmem:[#allocation49_spill] sm:$0xff] }
  0x86   :  { %1035 = vmatpush1.bf16.msra.mxu0 %v3073_v5  ;;  %1076 = vmatpush1.bf16.msra.mxu1 %v3083_v9 }
  0x87   :  { %1036 = vmatprep.subr.bf16.mxu0 %v3085_v10  ;;  %1077 = vmatprep.subr.bf16.mxu1 %v3098_v15 }
  0x8a   :  { %1037 = vmatpush1.bf16.msra.mxu0 %v3112_v19  ;;  %1078 = vmatpush1.bf16.msra.mxu1 %v3116_v20 }
  0x8b   :  { %1038 = vmatprep.subr.bf16.mxu0 %v3118_v21  ;;  %1079 = vmatprep.subr.bf16.mxu1 %v3121_v22 }
  0x8e   :  { %1039 = vmatpush1.bf16.msra.mxu0 %v3136_v27  ;;  %1080 = vmatpush1.bf16.msra.mxu1 %v3140_v28 }
  0x8f   :  { %1040 = vmatprep.subr.bf16.mxu0 %v3142_v29  ;;  %1081 = vmatprep.subr.bf16.mxu1 %v3145_v30 }
  0x92   :  { %1041 = vmatpush1.bf16.msra.mxu0 %v3160_v35  ;;  %1082 = vmatpush1.bf16.msra.mxu1 %v3164_v36 }
  0x93   :  { %1042 = vmatprep.subr.bf16.mxu0 %v3166_v37  ;;  %1083 = vmatprep.subr.bf16.mxu1 %v3169_v38 }
  0x96   :  { %1043 = vmatpush1.bf16.msra.mxu0 %v3184_v43  ;;  %1084 = vmatpush1.bf16.msra.mxu1 %v3188_v44 }
  0x97   :  { %1044 = vmatprep.subr.bf16.mxu0 %v3190_v45  ;;  %1085 = vmatprep.subr.bf16.mxu1 %v3193_v46 }
  0x9a   :  { %1045 = vmatpush1.bf16.msra.mxu0 %v3208_v51  ;;  %1086 = vmatpush1.bf16.msra.mxu1 %v3212_v52 }
  0x9b   :  { %1046 = vmatprep.subr.bf16.mxu0 %v3214_v53  ;;  %1087 = vmatprep.subr.bf16.mxu1 %v3217_v54 }
  0x9e   :  { %1047 = vmatpush1.bf16.msra.mxu0 %v3232_v59  ;;  %1088 = vmatpush1.bf16.msra.mxu1 %v3236_v60 }
  0x9f   :  { %1048 = vmatprep.subr.bf16.mxu0 %v3238_v61  ;;  %1089 = vmatprep.subr.bf16.mxu1 %v3241_v62 }
  0xa2   :  { %1049 = vmatpush1.bf16.msra.mxu0 %v3256_v4  ;;  %1090 = vmatpush1.bf16.msra.mxu1 %v3260_v6 }
  0xa3   :  { %1050 = vmatprep.subr.bf16.mxu0 %v3262_v7  ;;  %1091 = vmatprep.subr.bf16.mxu1 %v3265_v11 }
  0xa6   :  { %1051 = vmatpush2.bf16.msra.mxu0 %v3280_v18  ;;  %1092 = vmatpush2.bf16.msra.mxu1 %v3284_v23 }
  0xa7   :  { %1052 = vmatprep.subr.bf16.mxu0 %v3286_v24  ;;  %1093 = vmatprep.subr.bf16.mxu1 %v3289_v25 }
  0xaa   :  { %1053 = vmatpush2.bf16.msra.mxu0 %v3304_v34  ;;  %1094 = vmatpush2.bf16.msra.mxu1 %v3308_v39 }
  0xab   :  { %1054 = vmatprep.subr.bf16.mxu0 %v3310_v40  ;;  %1095 = vmatprep.subr.bf16.mxu1 %v3313_v41 }
  0xae   :  { %1055 = vmatpush2.bf16.msra.mxu0 %v3328_v50  ;;  %1096 = vmatpush2.bf16.msra.mxu1 %v3332_v55  ;;  %v5343_v55 = vld [vmem:[#allocation57_spill] sm:$0xff] }
  0xaf   :  { %1056 = vmatprep.subr.bf16.mxu0 %v3334_v56  ;;  %1097 = vmatprep.subr.bf16.mxu1 %v3337_v57  ;;  %v5344_v56 = vld [vmem:[#allocation58_spill] sm:$0xff]  ;;  %v5345_v57 = vld [vmem:[#allocation59_spill] sm:$0xff] }
  0xb2   :  { %1057 = vmatpush2.bf16.msra.mxu0 %v5335_v49  ;;  %1098 = vmatpush2.bf16.msra.mxu1 %v5336_v31  ;;  %v5346_v49 = vld [vmem:[#allocation60_spill] sm:$0xff]  ;;  %v5347_v31 = vld [vmem:[#allocation61_spill] sm:$0xff] }
  0xb3   :  { %1058 = vmatprep.subr.bf16.mxu0 %v5337_v1  ;;  %1099 = vmatprep.subr.bf16.mxu1 %v5338_v12  ;;  %v5348_v1 = vld [vmem:[#allocation62_spill] sm:$0xff]  ;;  %v5349_v12 = vld [vmem:[#allocation63_spill] sm:$0xff] }
  0xb6   :  { %1059 = vmatpush2.bf16.msra.mxu0 %v5339_v17  ;;  %1100 = vmatpush2.bf16.msra.mxu1 %v5340_v32  ;;  %v5350_v17 = vld [vmem:[#allocation64_spill] sm:$0xff]  ;;  %v5351_v32 = vld [vmem:[#allocation65_spill] sm:$0xff] }
  0xb7   :  { %1060 = vmatprep.subr.bf16.mxu0 %v5341_v33  ;;  %1101 = vmatprep.subr.bf16.mxu1 %v5342_v58  ;;  %v5352_v33 = vld [vmem:[#allocation66_spill] sm:$0xff]  ;;  %v5353_v58 = vld [vmem:[#allocation67_spill] sm:$0xff] }
  0xba   :  { %1061 = vmatpush2.bf16.msra.mxu0 %v5343_v55  ;;  %1102 = vmatpush2.bf16.msra.mxu1 %v5344_v56  ;;  %v5354_v55 = vld [vmem:[#allocation68_spill] sm:$0xff] }
  0xbb   :  { %1062 = vmatprep.subr.bf16.mxu0 %v5345_v57  ;;  %1103 = vmatprep.subr.bf16.mxu1 %v5346_v49 }
  0xbe   :  { %1063 = vmatpush2.bf16.msra.mxu0 %v5347_v31  ;;  %1104 = vmatpush2.bf16.msra.mxu1 %v5348_v1 }
  0xbf   :  { %1064 = vmatprep.subr.bf16.mxu0 %v5349_v12  ;;  %1105 = vmatprep.subr.bf16.mxu1 %v5350_v17  ;;  %v151_v17 = vld [vmem:[%s4932_s0] sm:$0xff] }
  0xc0   :  { %v156_v39 = vunpack.c.h.bf16 %v151_v17 }
  0xc2   :  { %1065 = vmatpush2.bf16.msra.mxu0 %v5351_v32  ;;  %1106 = vmatpush2.bf16.msra.mxu1 %v5352_v33  ;;  %v152_v33 = vld [vmem:[%s4932_s0 + $0x8] sm:$0xff]  ;;  %v155_v32 = vunpack.c.l.bf16 %v151_v17 }
  0xc3   :  { %1116 = vmatprep.subr.bf16.mxu0 %v5353_v58  ;;  %1157 = vmatprep.subr.bf16.mxu1 %v5354_v55  ;;  %v157_v58 = vunpack.c.l.bf16 %v152_v33  ;;  %v158_v12 = vunpack.c.h.bf16 %v152_v33 }
 0x105   :  { %v839_v56 = vpop.f32.mrf.mxu0  ;;  %v880_v57 = vpop.f32.mrf.mxu1 }
 0x106   :  { %v969_v55 = vadd.f32 %v839_v56, %v155_v32  ;;  %v971_v34 = vadd.f32 %v880_v57, %v157_v58  ;;  %v153_v56 = vld [vmem:[%s4932_s0 + $0x10] sm:$0xff] }
 0x107   :  { %v841_v50 = vpop.f32.mrf.mxu0  ;;  %v882_v49 = vpop.f32.mrf.mxu1 }
 0x108   :  { %v972_v25 = vadd.f32 %v882_v49, %v158_v12  ;;  %v977_v24 = vsub.f32 0.0, %v969_v55 }
 0x109   :  { %v843_v41 = vpop.f32.mrf.mxu0  ;;  %v884_v31 = vpop.f32.mrf.mxu1 }
 0x10a   :  { %v970_v41 = vadd.f32 %v841_v50, %v156_v39  ;;  %v979_v31 = vsub.f32 0.0, %v971_v34  ;;  %v154_v34 = vld [vmem:[%s4932_s0 + $0x18] sm:$0xff]  ;;  %v159_v39 = vunpack.c.l.bf16 %v153_v56 }
 0x10b   :  { %v844_v40 = vpop.f32.mrf.mxu0  ;;  %v885_v1 = vpop.f32.mrf.mxu1  ;;  %v161_v49 = vunpack.c.l.bf16 %v154_v34 }
 0x10c   :  { %v980_v40 = vsub.f32 0.0, %v972_v25  ;;  %v983_v1 = vmul.f32 1.442695, %v977_v24  ;;  %v978_v23 = vsub.f32 0.0, %v970_v41  ;;  %v987_v18 = vmul.f32 1.442695, %v979_v31 }
 0x10e   :  { %v989_v11 = vmul.f32 1.442695, %v980_v40  ;;  %2787 = vpow2.f32 %v983_v1  ;;  %v985_v7 = vmul.f32 1.442695, %v978_v23 }
 0x10f   :  { %2789 = vpow2.f32 %v987_v18  ;;  %v160_v18 = vunpack.c.h.bf16 %v153_v56 }
 0x110   :  { %2791 = vpow2.f32 %v989_v11 }
 0x111   :  { %2793 = vpow2.f32 %v985_v7  ;;  %v162_v7 = vunpack.c.h.bf16 %v154_v34 }
 0x11b   :  { %v2788_v6 = vpop.eup %2787 }
 0x11c   :  { %v2790_v57 = vpop.eup %2789  ;;  %v995_v24 = vadd.f32 1.0, %v2788_v6 }
 0x11d   :  { %v2792_v25 = vpop.eup %2791  ;;  %v997_v55 = vadd.f32 1.0, %v2790_v57 }
 0x11e   :  { %v2794_v50 = vpop.eup %2793  ;;  %v998_v23 = vadd.f32 1.0, %v2792_v25  ;;  %2795 = vrcp.f32 %v995_v24 }
 0x11f   :  { %v996_v12 = vadd.f32 1.0, %v2794_v50  ;;  %2797 = vrcp.f32 %v997_v55 }
 0x120   :  { %2799 = vrcp.f32 %v998_v23 }
 0x12b   :  { %v2796_v50 = vpop.eup %2795 }
 0x12c   :  { %v2798_v55 = vpop.eup %2797 }
 0x145   :  { %v921_v11 = vpop.f32.mrf.mxu0  ;;  %v962_v32 = vpop.f32.mrf.mxu1 }
 0x146   :  { %v973_v17 = vadd.f32 %v921_v11, %v159_v39  ;;  %v975_v33 = vadd.f32 %v962_v32, %v161_v49  ;;  %v2800_v49 = vpop.eup %2799 }
 0x147   :  { %v923_v58 = vpop.f32.mrf.mxu0  ;;  %v964_v40 = vpop.f32.mrf.mxu1 }
 0x148   :  { %v981_v41 = vsub.f32 0.0, %v973_v17  ;;  %v974_v31 = vadd.f32 %v923_v58, %v160_v18  ;;  %2801 = vtanh.f32 %v975_v33  ;;  %v976_v6 = vadd.f32 %v964_v40, %v162_v7 }
 0x149   :  { %v925_v1 = vpop.f32.mrf.mxu0  ;;  %2803 = vrcp.f32 %v996_v12  ;;  %v966_v56 = vpop.f32.mrf.mxu1  ;;  %v1009_v18 = vmul.f32 0.0, %v2798_v55  ;;  %v1010_v33 = vmul.f32 0.0, %v2800_v49  ;;  %v5355_v55 = vld [vmem:[#allocation69_spill] sm:$0xff]  ;;  %v5356_v49 = vld [vmem:[#allocation70_spill] sm:$0xff] }
 0x14a   :  { %v991_v57 = vmul.f32 1.442695, %v981_v41  ;;  %v982_v25 = vsub.f32 0.0, %v974_v31  ;;  %2805 = vtanh.f32 %v976_v6 }
 0x14b   :  { %v926_v34 = vpop.f32.mrf.mxu0  ;;  %v967_v39 = vpop.f32.mrf.mxu1 }
 0x14c   :  { %2807 = vpow2.f32 %v991_v57  ;;  %v993_v24 = vmul.f32 1.442695, %v982_v25 }
 0x14e   :  { %2809 = vpow2.f32 %v993_v24 }
 0x155   :  { %v2802_v23 = vpop.eup %2801 }
 0x156   :  { %v2804_v11 = vpop.eup %2803  ;;  %v1011_v17 = vmul.f32 %v2802_v23, %v2796_v50  ;;  %v5357_v23 = vld [vmem:[#allocation71_spill] sm:$0xff] }
 0x157   :  { %v2806_v32 = vpop.eup %2805 }
 0x158   :  { %v3913_v12 = vadd.f32 %v1011_v17, %v1009_v18  ;;  %v1012_v58 = vmul.f32 %v2806_v32, %v2804_v11  ;;  %v5358_v11 = vld [vmem:[#allocation72_spill] sm:$0xff]  ;;  %v5359_v18 = vld [vmem:[#allocation73_spill] sm:$0xff]  ;;  %v5360_v17 = vld [vmem:[#allocation74_spill] sm:$0xff] }
 0x159   :  { %v2808_v7 = vpop.eup %2807  ;;  %v5361_v32 = vld [vmem:[#allocation75_spill] sm:$0xff] }
 0x15a   :  { %v999_v41 = vadd.f32 1.0, %v2808_v7  ;;  %2811 = vtanh.f32 %v3913_v12  ;;  %v3916_v40 = vadd.f32 %v1012_v58, %v1010_v33  ;;  %v5362_v7 = vld [vmem:[#allocation76_spill] sm:$0xff]  ;;  %v5363_v33 = vld [vmem:[#allocation77_spill] sm:$0xff]  ;;  %v5364_v58 = vld [vmem:[#allocation78_spill] sm:$0xff] }
 0x15b   :  { %v2810_v31 = vpop.eup %2809 }
 0x15c   :  { %2813 = vrcp.f32 %v999_v41  ;;  %v1000_v6 = vadd.f32 1.0, %v2810_v31  ;;  %v5365_v41 = vld [vmem:[#allocation79_spill] sm:$0xff]  ;;  %v5366_v31 = vld [vmem:[#allocation80_spill] sm:$0xff] }
 0x15d   :  { %2815 = vtanh.f32 %v3916_v40 }
 0x15e   :  { %2817 = vrcp.f32 %v1000_v6  ;;  %v5367_v6 = vld [vmem:[#allocation81_spill] sm:$0xff] }
 0x167   :  { %v2812_v1 = vpop.eup %2811 }
 0x169   :  { %v2814_v57 = vpop.eup %2813 }
 0x16a   :  { %v2816_v25 = vpop.eup %2815  ;;  %v1017_v34 = vmul.f32 %v2814_v57, %v2812_v1  ;;  %v5368_v1 = vld [vmem:[#allocation82_spill] sm:$0xff]  ;;  %v5369_v57 = vld [vmem:[#allocation83_spill] sm:$0xff] }
 0x16b   :  { %v2818_v56 = vpop.eup %2817 }
 0x16c   :  { %v1018_v24 = vmul.f32 %v2818_v56, %v2816_v25  ;;  %v3919_v50 = vpack.c.bf16 %v1017_v34, %v1017_v34  ;;  %v5370_v25 = vld [vmem:[#allocation84_spill] sm:$0xff]  ;;  %v5371_v56 = vld [vmem:[#allocation85_spill] sm:$0xff]  ;;  %v5372_v34 = vld [vmem:[#allocation86_spill] sm:$0xff] }
 0x16e   :  { %v1033_v39 = vpack.c.bf16 %v1018_v24, %v1018_v24  ;;  %v5373_v24 = vld [vmem:[#allocation87_spill] sm:$0xff] }
 0x170   :  { %1066 = vmatprep.mubr.bf16.mxu0 %v1033_v39  ;;  %1107 = vmatprep.mubr.bf16.mxu1 %v1033_v39 }
 0x171   :  { %1067 = vmatmul.mubr.bf16.vlgmr.msra.gmra.mxu0 %v3919_v50  ;;  %1108 = vmatmul.mubr.bf16.vlgmr.msra.gmra.mxu1 %v3919_v50 }
 0x172   :  { %1117 = vmatpush1.bf16.msra.mxu0 %v5355_v55  ;;  %1158 = vmatpush1.bf16.msra.mxu1 %v5356_v49 }
 0x173   :  { %1148 = vmatprep.mubr.bf16.mxu0 %v1033_v39  ;;  %1189 = vmatprep.mubr.bf16.mxu1 %v1033_v39  ;;  %v5374_v39 = vld [vmem:[#allocation88_spill] sm:$0xff] }
 0x174   :  { %1118 = vmatprep.subr.bf16.mxu0 %v5357_v23  ;;  %1159 = vmatprep.subr.bf16.mxu1 %v5358_v11 }
 0x176   :  { %1119 = vmatpush1.bf16.msra.mxu0 %v5359_v18  ;;  %1160 = vmatpush1.bf16.msra.mxu1 %v5360_v17 }
 0x177   :  { %1120 = vmatprep.subr.bf16.mxu0 %v5361_v32  ;;  %1161 = vmatprep.subr.bf16.mxu1 %v5362_v7 }
 0x17a   :  { %1121 = vmatpush1.bf16.msra.mxu0 %v5363_v33  ;;  %1162 = vmatpush1.bf16.msra.mxu1 %v5364_v58  ;;  %v5375_v58 = vld [vmem:[#allocation89_spill] sm:$0xff] }
 0x17b   :  { %1122 = vmatprep.subr.bf16.mxu0 %v5365_v41  ;;  %1163 = vmatprep.subr.bf16.mxu1 %v5366_v31  ;;  %v5376_v41 = vld [vmem:[#allocation90_spill] sm:$0xff]  ;;  %v5377_v31 = vld [vmem:[#allocation91_spill] sm:$0xff] }
 0x17e   :  { %1123 = vmatpush1.bf16.msra.mxu0 %v5367_v6  ;;  %1164 = vmatpush1.bf16.msra.mxu1 %v5368_v1  ;;  %v5378_v6 = vld [vmem:[#allocation92_spill] sm:$0xff]  ;;  %v5379_v1 = vld [vmem:[#allocation93_spill] sm:$0xff] }
 0x17f   :  { %1124 = vmatprep.subr.bf16.mxu0 %v5369_v57  ;;  %1165 = vmatprep.subr.bf16.mxu1 %v5370_v25  ;;  %v5380_v57 = vld [vmem:[#allocation94_spill] sm:$0xff]  ;;  %v5381_v25 = vld [vmem:[#allocation95_spill] sm:$0xff] }
 0x182   :  { %1125 = vmatpush1.bf16.msra.mxu0 %v5371_v56  ;;  %1166 = vmatpush1.bf16.msra.mxu1 %v5372_v34  ;;  %v5382_v56 = vld [vmem:[#allocation96_spill] sm:$0xff]  ;;  %v5383_v34 = vld [vmem:[#allocation97_spill] sm:$0xff] }
 0x183   :  { %1126 = vmatprep.subr.bf16.mxu0 %v5373_v24  ;;  %1167 = vmatprep.subr.bf16.mxu1 %v5374_v39  ;;  %v5384_v24 = vld [vmem:[#allocation98_spill] sm:$0xff]  ;;  %v5385_v39 = vld [vmem:[#allocation99_spill] sm:$0xff] }
 0x186   :  { %1127 = vmatpush1.bf16.msra.mxu0 %v5375_v58  ;;  %1168 = vmatpush1.bf16.msra.mxu1 %v5376_v41  ;;  %v5386_v58 = vld [vmem:[#allocation100_spill] sm:$0xff]  ;;  %v5387_v41 = vld [vmem:[#allocation101_spill] sm:$0xff] }
 0x187   :  { %1128 = vmatprep.subr.bf16.mxu0 %v5377_v31  ;;  %1169 = vmatprep.subr.bf16.mxu1 %v5378_v6  ;;  %v5388_v31 = vld [vmem:[#allocation102_spill] sm:$0xff]  ;;  %v5389_v6 = vld [vmem:[#allocation103_spill] sm:$0xff] }
 0x18a   :  { %1129 = vmatpush1.bf16.msra.mxu0 %v5379_v1  ;;  %1170 = vmatpush1.bf16.msra.mxu1 %v5380_v57  ;;  %v5390_v1 = vld [vmem:[#allocation104_spill] sm:$0xff]  ;;  %v5391_v57 = vld [vmem:[#allocation105_spill] sm:$0xff] }
 0x18b   :  { %1130 = vmatprep.subr.bf16.mxu0 %v5381_v25  ;;  %1171 = vmatprep.subr.bf16.mxu1 %v5382_v56  ;;  %v5392_v25 = vld [vmem:[#allocation106_spill] sm:$0xff]  ;;  %v5393_v56 = vld [vmem:[#allocation107_spill] sm:$0xff] }
 0x18e   :  { %1131 = vmatpush1.bf16.msra.mxu0 %v5383_v34  ;;  %1172 = vmatpush1.bf16.msra.mxu1 %v5384_v24  ;;  %v5394_v34 = vld [vmem:[#allocation108_spill] sm:$0xff]  ;;  %v5395_v24 = vld [vmem:[#allocation109_spill] sm:$0xff] }
 0x18f   :  { %1132 = vmatprep.subr.bf16.mxu0 %v5385_v39  ;;  %1173 = vmatprep.subr.bf16.mxu1 %v5386_v58  ;;  %v5396_v39 = vld [vmem:[#allocation110_spill] sm:$0xff]  ;;  %v5397_v58 = vld [vmem:[#allocation111_spill] sm:$0xff] }
 0x192   :  { %1133 = vmatpush2.bf16.msra.mxu0 %v5387_v41  ;;  %1174 = vmatpush2.bf16.msra.mxu1 %v5388_v31  ;;  %v5398_v41 = vld [vmem:[#allocation112_spill] sm:$0xff]  ;;  %v5399_v31 = vld [vmem:[#allocation113_spill] sm:$0xff] }
 0x193   :  { %1134 = vmatprep.subr.bf16.mxu0 %v5389_v6  ;;  %1175 = vmatprep.subr.bf16.mxu1 %v5390_v1  ;;  %v5400_v6 = vld [vmem:[#allocation114_spill] sm:$0xff]  ;;  %v5401_v1 = vld [vmem:[#allocation115_spill] sm:$0xff] }
 0x196   :  { %1135 = vmatpush2.bf16.msra.mxu0 %v5391_v57  ;;  %1176 = vmatpush2.bf16.msra.mxu1 %v5392_v25  ;;  %v5402_v57 = vld [vmem:[#allocation116_spill] sm:$0xff]  ;;  %v5403_v25 = vld [vmem:[#allocation117_spill] sm:$0xff] }
 0x197   :  { %1136 = vmatprep.subr.bf16.mxu0 %v5393_v56  ;;  %1177 = vmatprep.subr.bf16.mxu1 %v5394_v34  ;;  %v5404_v56 = vld [vmem:[#allocation118_spill] sm:$0xff]  ;;  %v5405_v34 = vld [vmem:[#allocation119_spill] sm:$0xff] }
 0x19a   :  { %1137 = vmatpush2.bf16.msra.mxu0 %v5395_v24  ;;  %1178 = vmatpush2.bf16.msra.mxu1 %v5396_v39  ;;  %v5406_v24 = vld [vmem:[#allocation120_spill] sm:$0xff] }
 0x19b   :  { %1138 = vmatprep.subr.bf16.mxu0 %v5397_v58  ;;  %1179 = vmatprep.subr.bf16.mxu1 %v5398_v41 }
 0x19e   :  { %1139 = vmatpush2.bf16.msra.mxu0 %v5399_v31  ;;  %1180 = vmatpush2.bf16.msra.mxu1 %v5400_v6 }
 0x19f   :  { %1140 = vmatprep.subr.bf16.mxu0 %v5401_v1  ;;  %1181 = vmatprep.subr.bf16.mxu1 %v5402_v57 }
 0x1a2   :  { %1141 = vmatpush2.bf16.msra.mxu0 %v5403_v25  ;;  %1182 = vmatpush2.bf16.msra.mxu1 %v5404_v56 }
 0x1a3   :  { %1142 = vmatprep.subr.bf16.mxu0 %v5405_v34  ;;  %1183 = vmatprep.subr.bf16.mxu1 %v5406_v24 }
 0x1a6   :  { %1143 = vmatpush2.bf16.msra.mxu0 %v3788_v26  ;;  %1184 = vmatpush2.bf16.msra.mxu1 %v3792_v16 }
 0x1a7   :  { %1144 = vmatprep.subr.bf16.mxu0 %v3794_v13  ;;  %1185 = vmatprep.subr.bf16.mxu1 %v3797_v0 }
 0x1aa   :  { %1145 = vmatpush2.bf16.msra.mxu0 %v3812_v63  ;;  %1186 = vmatpush2.bf16.msra.mxu1 %v3816_v48 }
 0x1ab   :  { %1146 = vmatprep.subr.bf16.mxu0 %v3818_v47  ;;  %1187 = vmatprep.subr.bf16.mxu1 %v3821_v42 }
 0x1ae   :  { %1147 = vmatpush2.bf16.msra.mxu0 %v3824_v14  ;;  %1188 = vmatpush2.bf16.msra.mxu1 %v3828_v2 }
 0x1af   :  { %1263 = vmatprep.subr.bf16.mxu0 %v3068_v3  ;;  %1304 = vmatprep.subr.bf16.mxu1 %v3081_v8 }
 0x1b1   :  { %1149 = vmatmul.mubr.bf16.vlgmr.msra.gmra.mxu0 %v3919_v50  ;;  %1190 = vmatmul.mubr.bf16.vlgmr.msra.gmra.mxu1 %v3919_v50  ;;  %v5407_v50 = vld [vmem:[#allocation34_spill] sm:$0xff] }
 0x1b2   :  { %1264 = vmatpush1.bf16.msra.mxu0 %v3073_v5  ;;  %1305 = vmatpush1.bf16.msra.mxu1 %v3083_v9 }
 0x1b3   :  { %1265 = vmatprep.subr.bf16.mxu0 %v3085_v10  ;;  %1306 = vmatprep.subr.bf16.mxu1 %v3098_v15 }
 0x1b6   :  { %1266 = vmatpush1.bf16.msra.mxu0 %v3112_v19  ;;  %1307 = vmatpush1.bf16.msra.mxu1 %v3116_v20 }
 0x1b7   :  { %1267 = vmatprep.subr.bf16.mxu0 %v3118_v21  ;;  %1308 = vmatprep.subr.bf16.mxu1 %v3121_v22 }
 0x1ba   :  { %1268 = vmatpush1.bf16.msra.mxu0 %v3136_v27  ;;  %1309 = vmatpush1.bf16.msra.mxu1 %v3140_v28 }
 0x1bb   :  { %1269 = vmatprep.subr.bf16.mxu0 %v3142_v29  ;;  %1310 = vmatprep.subr.bf16.mxu1 %v3145_v30 }
 0x1be   :  { %1270 = vmatpush1.bf16.msra.mxu0 %v3160_v35  ;;  %1311 = vmatpush1.bf16.msra.mxu1 %v3164_v36 }
 0x1bf   :  { %1271 = vmatprep.subr.bf16.mxu0 %v3166_v37  ;;  %1312 = vmatprep.subr.bf16.mxu1 %v3169_v38 }
 0x1c2   :  { %1272 = vmatpush1.bf16.msra.mxu0 %v3184_v43  ;;  %1313 = vmatpush1.bf16.msra.mxu1 %v3188_v44 }
 0x1c3   :  { %1273 = vmatprep.subr.bf16.mxu0 %v3190_v45  ;;  %1314 = vmatprep.subr.bf16.mxu1 %v3193_v46  ;;  %v5408_v46 = vld [vmem:[#allocation35_spill] sm:$0xff] }
 0x1c6   :  { %1274 = vmatpush1.bf16.msra.mxu0 %v3208_v51  ;;  %1315 = vmatpush1.bf16.msra.mxu1 %v3212_v52  ;;  %v5409_v51 = vld [vmem:[#allocation36_spill] sm:$0xff]  ;;  %v5410_v52 = vld [vmem:[#allocation37_spill] sm:$0xff] }
 0x1c7   :  { %1275 = vmatprep.subr.bf16.mxu0 %v3214_v53  ;;  %1316 = vmatprep.subr.bf16.mxu1 %v3217_v54  ;;  %v5411_v53 = vld [vmem:[#allocation38_spill] sm:$0xff]  ;;  %v5412_v54 = vld [vmem:[#allocation39_spill] sm:$0xff] }
 0x1ca   :  { %1276 = vmatpush1.bf16.msra.mxu0 %v3232_v59  ;;  %1317 = vmatpush1.bf16.msra.mxu1 %v3236_v60  ;;  %v5413_v59 = vld [vmem:[#allocation40_spill] sm:$0xff]  ;;  %v5414_v60 = vld [vmem:[#allocation41_spill] sm:$0xff] }
 0x1cb   :  { %1277 = vmatprep.subr.bf16.mxu0 %v3238_v61  ;;  %1318 = vmatprep.subr.bf16.mxu1 %v3241_v62  ;;  %v5415_v61 = vld [vmem:[#allocation42_spill] sm:$0xff]  ;;  %v5416_v62 = vld [vmem:[#allocation43_spill] sm:$0xff] }
 0x1ce   :  { %1278 = vmatpush1.bf16.msra.mxu0 %v3256_v4  ;;  %1319 = vmatpush1.bf16.msra.mxu1 %v5407_v50  ;;  %v5417_v4 = vld [vmem:[#allocation44_spill] sm:$0xff]  ;;  %v5418_v50 = vld [vmem:[#allocation45_spill] sm:$0xff] }
 0x1cf   :  { %1279 = vmatprep.subr.bf16.mxu0 %v5408_v46  ;;  %1320 = vmatprep.subr.bf16.mxu1 %v5409_v51  ;;  %v5419_v46 = vld [vmem:[#allocation46_spill] sm:$0xff]  ;;  %v5420_v51 = vld [vmem:[#allocation47_spill] sm:$0xff] }
 0x1d2   :  { %1280 = vmatpush2.bf16.msra.mxu0 %v5410_v52  ;;  %1321 = vmatpush2.bf16.msra.mxu1 %v5411_v53  ;;  %v5421_v52 = vld [vmem:[#allocation48_spill] sm:$0xff]  ;;  %v5422_v53 = vld [vmem:[#allocation49_spill] sm:$0xff] }
 0x1d3   :  { %1281 = vmatprep.subr.bf16.mxu0 %v5412_v54  ;;  %1322 = vmatprep.subr.bf16.mxu1 %v5413_v59  ;;  %v5423_v54 = vld [vmem:[#allocation50_spill] sm:$0xff]  ;;  %v5424_v59 = vld [vmem:[#allocation51_spill] sm:$0xff] }
 0x1d6   :  { %1282 = vmatpush2.bf16.msra.mxu0 %v5414_v60  ;;  %1323 = vmatpush2.bf16.msra.mxu1 %v5415_v61  ;;  %v5425_v60 = vld [vmem:[#allocation52_spill] sm:$0xff]  ;;  %v5426_v61 = vld [vmem:[#allocation53_spill] sm:$0xff] }
 0x1d7   :  { %1283 = vmatprep.subr.bf16.mxu0 %v5416_v62  ;;  %1324 = vmatprep.subr.bf16.mxu1 %v5417_v4  ;;  %v5427_v62 = vld [vmem:[#allocation54_spill] sm:$0xff]  ;;  %v5428_v4 = vld [vmem:[#allocation55_spill] sm:$0xff] }
 0x1da   :  { %1284 = vmatpush2.bf16.msra.mxu0 %v5418_v50  ;;  %1325 = vmatpush2.bf16.msra.mxu1 %v5419_v46  ;;  %v5429_v50 = vld [vmem:[#allocation56_spill] sm:$0xff]  ;;  %v5430_v46 = vld [vmem:[#allocation57_spill] sm:$0xff] }
 0x1db   :  { %1285 = vmatprep.subr.bf16.mxu0 %v5420_v51  ;;  %1326 = vmatprep.subr.bf16.mxu1 %v5421_v52  ;;  %v5431_v51 = vld [vmem:[#allocation58_spill] sm:$0xff]  ;;  %v5432_v52 = vld [vmem:[#allocation59_spill] sm:$0xff] }
 0x1de   :  { %1286 = vmatpush2.bf16.msra.mxu0 %v5422_v53  ;;  %1327 = vmatpush2.bf16.msra.mxu1 %v5423_v54  ;;  %v5433_v53 = vld [vmem:[#allocation60_spill] sm:$0xff]  ;;  %v5434_v54 = vld [vmem:[#allocation61_spill] sm:$0xff] }
 0x1df   :  { %1287 = vmatprep.subr.bf16.mxu0 %v5424_v59  ;;  %1328 = vmatprep.subr.bf16.mxu1 %v5425_v60  ;;  %v5435_v59 = vld [vmem:[#allocation62_spill] sm:$0xff]  ;;  %v5436_v60 = vld [vmem:[#allocation63_spill] sm:$0xff] }
 0x1e2   :  { %1288 = vmatpush2.bf16.msra.mxu0 %v5426_v61  ;;  %1329 = vmatpush2.bf16.msra.mxu1 %v5427_v62  ;;  %v5437_v61 = vld [vmem:[#allocation64_spill] sm:$0xff]  ;;  %v5438_v62 = vld [vmem:[#allocation65_spill] sm:$0xff] }
 0x1e3   :  { %1289 = vmatprep.subr.bf16.mxu0 %v5428_v4  ;;  %1330 = vmatprep.subr.bf16.mxu1 %v5429_v50  ;;  %v5439_v4 = vld [vmem:[#allocation66_spill] sm:$0xff]  ;;  %v5440_v50 = vld [vmem:[#allocation67_spill] sm:$0xff] }
 0x1e6   :  { %1290 = vmatpush2.bf16.msra.mxu0 %v5430_v46  ;;  %1331 = vmatpush2.bf16.msra.mxu1 %v5431_v51  ;;  %v5441_v46 = vld [vmem:[#allocation68_spill] sm:$0xff] }
 0x1e7   :  { %1291 = vmatprep.subr.bf16.mxu0 %v5432_v52  ;;  %1332 = vmatprep.subr.bf16.mxu1 %v5433_v53 }
 0x1ea   :  { %1292 = vmatpush2.bf16.msra.mxu0 %v5434_v54  ;;  %1333 = vmatpush2.bf16.msra.mxu1 %v5435_v59 }
 0x1eb   :  { %1293 = vmatprep.subr.bf16.mxu0 %v5436_v60  ;;  %1334 = vmatprep.subr.bf16.mxu1 %v5437_v61  ;;  %v2758_v61 = vld [vmem:[%s4932_s0 + $0x20] sm:$0xff] }
 0x1ec   :  { %v1025_v38 = vunpack.c.h.bf16 %v2758_v61 }
 0x1ee   :  { %1294 = vmatpush2.bf16.msra.mxu0 %v5438_v62  ;;  %1335 = vmatpush2.bf16.msra.mxu1 %v5439_v4  ;;  %v2759_v4 = vld [vmem:[%s4932_s0 + $0x28] sm:$0xff]  ;;  %v1024_v62 = vunpack.c.l.bf16 %v2758_v61 }
 0x1ef   :  { %1345 = vmatprep.subr.bf16.mxu0 %v5440_v50  ;;  %1386 = vmatprep.subr.bf16.mxu1 %v5441_v46  ;;  %v1026_v50 = vunpack.c.l.bf16 %v2759_v4  ;;  %v1027_v60 = vunpack.c.h.bf16 %v2759_v4 }
 0x231   :  { %v1068_v51 = vpop.f32.mrf.mxu0  ;;  %v1109_v52 = vpop.f32.mrf.mxu1 }
 0x232   :  { %v1198_v46 = vadd.f32 %v1068_v51, %v1024_v62  ;;  %v1200_v37 = vadd.f32 %v1109_v52, %v1026_v50  ;;  %v2760_v51 = vld [vmem:[%s4932_s0 + $0x30] sm:$0xff] }
 0x233   :  { %v1070_v45 = vpop.f32.mrf.mxu0  ;;  %v1111_v53 = vpop.f32.mrf.mxu1 }
 0x234   :  { %v1201_v36 = vadd.f32 %v1111_v53, %v1027_v60  ;;  %v1206_v35 = vsub.f32 0.0, %v1198_v46  ;;  %v1028_v46 = vunpack.c.l.bf16 %v2760_v51 }
 0x235   :  { %v1072_v44 = vpop.f32.mrf.mxu0  ;;  %v1113_v54 = vpop.f32.mrf.mxu1 }
 0x236   :  { %v1199_v44 = vadd.f32 %v1070_v45, %v1025_v38  ;;  %v1208_v54 = vsub.f32 0.0, %v1200_v37  ;;  %v2761_v37 = vld [vmem:[%s4932_s0 + $0x38] sm:$0xff] }
 0x237   :  { %v1073_v43 = vpop.f32.mrf.mxu0  ;;  %v1114_v59 = vpop.f32.mrf.mxu1  ;;  %v1030_v52 = vunpack.c.l.bf16 %v2761_v37 }
 0x238   :  { %v1209_v43 = vsub.f32 0.0, %v1201_v36  ;;  %v1212_v59 = vmul.f32 1.442695, %v1206_v35  ;;  %v1207_v30 = vsub.f32 0.0, %v1199_v44  ;;  %v1216_v29 = vmul.f32 1.442695, %v1208_v54 }
 0x23a   :  { %v1218_v28 = vmul.f32 1.442695, %v1209_v43  ;;  %2819 = vpow2.f32 %v1212_v59  ;;  %v1214_v27 = vmul.f32 1.442695, %v1207_v30 }
 0x23b   :  { %2821 = vpow2.f32 %v1216_v29  ;;  %v1029_v29 = vunpack.c.h.bf16 %v2760_v51 }
 0x23c   :  { %2823 = vpow2.f32 %v1218_v28  ;;  %v1031_v28 = vunpack.c.h.bf16 %v2761_v37 }
 0x23d   :  { %2825 = vpow2.f32 %v1214_v27 }
 0x247   :  { %v2820_v22 = vpop.eup %2819 }
 0x248   :  { %v2822_v21 = vpop.eup %2821  ;;  %v1224_v35 = vadd.f32 1.0, %v2820_v22 }
 0x249   :  { %v2824_v36 = vpop.eup %2823  ;;  %v1226_v45 = vadd.f32 1.0, %v2822_v21 }
 0x24a   :  { %v2826_v38 = vpop.eup %2825  ;;  %v1227_v30 = vadd.f32 1.0, %v2824_v36  ;;  %2827 = vrcp.f32 %v1224_v35 }
 0x24b   :  { %v1225_v27 = vadd.f32 1.0, %v2826_v38  ;;  %2829 = vrcp.f32 %v1226_v45 }
 0x24c   :  { %2831 = vrcp.f32 %v1227_v30 }
 0x257   :  { %v2828_v38 = vpop.eup %2827 }
 0x258   :  { %v2830_v45 = vpop.eup %2829 }
 0x271   :  { %v1150_v53 = vpop.f32.mrf.mxu0  ;;  %v1191_v60 = vpop.f32.mrf.mxu1 }
 0x272   :  { %v1202_v61 = vadd.f32 %v1150_v53, %v1028_v46  ;;  %v1204_v62 = vadd.f32 %v1191_v60, %v1030_v52  ;;  %v2832_v46 = vpop.eup %2831  ;;  %v1238_v53 = vmul.f32 %v2830_v45, %v3913_v12  ;;  %v5445_v45 = vld [vmem:[#allocation81_spill] sm:$0xff] }
 0x273   :  { %v1152_v4 = vpop.f32.mrf.mxu0  ;;  %v1193_v50 = vpop.f32.mrf.mxu1  ;;  %v1239_v60 = vmul.f32 %v2832_v46, %v3916_v40  ;;  %v5446_v46 = vld [vmem:[#allocation82_spill] sm:$0xff] }
 0x274   :  { %v1210_v44 = vsub.f32 0.0, %v1202_v61  ;;  %2833 = vtanh.f32 %v1204_v62  ;;  %v1203_v22 = vadd.f32 %v1152_v4, %v1029_v29  ;;  %v1205_v54 = vadd.f32 %v1193_v50, %v1031_v28 }
 0x275   :  { %2835 = vrcp.f32 %v1225_v27  ;;  %v1154_v21 = vpop.f32.mrf.mxu0  ;;  %v1195_v43 = vpop.f32.mrf.mxu1 }
 0x276   :  { %v1220_v59 = vmul.f32 1.442695, %v1210_v44  ;;  %v1211_v51 = vsub.f32 0.0, %v1203_v22  ;;  %2837 = vtanh.f32 %v1205_v54 }
 0x277   :  { %v1155_v37 = vpop.f32.mrf.mxu0  ;;  %v1196_v36 = vpop.f32.mrf.mxu1 }
 0x278   :  { %2839 = vpow2.f32 %v1220_v59  ;;  %v1222_v35 = vmul.f32 1.442695, %v1211_v51  ;;  %v5442_v36 = vld [vmem:[#allocation78_spill] sm:$0xff] }
 0x27a   :  { %2841 = vpow2.f32 %v1222_v35  ;;  %v5443_v35 = vld [vmem:[#allocation79_spill] sm:$0xff] }
 0x281   :  { %v2834_v52 = vpop.eup %2833 }
 0x282   :  { %v2836_v30 = vpop.eup %2835  ;;  %v1240_v29 = vmul.f32 %v2834_v52, %v2828_v38  ;;  %v5444_v38 = vld [vmem:[#allocation80_spill] sm:$0xff]  ;;  %v5447_v52 = vld [vmem:[#allocation83_spill] sm:$0xff] }
 0x283   :  { %v2838_v28 = vpop.eup %2837 }
 0x284   :  { %v4066_v27 = vadd.f32 %v1240_v29, %v1238_v53  ;;  %v1241_v61 = vmul.f32 %v2838_v28, %v2836_v30  ;;  %v5448_v30 = vld [vmem:[#allocation84_spill] sm:$0xff]  ;;  %v5449_v53 = vld [vmem:[#allocation85_spill] sm:$0xff]  ;;  %v5450_v29 = vld [vmem:[#allocation86_spill] sm:$0xff] }
 0x285   :  { %v2840_v62 = vpop.eup %2839  ;;  %v5451_v28 = vld [vmem:[#allocation87_spill] sm:$0xff] }
 0x286   :  { %v1228_v4 = vadd.f32 1.0, %v2840_v62  ;;  %v4069_v50 = vadd.f32 %v1241_v61, %v1239_v60  ;;  %2843 = vtanh.f32 %v4066_v27  ;;  %v5452_v60 = vld [vmem:[#allocation88_spill] sm:$0xff]  ;;  %v5453_v61 = vld [vmem:[#allocation89_spill] sm:$0xff]  ;;  %v5454_v62 = vld [vmem:[#allocation90_spill] sm:$0xff] }
 0x287   :  { %v2842_v44 = vpop.eup %2841 }
 0x288   :  { %2845 = vrcp.f32 %v1228_v4  ;;  %v1229_v22 = vadd.f32 1.0, %v2842_v44  ;;  %v5455_v4 = vld [vmem:[#allocation91_spill] sm:$0xff]  ;;  %v5456_v44 = vld [vmem:[#allocation92_spill] sm:$0xff] }
 0x289   :  { %2847 = vtanh.f32 %v4069_v50 }
 0x28a   :  { %2849 = vrcp.f32 %v1229_v22  ;;  %v5457_v22 = vld [vmem:[#allocation93_spill] sm:$0xff] }
 0x293   :  { %v2844_v12 = vpop.eup %2843 }
 0x295   :  { %v2846_v54 = vpop.eup %2845 }
 0x296   :  { %v2848_v21 = vpop.eup %2847  ;;  %v1246_v59 = vmul.f32 %v2846_v54, %v2844_v12  ;;  %v5458_v12 = vld [vmem:[#allocation94_spill] sm:$0xff]  ;;  %v5459_v54 = vld [vmem:[#allocation95_spill] sm:$0xff] }
 0x297   :  { %v2850_v43 = vpop.eup %2849 }
 0x298   :  { %v1247_v51 = vmul.f32 %v2850_v43, %v2848_v21  ;;  %v4073_v37 = vpack.c.bf16 %v1246_v59, %v1246_v59  ;;  %v5460_v21 = vld [vmem:[#allocation96_spill] sm:$0xff]  ;;  %v5461_v43 = vld [vmem:[#allocation97_spill] sm:$0xff]  ;;  %v5462_v59 = vld [vmem:[#allocation98_spill] sm:$0xff] }
 0x29a   :  { %v1262_v40 = vpack.c.bf16 %v1247_v51, %v1247_v51  ;;  %v5463_v51 = vld [vmem:[#allocation99_spill] sm:$0xff] }
 0x29c   :  { %1295 = vmatprep.mubr.bf16.mxu0 %v1262_v40  ;;  %1336 = vmatprep.mubr.bf16.mxu1 %v1262_v40 }
 0x29d   :  { %1296 = vmatmul.mubr.bf16.vlgmr.msra.gmra.mxu0 %v4073_v37  ;;  %1337 = vmatmul.mubr.bf16.vlgmr.msra.gmra.mxu1 %v4073_v37 }
 0x29e   :  { %1346 = vmatpush1.bf16.msra.mxu0 %v5355_v55  ;;  %1387 = vmatpush1.bf16.msra.mxu1 %v5356_v49 }
 0x29f   :  { %1377 = vmatprep.mubr.bf16.mxu0 %v1262_v40  ;;  %1418 = vmatprep.mubr.bf16.mxu1 %v1262_v40  ;;  %v5464_v40 = vld [vmem:[#allocation100_spill] sm:$0xff] }
 0x2a0   :  { %1347 = vmatprep.subr.bf16.mxu0 %v5357_v23  ;;  %1388 = vmatprep.subr.bf16.mxu1 %v5358_v11 }
 0x2a2   :  { %1348 = vmatpush1.bf16.msra.mxu0 %v5359_v18  ;;  %1389 = vmatpush1.bf16.msra.mxu1 %v5360_v17 }
 0x2a3   :  { %1349 = vmatprep.subr.bf16.mxu0 %v5361_v32  ;;  %1390 = vmatprep.subr.bf16.mxu1 %v5362_v7 }
 0x2a6   :  { %1350 = vmatpush1.bf16.msra.mxu0 %v5363_v33  ;;  %1391 = vmatpush1.bf16.msra.mxu1 %v5442_v36 }
 0x2a7   :  { %1351 = vmatprep.subr.bf16.mxu0 %v5443_v35  ;;  %1392 = vmatprep.subr.bf16.mxu1 %v5444_v38 }
 0x2aa   :  { %1352 = vmatpush1.bf16.msra.mxu0 %v5445_v45  ;;  %1393 = vmatpush1.bf16.msra.mxu1 %v5446_v46 }
 0x2ab   :  { %1353 = vmatprep.subr.bf16.mxu0 %v5447_v52  ;;  %1394 = vmatprep.subr.bf16.mxu1 %v5448_v30 }
 0x2ae   :  { %1354 = vmatpush1.bf16.msra.mxu0 %v5449_v53  ;;  %1395 = vmatpush1.bf16.msra.mxu1 %v5450_v29 }
 0x2af   :  { %1355 = vmatprep.subr.bf16.mxu0 %v5451_v28  ;;  %1396 = vmatprep.subr.bf16.mxu1 %v5452_v60 }
 0x2b2   :  { %1356 = vmatpush1.bf16.msra.mxu0 %v5453_v61  ;;  %1397 = vmatpush1.bf16.msra.mxu1 %v5454_v62  ;;  %v5465_v62 = vld [vmem:[#allocation101_spill] sm:$0xff] }
 0x2b3   :  { %1357 = vmatprep.subr.bf16.mxu0 %v5455_v4  ;;  %1398 = vmatprep.subr.bf16.mxu1 %v5456_v44  ;;  %v5466_v4 = vld [vmem:[#allocation102_spill] sm:$0xff]  ;;  %v5467_v44 = vld [vmem:[#allocation103_spill] sm:$0xff] }
 0x2b6   :  { %1358 = vmatpush1.bf16.msra.mxu0 %v5457_v22  ;;  %1399 = vmatpush1.bf16.msra.mxu1 %v5458_v12  ;;  %v5468_v22 = vld [vmem:[#allocation104_spill] sm:$0xff]  ;;  %v5469_v12 = vld [vmem:[#allocation105_spill] sm:$0xff] }
 0x2b7   :  { %1359 = vmatprep.subr.bf16.mxu0 %v5459_v54  ;;  %1400 = vmatprep.subr.bf16.mxu1 %v5460_v21  ;;  %v5470_v54 = vld [vmem:[#allocation106_spill] sm:$0xff]  ;;  %v5471_v21 = vld [vmem:[#allocation107_spill] sm:$0xff] }
 0x2ba   :  { %1360 = vmatpush1.bf16.msra.mxu0 %v5461_v43  ;;  %1401 = vmatpush1.bf16.msra.mxu1 %v5462_v59  ;;  %v5472_v43 = vld [vmem:[#allocation108_spill] sm:$0xff]  ;;  %v5473_v59 = vld [vmem:[#allocation109_spill] sm:$0xff] }
 0x2bb   :  { %1361 = vmatprep.subr.bf16.mxu0 %v5463_v51  ;;  %1402 = vmatprep.subr.bf16.mxu1 %v5464_v40 }
 0x2be   :  { %1362 = vmatpush2.bf16.msra.mxu0 %v5465_v62  ;;  %1403 = vmatpush2.bf16.msra.mxu1 %v5466_v4 }
 0x2bf   :  { %1363 = vmatprep.subr.bf16.mxu0 %v5467_v44  ;;  %1404 = vmatprep.subr.bf16.mxu1 %v5468_v22 }
 0x2c2   :  { %1364 = vmatpush2.bf16.msra.mxu0 %v5469_v12  ;;  %1405 = vmatpush2.bf16.msra.mxu1 %v5470_v54 }
 0x2c3   :  { %1365 = vmatprep.subr.bf16.mxu0 %v5471_v21  ;;  %1406 = vmatprep.subr.bf16.mxu1 %v5472_v43 }
 0x2c6   :  { %1366 = vmatpush2.bf16.msra.mxu0 %v5473_v59  ;;  %1407 = vmatpush2.bf16.msra.mxu1 %v5396_v39 }
 0x2c7   :  { %1367 = vmatprep.subr.bf16.mxu0 %v5397_v58  ;;  %1408 = vmatprep.subr.bf16.mxu1 %v5398_v41 }
 0x2ca   :  { %1368 = vmatpush2.bf16.msra.mxu0 %v5399_v31  ;;  %1409 = vmatpush2.bf16.msra.mxu1 %v5400_v6 }
 0x2cb   :  { %1369 = vmatprep.subr.bf16.mxu0 %v5401_v1  ;;  %1410 = vmatprep.subr.bf16.mxu1 %v5402_v57 }
 0x2ce   :  { %1370 = vmatpush2.bf16.msra.mxu0 %v5403_v25  ;;  %1411 = vmatpush2.bf16.msra.mxu1 %v5404_v56 }
 0x2cf   :  { %1371 = vmatprep.subr.bf16.mxu0 %v5405_v34  ;;  %1412 = vmatprep.subr.bf16.mxu1 %v5406_v24 }
 0x2d2   :  { %1372 = vmatpush2.bf16.msra.mxu0 %v3788_v26  ;;  %1413 = vmatpush2.bf16.msra.mxu1 %v3792_v16 }
 0x2d3   :  { %1373 = vmatprep.subr.bf16.mxu0 %v3794_v13  ;;  %1414 = vmatprep.subr.bf16.mxu1 %v3797_v0 }
 0x2d6   :  { %1374 = vmatpush2.bf16.msra.mxu0 %v3812_v63  ;;  %1415 = vmatpush2.bf16.msra.mxu1 %v3816_v48 }
 0x2d7   :  { %1375 = vmatprep.subr.bf16.mxu0 %v3818_v47  ;;  %1416 = vmatprep.subr.bf16.mxu1 %v3821_v42 }
 0x2da   :  { %1376 = vmatpush2.bf16.msra.mxu0 %v3824_v14  ;;  %1417 = vmatpush2.bf16.msra.mxu1 %v3828_v2  ;;  %v5474_v2 = vld [vmem:[#allocation11_spill] sm:$0xff]  ;;  %v5477_v14 = vld [vmem:[#allocation14_spill] sm:$0xff] }
 0x2db   :  { %1492 = vmatprep.subr.bf16.mxu0 %v3068_v3  ;;  %1533 = vmatprep.subr.bf16.mxu1 %v3081_v8  ;;  %v5475_v3 = vld [vmem:[#allocation12_spill] sm:$0xff]  ;;  %v5476_v8 = vld [vmem:[#allocation13_spill] sm:$0xff] }
 0x2dd   :  { %1378 = vmatmul.mubr.bf16.vlgmr.msra.gmra.mxu0 %v4073_v37  ;;  %1419 = vmatmul.mubr.bf16.vlgmr.msra.gmra.mxu1 %v4073_v37  ;;  %v5478_v37 = vld [vmem:[#allocation15_spill] sm:$0xff] }
 0x2de   :  { %1493 = vmatpush1.bf16.msra.mxu0 %v3073_v5  ;;  %1534 = vmatpush1.bf16.msra.mxu1 %v3083_v9  ;;  %v5479_v5 = vld [vmem:[#allocation16_spill] sm:$0xff]  ;;  %v5480_v9 = vld [vmem:[#allocation17_spill] sm:$0xff] }
 0x2df   :  { %1494 = vmatprep.subr.bf16.mxu0 %v3085_v10  ;;  %1535 = vmatprep.subr.bf16.mxu1 %v3098_v15  ;;  %v5481_v10 = vld [vmem:[#allocation18_spill] sm:$0xff]  ;;  %v5482_v15 = vld [vmem:[#allocation19_spill] sm:$0xff] }
 0x2e2   :  { %1495 = vmatpush1.bf16.msra.mxu0 %v3112_v19  ;;  %1536 = vmatpush1.bf16.msra.mxu1 %v3116_v20  ;;  %v5483_v19 = vld [vmem:[#allocation20_spill] sm:$0xff]  ;;  %v5484_v20 = vld [vmem:[#allocation21_spill] sm:$0xff] }
 0x2e3   :  { %1496 = vmatprep.subr.bf16.mxu0 %v5474_v2  ;;  %1537 = vmatprep.subr.bf16.mxu1 %v5475_v3  ;;  %v5485_v2 = vld [vmem:[#allocation22_spill] sm:$0xff]  ;;  %v5486_v3 = vld [vmem:[#allocation23_spill] sm:$0xff] }
 0x2e6   :  { %1497 = vmatpush1.bf16.msra.mxu0 %v5476_v8  ;;  %1538 = vmatpush1.bf16.msra.mxu1 %v5477_v14  ;;  %v5487_v8 = vld [vmem:[#allocation24_spill] sm:$0xff]  ;;  %v5488_v14 = vld [vmem:[#allocation25_spill] sm:$0xff] }
 0x2e7   :  { %1498 = vmatprep.subr.bf16.mxu0 %v5478_v37  ;;  %1539 = vmatprep.subr.bf16.mxu1 %v5479_v5  ;;  %v5489_v37 = vld [vmem:[#allocation26_spill] sm:$0xff]  ;;  %v5490_v5 = vld [vmem:[#allocation27_spill] sm:$0xff] }
 0x2ea   :  { %1499 = vmatpush1.bf16.msra.mxu0 %v5480_v9  ;;  %1540 = vmatpush1.bf16.msra.mxu1 %v5481_v10  ;;  %v5491_v9 = vld [vmem:[#allocation28_spill] sm:$0xff]  ;;  %v5492_v10 = vld [vmem:[#allocation29_spill] sm:$0xff] }
 0x2eb   :  { %1500 = vmatprep.subr.bf16.mxu0 %v5482_v15  ;;  %1541 = vmatprep.subr.bf16.mxu1 %v5483_v19  ;;  %v5493_v15 = vld [vmem:[#allocation30_spill] sm:$0xff]  ;;  %v5494_v19 = vld [vmem:[#allocation31_spill] sm:$0xff] }
 0x2ee   :  { %1501 = vmatpush1.bf16.msra.mxu0 %v5484_v20  ;;  %1542 = vmatpush1.bf16.msra.mxu1 %v5485_v2  ;;  %v5495_v20 = vld [vmem:[#allocation32_spill] sm:$0xff]  ;;  %v5496_v2 = vld [vmem:[#allocation33_spill] sm:$0xff] }
 0x2ef   :  { %1502 = vmatprep.subr.bf16.mxu0 %v5486_v3  ;;  %1543 = vmatprep.subr.bf16.mxu1 %v5487_v8  ;;  %v5497_v3 = vld [vmem:[#allocation34_spill] sm:$0xff]  ;;  %v5498_v8 = vld [vmem:[#allocation35_spill] sm:$0xff] }
 0x2f2   :  { %1503 = vmatpush1.bf16.msra.mxu0 %v5488_v14  ;;  %1544 = vmatpush1.bf16.msra.mxu1 %v5489_v37  ;;  %v5499_v14 = vld [vmem:[#allocation36_spill] sm:$0xff]  ;;  %v5500_v37 = vld [vmem:[#allocation37_spill] sm:$0xff] }
 0x2f3   :  { %1504 = vmatprep.subr.bf16.mxu0 %v5490_v5  ;;  %1545 = vmatprep.subr.bf16.mxu1 %v5491_v9  ;;  %v5501_v5 = vld [vmem:[#allocation38_spill] sm:$0xff]  ;;  %v5502_v9 = vld [vmem:[#allocation39_spill] sm:$0xff] }
 0x2f6   :  { %1505 = vmatpush1.bf16.msra.mxu0 %v5492_v10  ;;  %1546 = vmatpush1.bf16.msra.mxu1 %v5493_v15  ;;  %v5503_v10 = vld [vmem:[#allocation40_spill] sm:$0xff]  ;;  %v5504_v15 = vld [vmem:[#allocation41_spill] sm:$0xff] }
 0x2f7   :  { %1506 = vmatprep.subr.bf16.mxu0 %v5494_v19  ;;  %1547 = vmatprep.subr.bf16.mxu1 %v5495_v20  ;;  %v5505_v19 = vld [vmem:[#allocation42_spill] sm:$0xff]  ;;  %v5506_v20 = vld [vmem:[#allocation43_spill] sm:$0xff] }
 0x2fa   :  { %1507 = vmatpush1.bf16.msra.mxu0 %v5496_v2  ;;  %1548 = vmatpush1.bf16.msra.mxu1 %v5497_v3  ;;  %v5507_v2 = vld [vmem:[#allocation44_spill] sm:$0xff]  ;;  %v5508_v3 = vld [vmem:[#allocation45_spill] sm:$0xff] }
 0x2fb   :  { %1508 = vmatprep.subr.bf16.mxu0 %v5498_v8  ;;  %1549 = vmatprep.subr.bf16.mxu1 %v5499_v14  ;;  %v5509_v8 = vld [vmem:[#allocation46_spill] sm:$0xff]  ;;  %v5510_v14 = vld [vmem:[#allocation47_spill] sm:$0xff] }
 0x2fe   :  { %1509 = vmatpush2.bf16.msra.mxu0 %v5500_v37  ;;  %1550 = vmatpush2.bf16.msra.mxu1 %v5501_v5  ;;  %v5511_v37 = vld [vmem:[#allocation48_spill] sm:$0xff]  ;;  %v5512_v5 = vld [vmem:[#allocation49_spill] sm:$0xff] }
 0x2ff   :  { %1510 = vmatprep.subr.bf16.mxu0 %v5502_v9  ;;  %1551 = vmatprep.subr.bf16.mxu1 %v5503_v10  ;;  %v5513_v9 = vld [vmem:[#allocation50_spill] sm:$0xff]  ;;  %v5514_v10 = vld [vmem:[#allocation51_spill] sm:$0xff] }
 0x302   :  { %1511 = vmatpush2.bf16.msra.mxu0 %v5504_v15  ;;  %1552 = vmatpush2.bf16.msra.mxu1 %v5505_v19  ;;  %v5515_v15 = vld [vmem:[#allocation52_spill] sm:$0xff]  ;;  %v5516_v19 = vld [vmem:[#allocation53_spill] sm:$0xff] }
 0x303   :  { %1512 = vmatprep.subr.bf16.mxu0 %v5506_v20  ;;  %1553 = vmatprep.subr.bf16.mxu1 %v5507_v2  ;;  %v5517_v20 = vld [vmem:[#allocation54_spill] sm:$0xff]  ;;  %v5518_v2 = vld [vmem:[#allocation55_spill] sm:$0xff] }
 0x306   :  { %1513 = vmatpush2.bf16.msra.mxu0 %v5508_v3  ;;  %1554 = vmatpush2.bf16.msra.mxu1 %v5509_v8  ;;  %v5519_v3 = vld [vmem:[#allocation56_spill] sm:$0xff]  ;;  %v5520_v8 = vld [vmem:[#allocation57_spill] sm:$0xff] }
 0x307   :  { %1514 = vmatprep.subr.bf16.mxu0 %v5510_v14  ;;  %1555 = vmatprep.subr.bf16.mxu1 %v5511_v37  ;;  %v5521_v14 = vld [vmem:[#allocation58_spill] sm:$0xff]  ;;  %v5522_v37 = vld [vmem:[#allocation59_spill] sm:$0xff] }
 0x30a   :  { %1515 = vmatpush2.bf16.msra.mxu0 %v5512_v5  ;;  %1556 = vmatpush2.bf16.msra.mxu1 %v5513_v9  ;;  %v5523_v5 = vld [vmem:[#allocation60_spill] sm:$0xff]  ;;  %v5524_v9 = vld [vmem:[#allocation61_spill] sm:$0xff] }
 0x30b   :  { %1516 = vmatprep.subr.bf16.mxu0 %v5514_v10  ;;  %1557 = vmatprep.subr.bf16.mxu1 %v5515_v15  ;;  %v5525_v10 = vld [vmem:[#allocation62_spill] sm:$0xff]  ;;  %v5526_v15 = vld [vmem:[#allocation63_spill] sm:$0xff] }
 0x30e   :  { %1517 = vmatpush2.bf16.msra.mxu0 %v5516_v19  ;;  %1558 = vmatpush2.bf16.msra.mxu1 %v5517_v20  ;;  %v5527_v19 = vld [vmem:[#allocation64_spill] sm:$0xff]  ;;  %v5528_v20 = vld [vmem:[#allocation65_spill] sm:$0xff] }
 0x30f   :  { %1518 = vmatprep.subr.bf16.mxu0 %v5518_v2  ;;  %1559 = vmatprep.subr.bf16.mxu1 %v5519_v3  ;;  %v5529_v2 = vld [vmem:[#allocation66_spill] sm:$0xff]  ;;  %v5530_v3 = vld [vmem:[#allocation67_spill] sm:$0xff] }
 0x312   :  { %1519 = vmatpush2.bf16.msra.mxu0 %v5520_v8  ;;  %1560 = vmatpush2.bf16.msra.mxu1 %v5521_v14  ;;  %v5531_v8 = vld [vmem:[#allocation68_spill] sm:$0xff] }
 0x313   :  { %1520 = vmatprep.subr.bf16.mxu0 %v5522_v37  ;;  %1561 = vmatprep.subr.bf16.mxu1 %v5523_v5 }
 0x316   :  { %1521 = vmatpush2.bf16.msra.mxu0 %v5524_v9  ;;  %1562 = vmatpush2.bf16.msra.mxu1 %v5525_v10 }
 0x317   :  { %1522 = vmatprep.subr.bf16.mxu0 %v5526_v15  ;;  %1563 = vmatprep.subr.bf16.mxu1 %v5527_v19  ;;  %v2762_v19 = vld [vmem:[%s4932_s0 + $0x40] sm:$0xff] }
 0x318   :  { %v1254_v63 = vunpack.c.h.bf16 %v2762_v19 }
 0x31a   :  { %1523 = vmatpush2.bf16.msra.mxu0 %v5528_v20  ;;  %1564 = vmatpush2.bf16.msra.mxu1 %v5529_v2  ;;  %v2763_v2 = vld [vmem:[%s4932_s0 + $0x48] sm:$0xff]  ;;  %v1253_v20 = vunpack.c.l.bf16 %v2762_v19 }
 0x31b   :  { %1574 = vmatprep.subr.bf16.mxu0 %v5530_v3  ;;  %1615 = vmatprep.subr.bf16.mxu1 %v5531_v8  ;;  %v1255_v3 = vunpack.c.l.bf16 %v2763_v2  ;;  %v1256_v15 = vunpack.c.h.bf16 %v2763_v2 }
 0x35d   :  { %v1297_v14 = vpop.f32.mrf.mxu0  ;;  %v1338_v37 = vpop.f32.mrf.mxu1 }
 0x35e   :  { %v1427_v8 = vadd.f32 %v1297_v14, %v1253_v20  ;;  %v1429_v0 = vadd.f32 %v1338_v37, %v1255_v3  ;;  %v2764_v3 = vld [vmem:[%s4932_s0 + $0x50] sm:$0xff] }
 0x35f   :  { %v1299_v42 = vpop.f32.mrf.mxu0  ;;  %v1340_v5 = vpop.f32.mrf.mxu1 }
 0x360   :  { %v1430_v13 = vadd.f32 %v1340_v5, %v1256_v15  ;;  %v1435_v16 = vsub.f32 0.0, %v1427_v8  ;;  %v2765_v5 = vld [vmem:[%s4932_s0 + $0x58] sm:$0xff] }
 0x361   :  { %v1301_v47 = vpop.f32.mrf.mxu0  ;;  %v1342_v9 = vpop.f32.mrf.mxu1  ;;  %v1260_v14 = vunpack.c.h.bf16 %v2765_v5 }
 0x362   :  { %v1428_v47 = vadd.f32 %v1299_v42, %v1254_v63  ;;  %v1437_v9 = vsub.f32 0.0, %v1429_v0  ;;  %v1258_v0 = vunpack.c.h.bf16 %v2764_v3 }
 0x363   :  { %v1302_v48 = vpop.f32.mrf.mxu0  ;;  %v1343_v10 = vpop.f32.mrf.mxu1 }
 0x364   :  { %v1438_v48 = vsub.f32 0.0, %v1430_v13  ;;  %v1441_v10 = vmul.f32 1.442695, %v1435_v16  ;;  %v1436_v26 = vsub.f32 0.0, %v1428_v47  ;;  %v1445_v24 = vmul.f32 1.442695, %v1437_v9 }
 0x365   :  { %v1257_v13 = vunpack.c.l.bf16 %v2764_v3  ;;  %v1259_v16 = vunpack.c.l.bf16 %v2765_v5 }
 0x366   :  { %v1447_v34 = vmul.f32 1.442695, %v1438_v48  ;;  %2851 = vpow2.f32 %v1441_v10  ;;  %v1443_v56 = vmul.f32 1.442695, %v1436_v26 }
 0x367   :  { %2853 = vpow2.f32 %v1445_v24 }
 0x368   :  { %2855 = vpow2.f32 %v1447_v34 }
 0x369   :  { %2857 = vpow2.f32 %v1443_v56 }
 0x373   :  { %v2852_v25 = vpop.eup %2851 }
 0x374   :  { %v2854_v57 = vpop.eup %2853  ;;  %v1453_v15 = vadd.f32 1.0, %v2852_v25 }
 0x375   :  { %v2856_v8 = vpop.eup %2855  ;;  %v1455_v20 = vadd.f32 1.0, %v2854_v57 }
 0x376   :  { %v2858_v19 = vpop.eup %2857  ;;  %v1456_v42 = vadd.f32 1.0, %v2856_v8  ;;  %2859 = vrcp.f32 %v1453_v15 }
 0x377   :  { %v1454_v26 = vadd.f32 1.0, %v2858_v19  ;;  %2861 = vrcp.f32 %v1455_v20 }
 0x378   :  { %2863 = vrcp.f32 %v1456_v42 }
 0x383   :  { %v2860_v19 = vpop.eup %2859 }
 0x384   :  { %v2862_v20 = vpop.eup %2861 }
 0x39d   :  { %v1379_v63 = vpop.f32.mrf.mxu0  ;;  %v1420_v2 = vpop.f32.mrf.mxu1 }
 0x39e   :  { %v1431_v56 = vadd.f32 %v1379_v63, %v1257_v13  ;;  %v1433_v34 = vadd.f32 %v1420_v2, %v1259_v16  ;;  %v2864_v13 = vpop.eup %2863  ;;  %v1467_v63 = vmul.f32 %v2862_v20, %v4066_v27  ;;  %v5535_v20 = vld [vmem:[#allocation93_spill] sm:$0xff] }
 0x39f   :  { %v1381_v24 = vpop.f32.mrf.mxu0  ;;  %v1422_v37 = vpop.f32.mrf.mxu1  ;;  %v1468_v2 = vmul.f32 %v2864_v13, %v4069_v50  ;;  %v5536_v13 = vld [vmem:[#allocation94_spill] sm:$0xff] }
 0x3a0   :  { %v1439_v47 = vsub.f32 0.0, %v1431_v56  ;;  %2865 = vtanh.f32 %v1433_v34  ;;  %v1432_v25 = vadd.f32 %v1381_v24, %v1258_v0  ;;  %v1434_v9 = vadd.f32 %v1422_v37, %v1260_v14 }
 0x3a1   :  { %2867 = vrcp.f32 %v1454_v26  ;;  %v1383_v57 = vpop.f32.mrf.mxu0  ;;  %v1424_v48 = vpop.f32.mrf.mxu1 }
 0x3a2   :  { %v1449_v10 = vmul.f32 1.442695, %v1439_v47  ;;  %v1440_v3 = vsub.f32 0.0, %v1432_v25  ;;  %2869 = vtanh.f32 %v1434_v9 }
 0x3a3   :  { %v1384_v5 = vpop.f32.mrf.mxu0  ;;  %v1425_v8 = vpop.f32.mrf.mxu1 }
 0x3a4   :  { %2871 = vpow2.f32 %v1449_v10  ;;  %v1451_v15 = vmul.f32 1.442695, %v1440_v3  ;;  %v5532_v8 = vld [vmem:[#allocation90_spill] sm:$0xff] }
 0x3a6   :  { %2873 = vpow2.f32 %v1451_v15  ;;  %v5533_v15 = vld [vmem:[#allocation91_spill] sm:$0xff] }
 0x3ad   :  { %v2866_v16 = vpop.eup %2865 }
 0x3ae   :  { %v2868_v42 = vpop.eup %2867  ;;  %v1469_v0 = vmul.f32 %v2866_v16, %v2860_v19  ;;  %v5534_v19 = vld [vmem:[#allocation92_spill] sm:$0xff]  ;;  %v5537_v16 = vld [vmem:[#allocation95_spill] sm:$0xff] }
 0x3af   :  { %v2870_v14 = vpop.eup %2869 }
 0x3b0   :  { %v4220_v26 = vadd.f32 %v1469_v0, %v1467_v63  ;;  %v1470_v56 = vmul.f32 %v2870_v14, %v2868_v42  ;;  %v5538_v42 = vld [vmem:[#allocation96_spill] sm:$0xff]  ;;  %v5539_v63 = vld [vmem:[#allocation97_spill] sm:$0xff]  ;;  %v5540_v0 = vld [vmem:[#allocation98_spill] sm:$0xff] }
 0x3b1   :  { %v2872_v34 = vpop.eup %2871  ;;  %v5541_v14 = vld [vmem:[#allocation116_spill] sm:$0xff] }
 0x3b2   :  { %v1457_v24 = vadd.f32 1.0, %v2872_v34  ;;  %v4223_v37 = vadd.f32 %v1470_v56, %v1468_v2  ;;  %2875 = vtanh.f32 %v4220_v26  ;;  %v5542_v2 = vld [vmem:[#allocation117_spill] sm:$0xff]  ;;  %v5543_v56 = vld [vmem:[#allocation118_spill] sm:$0xff]  ;;  %v5544_v34 = vld [vmem:[#allocation119_spill] sm:$0xff] }
 0x3b3   :  { %v2874_v47 = vpop.eup %2873 }
 0x3b4   :  { %2877 = vrcp.f32 %v1457_v24  ;;  %v1458_v25 = vadd.f32 1.0, %v2874_v47  ;;  %v5545_v24 = vld [vmem:[#allocation120_spill] sm:$0xff]  ;;  %v5546_v47 = vld [vmem:[#allocation121_spill] sm:$0xff] }
 0x3b5   :  { %2879 = vtanh.f32 %v4223_v37 }
 0x3b6   :  { %2881 = vrcp.f32 %v1458_v25  ;;  %v5547_v25 = vld [vmem:[#allocation122_spill] sm:$0xff] }
 0x3bf   :  { %v2876_v27 = vpop.eup %2875 }
 0x3c1   :  { %v2878_v9 = vpop.eup %2877 }
 0x3c2   :  { %v2880_v57 = vpop.eup %2879  ;;  %v1475_v10 = vmul.f32 %v2878_v9, %v2876_v27  ;;  %v5548_v27 = vld [vmem:[#allocation123_spill] sm:$0xff]  ;;  %v5549_v9 = vld [vmem:[#allocation124_spill] sm:$0xff] }
 0x3c3   :  { %v2882_v48 = vpop.eup %2881 }
 0x3c4   :  { %v1476_v3 = vmul.f32 %v2882_v48, %v2880_v57  ;;  %v4227_v5 = vpack.c.bf16 %v1475_v10, %v1475_v10  ;;  %v5550_v57 = vld [vmem:[#allocation125_spill] sm:$0xff]  ;;  %v5551_v48 = vld [vmem:[#allocation126_spill] sm:$0xff]  ;;  %v5552_v10 = vld [vmem:[#allocation127_spill] sm:$0xff] }
 0x3c6   :  { %v1491_v50 = vpack.c.bf16 %v1476_v3, %v1476_v3  ;;  %v5553_v3 = vld [vmem:[#allocation128_spill] sm:$0xff] }
 0x3c8   :  { %1524 = vmatprep.mubr.bf16.mxu0 %v1491_v50  ;;  %1565 = vmatprep.mubr.bf16.mxu1 %v1491_v50 }
 0x3c9   :  { %1525 = vmatmul.mubr.bf16.vlgmr.msra.gmra.mxu0 %v4227_v5  ;;  %1566 = vmatmul.mubr.bf16.vlgmr.msra.gmra.mxu1 %v4227_v5 }
 0x3ca   :  { %1575 = vmatpush1.bf16.msra.mxu0 %v5355_v55  ;;  %1616 = vmatpush1.bf16.msra.mxu1 %v5356_v49 }
 0x3cb   :  { %1606 = vmatprep.mubr.bf16.mxu0 %v1491_v50  ;;  %1647 = vmatprep.mubr.bf16.mxu1 %v1491_v50  ;;  %v5554_v50 = vld [vmem:[#allocation129_spill] sm:$0xff] }
 0x3cc   :  { %1576 = vmatprep.subr.bf16.mxu0 %v5357_v23  ;;  %1617 = vmatprep.subr.bf16.mxu1 %v5358_v11 }
 0x3ce   :  { %1577 = vmatpush1.bf16.msra.mxu0 %v5359_v18  ;;  %1618 = vmatpush1.bf16.msra.mxu1 %v5360_v17 }
 0x3cf   :  { %1578 = vmatprep.subr.bf16.mxu0 %v5361_v32  ;;  %1619 = vmatprep.subr.bf16.mxu1 %v5362_v7 }
 0x3d2   :  { %1579 = vmatpush1.bf16.msra.mxu0 %v5363_v33  ;;  %1620 = vmatpush1.bf16.msra.mxu1 %v5442_v36 }
 0x3d3   :  { %1580 = vmatprep.subr.bf16.mxu0 %v5443_v35  ;;  %1621 = vmatprep.subr.bf16.mxu1 %v5444_v38 }
 0x3d6   :  { %1581 = vmatpush1.bf16.msra.mxu0 %v5445_v45  ;;  %1622 = vmatpush1.bf16.msra.mxu1 %v5446_v46 }
 0x3d7   :  { %1582 = vmatprep.subr.bf16.mxu0 %v5447_v52  ;;  %1623 = vmatprep.subr.bf16.mxu1 %v5448_v30 }
 0x3da   :  { %1583 = vmatpush1.bf16.msra.mxu0 %v5449_v53  ;;  %1624 = vmatpush1.bf16.msra.mxu1 %v5450_v29 }
 0x3db   :  { %1584 = vmatprep.subr.bf16.mxu0 %v5451_v28  ;;  %1625 = vmatprep.subr.bf16.mxu1 %v5452_v60 }
 0x3de   :  { %1585 = vmatpush1.bf16.msra.mxu0 %v5453_v61  ;;  %1626 = vmatpush1.bf16.msra.mxu1 %v5532_v8 }
 0x3df   :  { %1586 = vmatprep.subr.bf16.mxu0 %v5533_v15  ;;  %1627 = vmatprep.subr.bf16.mxu1 %v5534_v19 }
 0x3e2   :  { %1587 = vmatpush1.bf16.msra.mxu0 %v5535_v20  ;;  %1628 = vmatpush1.bf16.msra.mxu1 %v5536_v13 }
 0x3e3   :  { %1588 = vmatprep.subr.bf16.mxu0 %v5537_v16  ;;  %1629 = vmatprep.subr.bf16.mxu1 %v5538_v42 }
 0x3e6   :  { %1589 = vmatpush1.bf16.msra.mxu0 %v5539_v63  ;;  %1630 = vmatpush1.bf16.msra.mxu1 %v5540_v0 }
 0x3e7   :  { %1590 = vmatprep.subr.bf16.mxu0 %v5463_v51  ;;  %1631 = vmatprep.subr.bf16.mxu1 %v5464_v40 }
 0x3ea   :  { %1591 = vmatpush2.bf16.msra.mxu0 %v5465_v62  ;;  %1632 = vmatpush2.bf16.msra.mxu1 %v5466_v4 }
 0x3eb   :  { %1592 = vmatprep.subr.bf16.mxu0 %v5467_v44  ;;  %1633 = vmatprep.subr.bf16.mxu1 %v5468_v22 }
 0x3ee   :  { %1593 = vmatpush2.bf16.msra.mxu0 %v5469_v12  ;;  %1634 = vmatpush2.bf16.msra.mxu1 %v5470_v54 }
 0x3ef   :  { %1594 = vmatprep.subr.bf16.mxu0 %v5471_v21  ;;  %1635 = vmatprep.subr.bf16.mxu1 %v5472_v43 }
 0x3f2   :  { %1595 = vmatpush2.bf16.msra.mxu0 %v5473_v59  ;;  %1636 = vmatpush2.bf16.msra.mxu1 %v5396_v39 }
 0x3f3   :  { %1596 = vmatprep.subr.bf16.mxu0 %v5397_v58  ;;  %1637 = vmatprep.subr.bf16.mxu1 %v5398_v41 }
 0x3f6   :  { %1597 = vmatpush2.bf16.msra.mxu0 %v5399_v31  ;;  %1638 = vmatpush2.bf16.msra.mxu1 %v5400_v6 }
 0x3f7   :  { %1598 = vmatprep.subr.bf16.mxu0 %v5401_v1  ;;  %1639 = vmatprep.subr.bf16.mxu1 %v5541_v14 }
 0x3fa   :  { %1599 = vmatpush2.bf16.msra.mxu0 %v5542_v2  ;;  %1640 = vmatpush2.bf16.msra.mxu1 %v5543_v56 }
 0x3fb   :  { %1600 = vmatprep.subr.bf16.mxu0 %v5544_v34  ;;  %1641 = vmatprep.subr.bf16.mxu1 %v5545_v24  ;;  %v5555_v34 = vld [vmem:[#allocation130_spill] sm:$0xff]  ;;  %v5556_v24 = vld [vmem:[#allocation3_spill] sm:$0xff] }
 0x3fe   :  { %1601 = vmatpush2.bf16.msra.mxu0 %v5546_v47  ;;  %1642 = vmatpush2.bf16.msra.mxu1 %v5547_v25  ;;  %v5557_v47 = vld [vmem:[#allocation5_spill] sm:$0xff] }
 0x3ff   :  { %1602 = vmatprep.subr.bf16.mxu0 %v5548_v27  ;;  %1643 = vmatprep.subr.bf16.mxu1 %v5549_v9  ;;  %v5558_v9 = vld [vmem:[#allocation4_spill] sm:$0xff]  ;;  %v5567_v27 = vld [vmem:[#allocation14_spill] sm:$0xff] }
 0x402   :  { %1603 = vmatpush2.bf16.msra.mxu0 %v5550_v57  ;;  %1644 = vmatpush2.bf16.msra.mxu1 %v5551_v48  ;;  %v5559_v57 = vld [vmem:[#allocation6_spill] sm:$0xff]  ;;  %v5560_v48 = vld [vmem:[#allocation7_spill] sm:$0xff] }
 0x403   :  { %1604 = vmatprep.subr.bf16.mxu0 %v5552_v10  ;;  %1645 = vmatprep.subr.bf16.mxu1 %v5553_v3  ;;  %v5561_v10 = vld [vmem:[#allocation8_spill] sm:$0xff]  ;;  %v5562_v3 = vld [vmem:[#allocation9_spill] sm:$0xff] }
 0x406   :  { %1605 = vmatpush2.bf16.msra.mxu0 %v5554_v50  ;;  %1646 = vmatpush2.bf16.msra.mxu1 %v5555_v34  ;;  %v5563_v50 = vld [vmem:[#allocation10_spill] sm:$0xff]  ;;  %v5564_v34 = vld [vmem:[#allocation11_spill] sm:$0xff] }
 0x407   :  { %1721 = vmatprep.subr.bf16.mxu0 %v5556_v24  ;;  %1762 = vmatprep.subr.bf16.mxu1 %v5557_v47  ;;  %v5565_v24 = vld [vmem:[#allocation12_spill] sm:$0xff]  ;;  %v5566_v47 = vld [vmem:[#allocation13_spill] sm:$0xff] }
 0x409   :  { %1607 = vmatmul.mubr.bf16.vlgmr.msra.gmra.mxu0 %v4227_v5  ;;  %1648 = vmatmul.mubr.bf16.vlgmr.msra.gmra.mxu1 %v4227_v5  ;;  %v5568_v5 = vld [vmem:[#allocation15_spill] sm:$0xff] }
 0x40a   :  { %1722 = vmatpush1.bf16.msra.mxu0 %v5558_v9  ;;  %1763 = vmatpush1.bf16.msra.mxu1 %v5559_v57  ;;  %v5569_v9 = vld [vmem:[#allocation16_spill] sm:$0xff]  ;;  %v5570_v57 = vld [vmem:[#allocation17_spill] sm:$0xff] }
 0x40b   :  { %1723 = vmatprep.subr.bf16.mxu0 %v5560_v48  ;;  %1764 = vmatprep.subr.bf16.mxu1 %v5561_v10  ;;  %v5571_v48 = vld [vmem:[#allocation18_spill] sm:$0xff]  ;;  %v5572_v10 = vld [vmem:[#allocation19_spill] sm:$0xff] }
 0x40e   :  { %1724 = vmatpush1.bf16.msra.mxu0 %v5562_v3  ;;  %1765 = vmatpush1.bf16.msra.mxu1 %v5563_v50  ;;  %v5573_v3 = vld [vmem:[#allocation20_spill] sm:$0xff]  ;;  %v5574_v50 = vld [vmem:[#allocation21_spill] sm:$0xff] }
 0x40f   :  { %1725 = vmatprep.subr.bf16.mxu0 %v5564_v34  ;;  %1766 = vmatprep.subr.bf16.mxu1 %v5565_v24  ;;  %v5575_v34 = vld [vmem:[#allocation22_spill] sm:$0xff]  ;;  %v5576_v24 = vld [vmem:[#allocation23_spill] sm:$0xff] }
 0x412   :  { %1726 = vmatpush1.bf16.msra.mxu0 %v5566_v47  ;;  %1767 = vmatpush1.bf16.msra.mxu1 %v5567_v27  ;;  %v5577_v47 = vld [vmem:[#allocation24_spill] sm:$0xff]  ;;  %v5578_v27 = vld [vmem:[#allocation25_spill] sm:$0xff] }
 0x413   :  { %1727 = vmatprep.subr.bf16.mxu0 %v5568_v5  ;;  %1768 = vmatprep.subr.bf16.mxu1 %v5569_v9  ;;  %v5579_v5 = vld [vmem:[#allocation26_spill] sm:$0xff]  ;;  %v5580_v9 = vld [vmem:[#allocation27_spill] sm:$0xff] }
 0x416   :  { %1728 = vmatpush1.bf16.msra.mxu0 %v5570_v57  ;;  %1769 = vmatpush1.bf16.msra.mxu1 %v5571_v48  ;;  %v5581_v57 = vld [vmem:[#allocation28_spill] sm:$0xff]  ;;  %v5582_v48 = vld [vmem:[#allocation29_spill] sm:$0xff] }
 0x417   :  { %1729 = vmatprep.subr.bf16.mxu0 %v5572_v10  ;;  %1770 = vmatprep.subr.bf16.mxu1 %v5573_v3  ;;  %v5583_v10 = vld [vmem:[#allocation30_spill] sm:$0xff]  ;;  %v5584_v3 = vld [vmem:[#allocation31_spill] sm:$0xff] }
 0x41a   :  { %1730 = vmatpush1.bf16.msra.mxu0 %v5574_v50  ;;  %1771 = vmatpush1.bf16.msra.mxu1 %v5575_v34  ;;  %v5585_v50 = vld [vmem:[#allocation32_spill] sm:$0xff]  ;;  %v5586_v34 = vld [vmem:[#allocation33_spill] sm:$0xff] }
 0x41b   :  { %1731 = vmatprep.subr.bf16.mxu0 %v5576_v24  ;;  %1772 = vmatprep.subr.bf16.mxu1 %v5577_v47  ;;  %v5587_v24 = vld [vmem:[#allocation34_spill] sm:$0xff]  ;;  %v5588_v47 = vld [vmem:[#allocation35_spill] sm:$0xff] }
 0x41e   :  { %1732 = vmatpush1.bf16.msra.mxu0 %v5578_v27  ;;  %1773 = vmatpush1.bf16.msra.mxu1 %v5579_v5  ;;  %v5589_v27 = vld [vmem:[#allocation36_spill] sm:$0xff]  ;;  %v5590_v5 = vld [vmem:[#allocation37_spill] sm:$0xff] }
 0x41f   :  { %1733 = vmatprep.subr.bf16.mxu0 %v5580_v9  ;;  %1774 = vmatprep.subr.bf16.mxu1 %v5581_v57  ;;  %v5591_v9 = vld [vmem:[#allocation38_spill] sm:$0xff]  ;;  %v5592_v57 = vld [vmem:[#allocation39_spill] sm:$0xff] }
 0x422   :  { %1734 = vmatpush1.bf16.msra.mxu0 %v5582_v48  ;;  %1775 = vmatpush1.bf16.msra.mxu1 %v5583_v10  ;;  %v5593_v48 = vld [vmem:[#allocation40_spill] sm:$0xff]  ;;  %v5594_v10 = vld [vmem:[#allocation41_spill] sm:$0xff] }
 0x423   :  { %1735 = vmatprep.subr.bf16.mxu0 %v5584_v3  ;;  %1776 = vmatprep.subr.bf16.mxu1 %v5585_v50  ;;  %v5595_v3 = vld [vmem:[#allocation42_spill] sm:$0xff]  ;;  %v5596_v50 = vld [vmem:[#allocation43_spill] sm:$0xff] }
 0x426   :  { %1736 = vmatpush1.bf16.msra.mxu0 %v5586_v34  ;;  %1777 = vmatpush1.bf16.msra.mxu1 %v5587_v24  ;;  %v5597_v34 = vld [vmem:[#allocation44_spill] sm:$0xff]  ;;  %v5598_v24 = vld [vmem:[#allocation45_spill] sm:$0xff] }
 0x427   :  { %1737 = vmatprep.subr.bf16.mxu0 %v5588_v47  ;;  %1778 = vmatprep.subr.bf16.mxu1 %v5589_v27  ;;  %v5599_v47 = vld [vmem:[#allocation46_spill] sm:$0xff]  ;;  %v5600_v27 = vld [vmem:[#allocation47_spill] sm:$0xff] }
 0x42a   :  { %1738 = vmatpush2.bf16.msra.mxu0 %v5590_v5  ;;  %1779 = vmatpush2.bf16.msra.mxu1 %v5591_v9  ;;  %v5601_v5 = vld [vmem:[#allocation48_spill] sm:$0xff]  ;;  %v5602_v9 = vld [vmem:[#allocation49_spill] sm:$0xff] }
 0x42b   :  { %1739 = vmatprep.subr.bf16.mxu0 %v5592_v57  ;;  %1780 = vmatprep.subr.bf16.mxu1 %v5593_v48  ;;  %v5603_v57 = vld [vmem:[#allocation50_spill] sm:$0xff]  ;;  %v5604_v48 = vld [vmem:[#allocation51_spill] sm:$0xff] }
 0x42e   :  { %1740 = vmatpush2.bf16.msra.mxu0 %v5594_v10  ;;  %1781 = vmatpush2.bf16.msra.mxu1 %v5595_v3  ;;  %v5605_v10 = vld [vmem:[#allocation52_spill] sm:$0xff]  ;;  %v5606_v3 = vld [vmem:[#allocation53_spill] sm:$0xff] }
 0x42f   :  { %1741 = vmatprep.subr.bf16.mxu0 %v5596_v50  ;;  %1782 = vmatprep.subr.bf16.mxu1 %v5597_v34  ;;  %v5607_v50 = vld [vmem:[#allocation54_spill] sm:$0xff]  ;;  %v5608_v34 = vld [vmem:[#allocation55_spill] sm:$0xff] }
 0x432   :  { %1742 = vmatpush2.bf16.msra.mxu0 %v5598_v24  ;;  %1783 = vmatpush2.bf16.msra.mxu1 %v5599_v47  ;;  %v5609_v24 = vld [vmem:[#allocation56_spill] sm:$0xff]  ;;  %v5610_v47 = vld [vmem:[#allocation57_spill] sm:$0xff] }
 0x433   :  { %1743 = vmatprep.subr.bf16.mxu0 %v5600_v27  ;;  %1784 = vmatprep.subr.bf16.mxu1 %v5601_v5  ;;  %v5611_v27 = vld [vmem:[#allocation58_spill] sm:$0xff]  ;;  %v5612_v5 = vld [vmem:[#allocation59_spill] sm:$0xff] }
 0x436   :  { %1744 = vmatpush2.bf16.msra.mxu0 %v5602_v9  ;;  %1785 = vmatpush2.bf16.msra.mxu1 %v5603_v57  ;;  %v5613_v9 = vld [vmem:[#allocation60_spill] sm:$0xff]  ;;  %v5614_v57 = vld [vmem:[#allocation61_spill] sm:$0xff] }
 0x437   :  { %1745 = vmatprep.subr.bf16.mxu0 %v5604_v48  ;;  %1786 = vmatprep.subr.bf16.mxu1 %v5605_v10  ;;  %v5615_v48 = vld [vmem:[#allocation62_spill] sm:$0xff]  ;;  %v5616_v10 = vld [vmem:[#allocation63_spill] sm:$0xff] }
 0x43a   :  { %1746 = vmatpush2.bf16.msra.mxu0 %v5606_v3  ;;  %1787 = vmatpush2.bf16.msra.mxu1 %v5607_v50  ;;  %v5617_v3 = vld [vmem:[#allocation64_spill] sm:$0xff]  ;;  %v5618_v50 = vld [vmem:[#allocation65_spill] sm:$0xff] }
 0x43b   :  { %1747 = vmatprep.subr.bf16.mxu0 %v5608_v34  ;;  %1788 = vmatprep.subr.bf16.mxu1 %v5609_v24  ;;  %v5619_v34 = vld [vmem:[#allocation66_spill] sm:$0xff]  ;;  %v5620_v24 = vld [vmem:[#allocation67_spill] sm:$0xff] }
 0x43e   :  { %1748 = vmatpush2.bf16.msra.mxu0 %v5610_v47  ;;  %1789 = vmatpush2.bf16.msra.mxu1 %v5611_v27  ;;  %v5621_v47 = vld [vmem:[#allocation68_spill] sm:$0xff] }
 0x43f   :  { %1749 = vmatprep.subr.bf16.mxu0 %v5612_v5  ;;  %1790 = vmatprep.subr.bf16.mxu1 %v5613_v9 }
 0x442   :  { %1750 = vmatpush2.bf16.msra.mxu0 %v5614_v57  ;;  %1791 = vmatpush2.bf16.msra.mxu1 %v5615_v48 }
 0x443   :  { %1751 = vmatprep.subr.bf16.mxu0 %v5616_v10  ;;  %1792 = vmatprep.subr.bf16.mxu1 %v5617_v3  ;;  %v2766_v3 = vld [vmem:[%s4932_s0 + $0x60] sm:$0xff] }
 0x444   :  { %v1483_v14 = vunpack.c.h.bf16 %v2766_v3 }
 0x446   :  { %1752 = vmatpush2.bf16.msra.mxu0 %v5618_v50  ;;  %1793 = vmatpush2.bf16.msra.mxu1 %v5619_v34  ;;  %v2767_v34 = vld [vmem:[%s4932_s0 + $0x68] sm:$0xff]  ;;  %v1482_v50 = vunpack.c.l.bf16 %v2766_v3 }
 0x447   :  { %1803 = vmatprep.subr.bf16.mxu0 %v5620_v24  ;;  %1844 = vmatprep.subr.bf16.mxu1 %v5621_v47  ;;  %v1484_v24 = vunpack.c.l.bf16 %v2767_v34  ;;  %v1485_v10 = vunpack.c.h.bf16 %v2767_v34  ;;  %v2768_v34 = vld [vmem:[%s4932_s0 + $0x70] sm:$0xff] }
 0x489   :  { %v1526_v27 = vpop.f32.mrf.mxu0  ;;  %v1567_v5 = vpop.f32.mrf.mxu1 }
 0x48a   :  { %v1656_v47 = vadd.f32 %v1526_v27, %v1482_v50  ;;  %v1658_v1 = vadd.f32 %v1567_v5, %v1484_v24 }
 0x48b   :  { %v1528_v25 = vpop.f32.mrf.mxu0  ;;  %v1569_v9 = vpop.f32.mrf.mxu1 }
 0x48c   :  { %v1659_v6 = vadd.f32 %v1569_v9, %v1485_v10  ;;  %v1664_v31 = vsub.f32 0.0, %v1656_v47  ;;  %v1486_v47 = vunpack.c.l.bf16 %v2768_v34 }
 0x48d   :  { %v1530_v56 = vpop.f32.mrf.mxu0  ;;  %v1571_v57 = vpop.f32.mrf.mxu1 }
 0x48e   :  { %v1657_v56 = vadd.f32 %v1528_v25, %v1483_v14  ;;  %v1666_v57 = vsub.f32 0.0, %v1658_v1  ;;  %v2769_v1 = vld [vmem:[%s4932_s0 + $0x78] sm:$0xff] }
 0x48f   :  { %v1531_v2 = vpop.f32.mrf.mxu0  ;;  %v1572_v48 = vpop.f32.mrf.mxu1  ;;  %v1488_v25 = vunpack.c.l.bf16 %v2769_v1 }
 0x490   :  { %v1667_v2 = vsub.f32 0.0, %v1659_v6  ;;  %v1670_v48 = vmul.f32 1.442695, %v1664_v31  ;;  %v1665_v41 = vsub.f32 0.0, %v1657_v56  ;;  %v1674_v58 = vmul.f32 1.442695, %v1666_v57 }
 0x492   :  { %v1676_v39 = vmul.f32 1.442695, %v1667_v2  ;;  %2883 = vpow2.f32 %v1670_v48  ;;  %v1672_v59 = vmul.f32 1.442695, %v1665_v41 }
 0x493   :  { %2885 = vpow2.f32 %v1674_v58  ;;  %v1487_v58 = vunpack.c.h.bf16 %v2768_v34 }
 0x494   :  { %2887 = vpow2.f32 %v1676_v39  ;;  %v1489_v39 = vunpack.c.h.bf16 %v2769_v1 }
 0x495   :  { %2889 = vpow2.f32 %v1672_v59 }
 0x49f   :  { %v2884_v43 = vpop.eup %2883 }
 0x4a0   :  { %v2886_v21 = vpop.eup %2885  ;;  %v1682_v31 = vadd.f32 1.0, %v2884_v43 }
 0x4a1   :  { %v2888_v6 = vpop.eup %2887  ;;  %v1684_v24 = vadd.f32 1.0, %v2886_v21 }
 0x4a2   :  { %v2890_v14 = vpop.eup %2889  ;;  %v1685_v41 = vadd.f32 1.0, %v2888_v6  ;;  %2891 = vrcp.f32 %v1682_v31 }
 0x4a3   :  { %v1683_v59 = vadd.f32 1.0, %v2890_v14  ;;  %2893 = vrcp.f32 %v1684_v24 }
 0x4a4   :  { %2895 = vrcp.f32 %v1685_v41 }
 0x4af   :  { %v2892_v14 = vpop.eup %2891 }
 0x4b0   :  { %v2894_v24 = vpop.eup %2893 }
 0x4c9   :  { %v1608_v27 = vpop.f32.mrf.mxu0  ;;  %v1649_v9 = vpop.f32.mrf.mxu1 }
 0x4ca   :  { %v1660_v10 = vadd.f32 %v1608_v27, %v1486_v47  ;;  %v1662_v3 = vadd.f32 %v1649_v9, %v1488_v25  ;;  %v2896_v47 = vpop.eup %2895  ;;  %v1696_v27 = vmul.f32 %v2894_v24, %v4220_v26  ;;  %v5625_v24 = vld [vmem:[#allocation110_spill] sm:$0xff] }
 0x4cb   :  { %v1610_v50 = vpop.f32.mrf.mxu0  ;;  %v1651_v5 = vpop.f32.mrf.mxu1  ;;  %v1697_v9 = vmul.f32 %v2896_v47, %v4223_v37  ;;  %v5626_v47 = vld [vmem:[#allocation111_spill] sm:$0xff] }
 0x4cc   :  { %v1668_v56 = vsub.f32 0.0, %v1660_v10  ;;  %2897 = vtanh.f32 %v1662_v3  ;;  %v1661_v43 = vadd.f32 %v1610_v50, %v1487_v58  ;;  %v1663_v57 = vadd.f32 %v1651_v5, %v1489_v39 }
 0x4cd   :  { %2899 = vrcp.f32 %v1683_v59  ;;  %v1612_v21 = vpop.f32.mrf.mxu0  ;;  %v1653_v2 = vpop.f32.mrf.mxu1 }
 0x4ce   :  { %v1678_v48 = vmul.f32 1.442695, %v1668_v56  ;;  %v1669_v34 = vsub.f32 0.0, %v1661_v43  ;;  %2901 = vtanh.f32 %v1663_v57 }
 0x4cf   :  { %v1613_v1 = vpop.f32.mrf.mxu0  ;;  %v1654_v6 = vpop.f32.mrf.mxu1 }
 0x4d0   :  { %2903 = vpow2.f32 %v1678_v48  ;;  %v1680_v31 = vmul.f32 1.442695, %v1669_v34  ;;  %v5622_v6 = vld [vmem:[#allocation107_spill] sm:$0xff] }
 0x4d2   :  { %2905 = vpow2.f32 %v1680_v31  ;;  %v5623_v31 = vld [vmem:[#allocation108_spill] sm:$0xff] }
 0x4d9   :  { %v2898_v25 = vpop.eup %2897 }
 0x4da   :  { %v2900_v41 = vpop.eup %2899  ;;  %v1698_v58 = vmul.f32 %v2898_v25, %v2892_v14  ;;  %v5624_v14 = vld [vmem:[#allocation109_spill] sm:$0xff]  ;;  %v5627_v25 = vld [vmem:[#allocation112_spill] sm:$0xff] }
 0x4db   :  { %v2902_v39 = vpop.eup %2901 }
 0x4dc   :  { %v4374_v59 = vadd.f32 %v1698_v58, %v1696_v27  ;;  %v1699_v10 = vmul.f32 %v2902_v39, %v2900_v41  ;;  %v5628_v41 = vld [vmem:[#allocation113_spill] sm:$0xff]  ;;  %v5629_v27 = vld [vmem:[#allocation114_spill] sm:$0xff]  ;;  %v5630_v58 = vld [vmem:[#allocation115_spill] sm:$0xff] }
 0x4dd   :  { %v2904_v3 = vpop.eup %2903  ;;  %v5631_v39 = vld [vmem:[#allocation116_spill] sm:$0xff] }
 0x4de   :  { %v1686_v50 = vadd.f32 1.0, %v2904_v3  ;;  %v4377_v5 = vadd.f32 %v1699_v10, %v1697_v9  ;;  %2907 = vtanh.f32 %v4374_v59  ;;  %v5632_v9 = vld [vmem:[#allocation117_spill] sm:$0xff]  ;;  %v5633_v10 = vld [vmem:[#allocation118_spill] sm:$0xff]  ;;  %v5634_v3 = vld [vmem:[#allocation119_spill] sm:$0xff] }
 0x4df   :  { %v2906_v56 = vpop.eup %2905 }
 0x4e0   :  { %2909 = vrcp.f32 %v1686_v50  ;;  %v1687_v43 = vadd.f32 1.0, %v2906_v56  ;;  %v5635_v50 = vld [vmem:[#allocation120_spill] sm:$0xff]  ;;  %v5636_v56 = vld [vmem:[#allocation121_spill] sm:$0xff] }
 0x4e1   :  { %2911 = vtanh.f32 %v4377_v5 }
 0x4e2   :  { %2913 = vrcp.f32 %v1687_v43  ;;  %v5637_v43 = vld [vmem:[#allocation122_spill] sm:$0xff] }
 0x4eb   :  { %v2908_v26 = vpop.eup %2907 }
 0x4ed   :  { %v2910_v57 = vpop.eup %2909 }
 0x4ee   :  { %v2912_v21 = vpop.eup %2911  ;;  %v1704_v48 = vmul.f32 %v2910_v57, %v2908_v26  ;;  %v5638_v26 = vld [vmem:[#allocation123_spill] sm:$0xff]  ;;  %v5639_v57 = vld [vmem:[#allocation124_spill] sm:$0xff] }
 0x4ef   :  { %v2914_v2 = vpop.eup %2913 }
 0x4f0   :  { %v1705_v34 = vmul.f32 %v2914_v2, %v2912_v21  ;;  %v4381_v1 = vpack.c.bf16 %v1704_v48, %v1704_v48  ;;  %v5640_v21 = vld [vmem:[#allocation125_spill] sm:$0xff]  ;;  %v5641_v2 = vld [vmem:[#allocation126_spill] sm:$0xff]  ;;  %v5642_v48 = vld [vmem:[#allocation127_spill] sm:$0xff] }
 0x4f2   :  { %v1720_v37 = vpack.c.bf16 %v1705_v34, %v1705_v34  ;;  %v5643_v34 = vld [vmem:[#allocation128_spill] sm:$0xff] }
 0x4f4   :  { %1753 = vmatprep.mubr.bf16.mxu0 %v1720_v37  ;;  %1794 = vmatprep.mubr.bf16.mxu1 %v1720_v37 }
 0x4f5   :  { %1754 = vmatmul.mubr.bf16.vlgmr.msra.gmra.mxu0 %v4381_v1  ;;  %1795 = vmatmul.mubr.bf16.vlgmr.msra.gmra.mxu1 %v4381_v1 }
 0x4f6   :  { %1804 = vmatpush1.bf16.msra.mxu0 %v5355_v55  ;;  %1845 = vmatpush1.bf16.msra.mxu1 %v5356_v49 }
 0x4f7   :  { %1835 = vmatprep.mubr.bf16.mxu0 %v1720_v37  ;;  %1876 = vmatprep.mubr.bf16.mxu1 %v1720_v37  ;;  %v5644_v37 = vld [vmem:[#allocation129_spill] sm:$0xff] }
 0x4f8   :  { %1805 = vmatprep.subr.bf16.mxu0 %v5357_v23  ;;  %1846 = vmatprep.subr.bf16.mxu1 %v5358_v11 }
 0x4fa   :  { %1806 = vmatpush1.bf16.msra.mxu0 %v5359_v18  ;;  %1847 = vmatpush1.bf16.msra.mxu1 %v5360_v17 }
 0x4fb   :  { %1807 = vmatprep.subr.bf16.mxu0 %v5361_v32  ;;  %1848 = vmatprep.subr.bf16.mxu1 %v5362_v7 }
 0x4fe   :  { %1808 = vmatpush1.bf16.msra.mxu0 %v5363_v33  ;;  %1849 = vmatpush1.bf16.msra.mxu1 %v5442_v36 }
 0x4ff   :  { %1809 = vmatprep.subr.bf16.mxu0 %v5443_v35  ;;  %1850 = vmatprep.subr.bf16.mxu1 %v5444_v38 }
 0x502   :  { %1810 = vmatpush1.bf16.msra.mxu0 %v5445_v45  ;;  %1851 = vmatpush1.bf16.msra.mxu1 %v5446_v46 }
 0x503   :  { %1811 = vmatprep.subr.bf16.mxu0 %v5447_v52  ;;  %1852 = vmatprep.subr.bf16.mxu1 %v5448_v30 }
 0x506   :  { %1812 = vmatpush1.bf16.msra.mxu0 %v5449_v53  ;;  %1853 = vmatpush1.bf16.msra.mxu1 %v5450_v29 }
 0x507   :  { %1813 = vmatprep.subr.bf16.mxu0 %v5451_v28  ;;  %1854 = vmatprep.subr.bf16.mxu1 %v5452_v60 }
 0x50a   :  { %1814 = vmatpush1.bf16.msra.mxu0 %v5453_v61  ;;  %1855 = vmatpush1.bf16.msra.mxu1 %v5532_v8 }
 0x50b   :  { %1815 = vmatprep.subr.bf16.mxu0 %v5533_v15  ;;  %1856 = vmatprep.subr.bf16.mxu1 %v5534_v19 }
 0x50e   :  { %1816 = vmatpush1.bf16.msra.mxu0 %v5535_v20  ;;  %1857 = vmatpush1.bf16.msra.mxu1 %v5536_v13 }
 0x50f   :  { %1817 = vmatprep.subr.bf16.mxu0 %v5537_v16  ;;  %1858 = vmatprep.subr.bf16.mxu1 %v5538_v42 }
 0x512   :  { %1818 = vmatpush1.bf16.msra.mxu0 %v5539_v63  ;;  %1859 = vmatpush1.bf16.msra.mxu1 %v5540_v0 }
 0x513   :  { %1819 = vmatprep.subr.bf16.mxu0 %v5463_v51  ;;  %1860 = vmatprep.subr.bf16.mxu1 %v5464_v40 }
 0x516   :  { %1820 = vmatpush2.bf16.msra.mxu0 %v5465_v62  ;;  %1861 = vmatpush2.bf16.msra.mxu1 %v5466_v4 }
 0x517   :  { %1821 = vmatprep.subr.bf16.mxu0 %v5467_v44  ;;  %1862 = vmatprep.subr.bf16.mxu1 %v5468_v22 }
 0x51a   :  { %1822 = vmatpush2.bf16.msra.mxu0 %v5469_v12  ;;  %1863 = vmatpush2.bf16.msra.mxu1 %v5470_v54 }
 0x51b   :  { %1823 = vmatprep.subr.bf16.mxu0 %v5622_v6  ;;  %1864 = vmatprep.subr.bf16.mxu1 %v5623_v31 }
 0x51e   :  { %1824 = vmatpush2.bf16.msra.mxu0 %v5624_v14  ;;  %1865 = vmatpush2.bf16.msra.mxu1 %v5625_v24 }
 0x51f   :  { %1825 = vmatprep.subr.bf16.mxu0 %v5626_v47  ;;  %1866 = vmatprep.subr.bf16.mxu1 %v5627_v25 }
 0x522   :  { %1826 = vmatpush2.bf16.msra.mxu0 %v5628_v41  ;;  %1867 = vmatpush2.bf16.msra.mxu1 %v5629_v27 }
 0x523   :  { %1827 = vmatprep.subr.bf16.mxu0 %v5630_v58  ;;  %1868 = vmatprep.subr.bf16.mxu1 %v5631_v39 }
 0x526   :  { %1828 = vmatpush2.bf16.msra.mxu0 %v5632_v9  ;;  %1869 = vmatpush2.bf16.msra.mxu1 %v5633_v10 }
 0x527   :  { %1829 = vmatprep.subr.bf16.mxu0 %v5634_v3  ;;  %1870 = vmatprep.subr.bf16.mxu1 %v5635_v50  ;;  %v5645_v3 = vld [vmem:[#allocation130_spill] sm:$0xff]  ;;  %v5646_v50 = vld [vmem:[#allocation3_spill] sm:$0xff] }
 0x52a   :  { %1830 = vmatpush2.bf16.msra.mxu0 %v5636_v56  ;;  %1871 = vmatpush2.bf16.msra.mxu1 %v5637_v43  ;;  %v5647_v56 = vld [vmem:[#allocation5_spill] sm:$0xff] }
 0x52b   :  { %1831 = vmatprep.subr.bf16.mxu0 %v5638_v26  ;;  %1872 = vmatprep.subr.bf16.mxu1 %v5639_v57  ;;  %v5648_v57 = vld [vmem:[#allocation4_spill] sm:$0xff]  ;;  %v5657_v26 = vld [vmem:[#allocation14_spill] sm:$0xff] }
 0x52e   :  { %1832 = vmatpush2.bf16.msra.mxu0 %v5640_v21  ;;  %1873 = vmatpush2.bf16.msra.mxu1 %v5641_v2  ;;  %v5649_v21 = vld [vmem:[#allocation6_spill] sm:$0xff]  ;;  %v5650_v2 = vld [vmem:[#allocation7_spill] sm:$0xff] }
 0x52f   :  { %1833 = vmatprep.subr.bf16.mxu0 %v5642_v48  ;;  %1874 = vmatprep.subr.bf16.mxu1 %v5643_v34  ;;  %v5651_v48 = vld [vmem:[#allocation8_spill] sm:$0xff]  ;;  %v5652_v34 = vld [vmem:[#allocation9_spill] sm:$0xff] }
 0x532   :  { %1834 = vmatpush2.bf16.msra.mxu0 %v5644_v37  ;;  %1875 = vmatpush2.bf16.msra.mxu1 %v5645_v3  ;;  %v5653_v37 = vld [vmem:[#allocation10_spill] sm:$0xff]  ;;  %v5654_v3 = vld [vmem:[#allocation11_spill] sm:$0xff] }
 0x533   :  { %1950 = vmatprep.subr.bf16.mxu0 %v5646_v50  ;;  %1991 = vmatprep.subr.bf16.mxu1 %v5647_v56  ;;  %v5655_v50 = vld [vmem:[#allocation12_spill] sm:$0xff]  ;;  %v5656_v56 = vld [vmem:[#allocation13_spill] sm:$0xff] }
 0x535   :  { %1836 = vmatmul.mubr.bf16.vlgmr.msra.gmra.mxu0 %v4381_v1  ;;  %1877 = vmatmul.mubr.bf16.vlgmr.msra.gmra.mxu1 %v4381_v1  ;;  %v5658_v1 = vld [vmem:[#allocation15_spill] sm:$0xff] }
 0x536   :  { %1951 = vmatpush1.bf16.msra.mxu0 %v5648_v57  ;;  %1992 = vmatpush1.bf16.msra.mxu1 %v5649_v21  ;;  %v5659_v57 = vld [vmem:[#allocation16_spill] sm:$0xff]  ;;  %v5660_v21 = vld [vmem:[#allocation17_spill] sm:$0xff] }
 0x537   :  { %1952 = vmatprep.subr.bf16.mxu0 %v5650_v2  ;;  %1993 = vmatprep.subr.bf16.mxu1 %v5651_v48  ;;  %v5661_v2 = vld [vmem:[#allocation18_spill] sm:$0xff]  ;;  %v5662_v48 = vld [vmem:[#allocation19_spill] sm:$0xff] }
 0x53a   :  { %1953 = vmatpush1.bf16.msra.mxu0 %v5652_v34  ;;  %1994 = vmatpush1.bf16.msra.mxu1 %v5653_v37  ;;  %v5663_v34 = vld [vmem:[#allocation20_spill] sm:$0xff]  ;;  %v5664_v37 = vld [vmem:[#allocation21_spill] sm:$0xff] }
 0x53b   :  { %1954 = vmatprep.subr.bf16.mxu0 %v5654_v3  ;;  %1995 = vmatprep.subr.bf16.mxu1 %v5655_v50  ;;  %v5665_v3 = vld [vmem:[#allocation22_spill] sm:$0xff]  ;;  %v5666_v50 = vld [vmem:[#allocation23_spill] sm:$0xff] }
 0x53e   :  { %1955 = vmatpush1.bf16.msra.mxu0 %v5656_v56  ;;  %1996 = vmatpush1.bf16.msra.mxu1 %v5657_v26  ;;  %v5667_v56 = vld [vmem:[#allocation24_spill] sm:$0xff]  ;;  %v5668_v26 = vld [vmem:[#allocation25_spill] sm:$0xff] }
 0x53f   :  { %1956 = vmatprep.subr.bf16.mxu0 %v5658_v1  ;;  %1997 = vmatprep.subr.bf16.mxu1 %v5659_v57  ;;  %v5669_v1 = vld [vmem:[#allocation26_spill] sm:$0xff]  ;;  %v5670_v57 = vld [vmem:[#allocation27_spill] sm:$0xff] }
 0x542   :  { %1957 = vmatpush1.bf16.msra.mxu0 %v5660_v21  ;;  %1998 = vmatpush1.bf16.msra.mxu1 %v5661_v2  ;;  %v5671_v21 = vld [vmem:[#allocation28_spill] sm:$0xff]  ;;  %v5672_v2 = vld [vmem:[#allocation29_spill] sm:$0xff] }
 0x543   :  { %1958 = vmatprep.subr.bf16.mxu0 %v5662_v48  ;;  %1999 = vmatprep.subr.bf16.mxu1 %v5663_v34  ;;  %v5673_v48 = vld [vmem:[#allocation30_spill] sm:$0xff]  ;;  %v5674_v34 = vld [vmem:[#allocation31_spill] sm:$0xff] }
 0x546   :  { %1959 = vmatpush1.bf16.msra.mxu0 %v5664_v37  ;;  %2000 = vmatpush1.bf16.msra.mxu1 %v5665_v3  ;;  %v5675_v37 = vld [vmem:[#allocation32_spill] sm:$0xff]  ;;  %v5676_v3 = vld [vmem:[#allocation33_spill] sm:$0xff] }
 0x547   :  { %1960 = vmatprep.subr.bf16.mxu0 %v5666_v50  ;;  %2001 = vmatprep.subr.bf16.mxu1 %v5667_v56  ;;  %v5677_v50 = vld [vmem:[#allocation34_spill] sm:$0xff]  ;;  %v5678_v56 = vld [vmem:[#allocation35_spill] sm:$0xff] }
 0x54a   :  { %1961 = vmatpush1.bf16.msra.mxu0 %v5668_v26  ;;  %2002 = vmatpush1.bf16.msra.mxu1 %v5669_v1  ;;  %v5679_v26 = vld [vmem:[#allocation36_spill] sm:$0xff]  ;;  %v5680_v1 = vld [vmem:[#allocation37_spill] sm:$0xff] }
 0x54b   :  { %1962 = vmatprep.subr.bf16.mxu0 %v5670_v57  ;;  %2003 = vmatprep.subr.bf16.mxu1 %v5671_v21  ;;  %v5681_v57 = vld [vmem:[#allocation38_spill] sm:$0xff]  ;;  %v5682_v21 = vld [vmem:[#allocation39_spill] sm:$0xff] }
 0x54e   :  { %1963 = vmatpush1.bf16.msra.mxu0 %v5672_v2  ;;  %2004 = vmatpush1.bf16.msra.mxu1 %v5673_v48  ;;  %v5683_v2 = vld [vmem:[#allocation40_spill] sm:$0xff]  ;;  %v5684_v48 = vld [vmem:[#allocation41_spill] sm:$0xff] }
 0x54f   :  { %1964 = vmatprep.subr.bf16.mxu0 %v5674_v34  ;;  %2005 = vmatprep.subr.bf16.mxu1 %v5675_v37  ;;  %v5685_v34 = vld [vmem:[#allocation42_spill] sm:$0xff]  ;;  %v5686_v37 = vld [vmem:[#allocation43_spill] sm:$0xff] }
 0x552   :  { %1965 = vmatpush1.bf16.msra.mxu0 %v5676_v3  ;;  %2006 = vmatpush1.bf16.msra.mxu1 %v5677_v50  ;;  %v5687_v3 = vld [vmem:[#allocation44_spill] sm:$0xff]  ;;  %v5688_v50 = vld [vmem:[#allocation45_spill] sm:$0xff] }
 0x553   :  { %1966 = vmatprep.subr.bf16.mxu0 %v5678_v56  ;;  %2007 = vmatprep.subr.bf16.mxu1 %v5679_v26  ;;  %v5689_v56 = vld [vmem:[#allocation46_spill] sm:$0xff]  ;;  %v5690_v26 = vld [vmem:[#allocation47_spill] sm:$0xff] }
 0x556   :  { %1967 = vmatpush2.bf16.msra.mxu0 %v5680_v1  ;;  %2008 = vmatpush2.bf16.msra.mxu1 %v5681_v57  ;;  %v5691_v1 = vld [vmem:[#allocation48_spill] sm:$0xff]  ;;  %v5692_v57 = vld [vmem:[#allocation49_spill] sm:$0xff] }
 0x557   :  { %1968 = vmatprep.subr.bf16.mxu0 %v5682_v21  ;;  %2009 = vmatprep.subr.bf16.mxu1 %v5683_v2  ;;  %v5693_v21 = vld [vmem:[#allocation50_spill] sm:$0xff]  ;;  %v5694_v2 = vld [vmem:[#allocation51_spill] sm:$0xff] }
 0x55a   :  { %1969 = vmatpush2.bf16.msra.mxu0 %v5684_v48  ;;  %2010 = vmatpush2.bf16.msra.mxu1 %v5685_v34  ;;  %v5695_v48 = vld [vmem:[#allocation52_spill] sm:$0xff]  ;;  %v5696_v34 = vld [vmem:[#allocation53_spill] sm:$0xff] }
 0x55b   :  { %1970 = vmatprep.subr.bf16.mxu0 %v5686_v37  ;;  %2011 = vmatprep.subr.bf16.mxu1 %v5687_v3  ;;  %v5697_v37 = vld [vmem:[#allocation54_spill] sm:$0xff]  ;;  %v5698_v3 = vld [vmem:[#allocation55_spill] sm:$0xff] }
 0x55e   :  { %1971 = vmatpush2.bf16.msra.mxu0 %v5688_v50  ;;  %2012 = vmatpush2.bf16.msra.mxu1 %v5689_v56  ;;  %v5699_v50 = vld [vmem:[#allocation56_spill] sm:$0xff]  ;;  %v5700_v56 = vld [vmem:[#allocation57_spill] sm:$0xff] }
 0x55f   :  { %1972 = vmatprep.subr.bf16.mxu0 %v5690_v26  ;;  %2013 = vmatprep.subr.bf16.mxu1 %v5691_v1  ;;  %v5701_v26 = vld [vmem:[#allocation58_spill] sm:$0xff]  ;;  %v5702_v1 = vld [vmem:[#allocation59_spill] sm:$0xff] }
 0x562   :  { %1973 = vmatpush2.bf16.msra.mxu0 %v5692_v57  ;;  %2014 = vmatpush2.bf16.msra.mxu1 %v5693_v21  ;;  %v5703_v57 = vld [vmem:[#allocation60_spill] sm:$0xff]  ;;  %v5704_v21 = vld [vmem:[#allocation61_spill] sm:$0xff] }
 0x563   :  { %1974 = vmatprep.subr.bf16.mxu0 %v5694_v2  ;;  %2015 = vmatprep.subr.bf16.mxu1 %v5695_v48  ;;  %v5705_v2 = vld [vmem:[#allocation62_spill] sm:$0xff]  ;;  %v5706_v48 = vld [vmem:[#allocation63_spill] sm:$0xff] }
 0x566   :  { %1975 = vmatpush2.bf16.msra.mxu0 %v5696_v34  ;;  %2016 = vmatpush2.bf16.msra.mxu1 %v5697_v37  ;;  %v5707_v34 = vld [vmem:[#allocation64_spill] sm:$0xff]  ;;  %v5708_v37 = vld [vmem:[#allocation65_spill] sm:$0xff] }
 0x567   :  { %1976 = vmatprep.subr.bf16.mxu0 %v5698_v3  ;;  %2017 = vmatprep.subr.bf16.mxu1 %v5699_v50  ;;  %v5709_v3 = vld [vmem:[#allocation66_spill] sm:$0xff]  ;;  %v5710_v50 = vld [vmem:[#allocation67_spill] sm:$0xff] }
 0x56a   :  { %1977 = vmatpush2.bf16.msra.mxu0 %v5700_v56  ;;  %2018 = vmatpush2.bf16.msra.mxu1 %v5701_v26  ;;  %v5711_v56 = vld [vmem:[#allocation68_spill] sm:$0xff] }
 0x56b   :  { %1978 = vmatprep.subr.bf16.mxu0 %v5702_v1  ;;  %2019 = vmatprep.subr.bf16.mxu1 %v5703_v57 }
 0x56e   :  { %1979 = vmatpush2.bf16.msra.mxu0 %v5704_v21  ;;  %2020 = vmatpush2.bf16.msra.mxu1 %v5705_v2 }
 0x56f   :  { %1980 = vmatprep.subr.bf16.mxu0 %v5706_v48  ;;  %2021 = vmatprep.subr.bf16.mxu1 %v5707_v34  ;;  %v2770_v34 = vld [vmem:[%s4932_s0 + $0x80] sm:$0xff] }
 0x570   :  { %v1712_v39 = vunpack.c.h.bf16 %v2770_v34 }
 0x572   :  { %1981 = vmatpush2.bf16.msra.mxu0 %v5708_v37  ;;  %2022 = vmatpush2.bf16.msra.mxu1 %v5709_v3  ;;  %v2771_v3 = vld [vmem:[%s4932_s0 + $0x88] sm:$0xff]  ;;  %v1711_v37 = vunpack.c.l.bf16 %v2770_v34 }
 0x573   :  { %2032 = vmatprep.subr.bf16.mxu0 %v5710_v50  ;;  %2073 = vmatprep.subr.bf16.mxu1 %v5711_v56  ;;  %v1713_v50 = vunpack.c.l.bf16 %v2771_v3  ;;  %v1714_v48 = vunpack.c.h.bf16 %v2771_v3  ;;  %v2772_v3 = vld [vmem:[%s4932_s0 + $0x90] sm:$0xff] }
 0x5b5   :  { %v1755_v26 = vpop.f32.mrf.mxu0  ;;  %v1796_v1 = vpop.f32.mrf.mxu1 }
 0x5b6   :  { %v1885_v56 = vadd.f32 %v1755_v26, %v1711_v37  ;;  %v1887_v58 = vadd.f32 %v1796_v1, %v1713_v50 }
 0x5b7   :  { %v1757_v43 = vpop.f32.mrf.mxu0  ;;  %v1798_v57 = vpop.f32.mrf.mxu1 }
 0x5b8   :  { %v1888_v27 = vadd.f32 %v1798_v57, %v1714_v48  ;;  %v1893_v41 = vsub.f32 0.0, %v1885_v56  ;;  %v1715_v56 = vunpack.c.l.bf16 %v2772_v3 }
 0x5b9   :  { %v1759_v10 = vpop.f32.mrf.mxu0  ;;  %v1800_v21 = vpop.f32.mrf.mxu1 }
 0x5ba   :  { %v1886_v10 = vadd.f32 %v1757_v43, %v1712_v39  ;;  %v1895_v21 = vsub.f32 0.0, %v1887_v58  ;;  %v2773_v58 = vld [vmem:[%s4932_s0 + $0x98] sm:$0xff] }
 0x5bb   :  { %v1760_v9 = vpop.f32.mrf.mxu0  ;;  %v1801_v2 = vpop.f32.mrf.mxu1  ;;  %v1717_v43 = vunpack.c.l.bf16 %v2773_v58 }
 0x5bc   :  { %v1896_v9 = vsub.f32 0.0, %v1888_v27  ;;  %v1899_v2 = vmul.f32 1.442695, %v1893_v41  ;;  %v1894_v25 = vsub.f32 0.0, %v1886_v10  ;;  %v1903_v47 = vmul.f32 1.442695, %v1895_v21 }
 0x5be   :  { %v1905_v24 = vmul.f32 1.442695, %v1896_v9  ;;  %2915 = vpow2.f32 %v1899_v2  ;;  %v1901_v14 = vmul.f32 1.442695, %v1894_v25 }
 0x5bf   :  { %2917 = vpow2.f32 %v1903_v47  ;;  %v1716_v47 = vunpack.c.h.bf16 %v2772_v3 }
 0x5c0   :  { %2919 = vpow2.f32 %v1905_v24  ;;  %v1718_v24 = vunpack.c.h.bf16 %v2773_v58 }
 0x5c1   :  { %2921 = vpow2.f32 %v1901_v14 }
 0x5cb   :  { %v2916_v31 = vpop.eup %2915 }
 0x5cc   :  { %v2918_v6 = vpop.eup %2917  ;;  %v1911_v41 = vadd.f32 1.0, %v2916_v31 }
 0x5cd   :  { %v2920_v27 = vpop.eup %2919  ;;  %v1913_v50 = vadd.f32 1.0, %v2918_v6 }
 0x5ce   :  { %v2922_v39 = vpop.eup %2921  ;;  %v1914_v25 = vadd.f32 1.0, %v2920_v27  ;;  %2923 = vrcp.f32 %v1911_v41 }
 0x5cf   :  { %v1912_v14 = vadd.f32 1.0, %v2922_v39  ;;  %2925 = vrcp.f32 %v1913_v50 }
 0x5d0   :  { %2927 = vrcp.f32 %v1914_v25 }
 0x5db   :  { %v2924_v39 = vpop.eup %2923 }
 0x5dc   :  { %v2926_v50 = vpop.eup %2925 }
 0x5f5   :  { %v1837_v26 = vpop.f32.mrf.mxu0  ;;  %v1878_v57 = vpop.f32.mrf.mxu1 }
 0x5f6   :  { %v1889_v48 = vadd.f32 %v1837_v26, %v1715_v56  ;;  %v1891_v34 = vadd.f32 %v1878_v57, %v1717_v43  ;;  %v2928_v56 = vpop.eup %2927  ;;  %v1925_v26 = vmul.f32 %v2926_v50, %v4374_v59  ;;  %v5715_v50 = vld [vmem:[#allocation110_spill] sm:$0xff] }
 0x5f7   :  { %v1839_v37 = vpop.f32.mrf.mxu0  ;;  %v1880_v1 = vpop.f32.mrf.mxu1  ;;  %v1926_v57 = vmul.f32 %v2928_v56, %v4377_v5  ;;  %v5716_v56 = vld [vmem:[#allocation111_spill] sm:$0xff] }
 0x5f8   :  { %v1897_v10 = vsub.f32 0.0, %v1889_v48  ;;  %2929 = vtanh.f32 %v1891_v34  ;;  %v1890_v31 = vadd.f32 %v1839_v37, %v1716_v47  ;;  %v1892_v21 = vadd.f32 %v1880_v1, %v1718_v24 }
 0x5f9   :  { %2931 = vrcp.f32 %v1912_v14  ;;  %v1841_v6 = vpop.f32.mrf.mxu0  ;;  %v1882_v9 = vpop.f32.mrf.mxu1 }
 0x5fa   :  { %v1907_v2 = vmul.f32 1.442695, %v1897_v10  ;;  %v1898_v3 = vsub.f32 0.0, %v1890_v31  ;;  %2933 = vtanh.f32 %v1892_v21 }
 0x5fb   :  { %v1842_v58 = vpop.f32.mrf.mxu0  ;;  %v1883_v27 = vpop.f32.mrf.mxu1 }
 0x5fc   :  { %2935 = vpow2.f32 %v1907_v2  ;;  %v1909_v41 = vmul.f32 1.442695, %v1898_v3  ;;  %v5712_v27 = vld [vmem:[#allocation107_spill] sm:$0xff] }
 0x5fe   :  { %2937 = vpow2.f32 %v1909_v41  ;;  %v5713_v41 = vld [vmem:[#allocation108_spill] sm:$0xff] }
 0x605   :  { %v2930_v43 = vpop.eup %2929 }
 0x606   :  { %v2932_v25 = vpop.eup %2931  ;;  %v1927_v47 = vmul.f32 %v2930_v43, %v2924_v39  ;;  %v5714_v39 = vld [vmem:[#allocation109_spill] sm:$0xff]  ;;  %v5717_v43 = vld [vmem:[#allocation112_spill] sm:$0xff] }
 0x607   :  { %v2934_v24 = vpop.eup %2933 }
 0x608   :  { %v4528_v14 = vadd.f32 %v1927_v47, %v1925_v26  ;;  %v1928_v48 = vmul.f32 %v2934_v24, %v2932_v25  ;;  %v5718_v25 = vld [vmem:[#allocation113_spill] sm:$0xff]  ;;  %v5719_v26 = vld [vmem:[#allocation114_spill] sm:$0xff]  ;;  %v5720_v47 = vld [vmem:[#allocation115_spill] sm:$0xff] }
 0x609   :  { %v2936_v34 = vpop.eup %2935  ;;  %v5721_v24 = vld [vmem:[#allocation116_spill] sm:$0xff] }
 0x60a   :  { %v1915_v37 = vadd.f32 1.0, %v2936_v34  ;;  %v4531_v1 = vadd.f32 %v1928_v48, %v1926_v57  ;;  %2939 = vtanh.f32 %v4528_v14  ;;  %v5722_v57 = vld [vmem:[#allocation117_spill] sm:$0xff]  ;;  %v5723_v48 = vld [vmem:[#allocation118_spill] sm:$0xff]  ;;  %v5724_v34 = vld [vmem:[#allocation119_spill] sm:$0xff] }
 0x60b   :  { %v2938_v10 = vpop.eup %2937 }
 0x60c   :  { %2941 = vrcp.f32 %v1915_v37  ;;  %v1916_v31 = vadd.f32 1.0, %v2938_v10  ;;  %v5725_v37 = vld [vmem:[#allocation120_spill] sm:$0xff]  ;;  %v5726_v10 = vld [vmem:[#allocation121_spill] sm:$0xff] }
 0x60d   :  { %2943 = vtanh.f32 %v4531_v1 }
 0x60e   :  { %2945 = vrcp.f32 %v1916_v31  ;;  %v5727_v31 = vld [vmem:[#allocation122_spill] sm:$0xff] }
 0x617   :  { %v2940_v59 = vpop.eup %2939 }
 0x619   :  { %v2942_v21 = vpop.eup %2941 }
 0x61a   :  { %v2944_v6 = vpop.eup %2943  ;;  %v1933_v2 = vmul.f32 %v2942_v21, %v2940_v59  ;;  %v5728_v59 = vld [vmem:[#allocation123_spill] sm:$0xff]  ;;  %v5729_v21 = vld [vmem:[#allocation124_spill] sm:$0xff] }
 0x61b   :  { %v2946_v9 = vpop.eup %2945 }
 0x61c   :  { %v1934_v3 = vmul.f32 %v2946_v9, %v2944_v6  ;;  %v4535_v58 = vpack.c.bf16 %v1933_v2, %v1933_v2  ;;  %v5730_v6 = vld [vmem:[#allocation125_spill] sm:$0xff]  ;;  %v5731_v9 = vld [vmem:[#allocation126_spill] sm:$0xff]  ;;  %v5732_v2 = vld [vmem:[#allocation127_spill] sm:$0xff] }
 0x61e   :  { %v1949_v5 = vpack.c.bf16 %v1934_v3, %v1934_v3  ;;  %v5733_v3 = vld [vmem:[#allocation128_spill] sm:$0xff] }
 0x620   :  { %1982 = vmatprep.mubr.bf16.mxu0 %v1949_v5  ;;  %2023 = vmatprep.mubr.bf16.mxu1 %v1949_v5 }
 0x621   :  { %1983 = vmatmul.mubr.bf16.vlgmr.msra.gmra.mxu0 %v4535_v58  ;;  %2024 = vmatmul.mubr.bf16.vlgmr.msra.gmra.mxu1 %v4535_v58 }
 0x622   :  { %2033 = vmatpush1.bf16.msra.mxu0 %v5355_v55  ;;  %2074 = vmatpush1.bf16.msra.mxu1 %v5356_v49 }
 0x623   :  { %2064 = vmatprep.mubr.bf16.mxu0 %v1949_v5  ;;  %2105 = vmatprep.mubr.bf16.mxu1 %v1949_v5  ;;  %v5734_v5 = vld [vmem:[#allocation129_spill] sm:$0xff] }
 0x624   :  { %2034 = vmatprep.subr.bf16.mxu0 %v5357_v23  ;;  %2075 = vmatprep.subr.bf16.mxu1 %v5358_v11 }
 0x626   :  { %2035 = vmatpush1.bf16.msra.mxu0 %v5359_v18  ;;  %2076 = vmatpush1.bf16.msra.mxu1 %v5360_v17 }
 0x627   :  { %2036 = vmatprep.subr.bf16.mxu0 %v5361_v32  ;;  %2077 = vmatprep.subr.bf16.mxu1 %v5362_v7 }
 0x62a   :  { %2037 = vmatpush1.bf16.msra.mxu0 %v5363_v33  ;;  %2078 = vmatpush1.bf16.msra.mxu1 %v5442_v36 }
 0x62b   :  { %2038 = vmatprep.subr.bf16.mxu0 %v5443_v35  ;;  %2079 = vmatprep.subr.bf16.mxu1 %v5444_v38 }
 0x62e   :  { %2039 = vmatpush1.bf16.msra.mxu0 %v5445_v45  ;;  %2080 = vmatpush1.bf16.msra.mxu1 %v5446_v46 }
 0x62f   :  { %2040 = vmatprep.subr.bf16.mxu0 %v5447_v52  ;;  %2081 = vmatprep.subr.bf16.mxu1 %v5448_v30 }
 0x632   :  { %2041 = vmatpush1.bf16.msra.mxu0 %v5449_v53  ;;  %2082 = vmatpush1.bf16.msra.mxu1 %v5450_v29 }
 0x633   :  { %2042 = vmatprep.subr.bf16.mxu0 %v5451_v28  ;;  %2083 = vmatprep.subr.bf16.mxu1 %v5452_v60 }
 0x636   :  { %2043 = vmatpush1.bf16.msra.mxu0 %v5453_v61  ;;  %2084 = vmatpush1.bf16.msra.mxu1 %v5532_v8 }
 0x637   :  { %2044 = vmatprep.subr.bf16.mxu0 %v5533_v15  ;;  %2085 = vmatprep.subr.bf16.mxu1 %v5534_v19 }
 0x63a   :  { %2045 = vmatpush1.bf16.msra.mxu0 %v5535_v20  ;;  %2086 = vmatpush1.bf16.msra.mxu1 %v5536_v13 }
 0x63b   :  { %2046 = vmatprep.subr.bf16.mxu0 %v5537_v16  ;;  %2087 = vmatprep.subr.bf16.mxu1 %v5538_v42 }
 0x63e   :  { %2047 = vmatpush1.bf16.msra.mxu0 %v5539_v63  ;;  %2088 = vmatpush1.bf16.msra.mxu1 %v5540_v0 }
 0x63f   :  { %2048 = vmatprep.subr.bf16.mxu0 %v5463_v51  ;;  %2089 = vmatprep.subr.bf16.mxu1 %v5464_v40 }
 0x642   :  { %2049 = vmatpush2.bf16.msra.mxu0 %v5465_v62  ;;  %2090 = vmatpush2.bf16.msra.mxu1 %v5466_v4 }
 0x643   :  { %2050 = vmatprep.subr.bf16.mxu0 %v5467_v44  ;;  %2091 = vmatprep.subr.bf16.mxu1 %v5468_v22 }
 0x646   :  { %2051 = vmatpush2.bf16.msra.mxu0 %v5469_v12  ;;  %2092 = vmatpush2.bf16.msra.mxu1 %v5470_v54 }
 0x647   :  { %2052 = vmatprep.subr.bf16.mxu0 %v5712_v27  ;;  %2093 = vmatprep.subr.bf16.mxu1 %v5713_v41 }
 0x64a   :  { %2053 = vmatpush2.bf16.msra.mxu0 %v5714_v39  ;;  %2094 = vmatpush2.bf16.msra.mxu1 %v5715_v50 }
 0x64b   :  { %2054 = vmatprep.subr.bf16.mxu0 %v5716_v56  ;;  %2095 = vmatprep.subr.bf16.mxu1 %v5717_v43 }
 0x64e   :  { %2055 = vmatpush2.bf16.msra.mxu0 %v5718_v25  ;;  %2096 = vmatpush2.bf16.msra.mxu1 %v5719_v26 }
 0x64f   :  { %2056 = vmatprep.subr.bf16.mxu0 %v5720_v47  ;;  %2097 = vmatprep.subr.bf16.mxu1 %v5721_v24 }
 0x652   :  { %2057 = vmatpush2.bf16.msra.mxu0 %v5722_v57  ;;  %2098 = vmatpush2.bf16.msra.mxu1 %v5723_v48 }
 0x653   :  { %2058 = vmatprep.subr.bf16.mxu0 %v5724_v34  ;;  %2099 = vmatprep.subr.bf16.mxu1 %v5725_v37  ;;  %v5735_v34 = vld [vmem:[#allocation130_spill] sm:$0xff]  ;;  %v5736_v37 = vld [vmem:[#allocation3_spill] sm:$0xff] }
 0x656   :  { %2059 = vmatpush2.bf16.msra.mxu0 %v5726_v10  ;;  %2100 = vmatpush2.bf16.msra.mxu1 %v5727_v31  ;;  %v5737_v10 = vld [vmem:[#allocation5_spill] sm:$0xff] }
 0x657   :  { %2060 = vmatprep.subr.bf16.mxu0 %v5728_v59  ;;  %2101 = vmatprep.subr.bf16.mxu1 %v5729_v21  ;;  %v5738_v21 = vld [vmem:[#allocation4_spill] sm:$0xff]  ;;  %v5747_v59 = vld [vmem:[#allocation14_spill] sm:$0xff] }
 0x65a   :  { %2061 = vmatpush2.bf16.msra.mxu0 %v5730_v6  ;;  %2102 = vmatpush2.bf16.msra.mxu1 %v5731_v9  ;;  %v5739_v6 = vld [vmem:[#allocation6_spill] sm:$0xff]  ;;  %v5740_v9 = vld [vmem:[#allocation7_spill] sm:$0xff] }
 0x65b   :  { %2062 = vmatprep.subr.bf16.mxu0 %v5732_v2  ;;  %2103 = vmatprep.subr.bf16.mxu1 %v5733_v3  ;;  %v5741_v2 = vld [vmem:[#allocation8_spill] sm:$0xff]  ;;  %v5742_v3 = vld [vmem:[#allocation9_spill] sm:$0xff] }
 0x65e   :  { %2063 = vmatpush2.bf16.msra.mxu0 %v5734_v5  ;;  %2104 = vmatpush2.bf16.msra.mxu1 %v5735_v34  ;;  %v5743_v5 = vld [vmem:[#allocation10_spill] sm:$0xff]  ;;  %v5744_v34 = vld [vmem:[#allocation11_spill] sm:$0xff] }
 0x65f   :  { %2179 = vmatprep.subr.bf16.mxu0 %v5736_v37  ;;  %2220 = vmatprep.subr.bf16.mxu1 %v5737_v10  ;;  %v5745_v37 = vld [vmem:[#allocation12_spill] sm:$0xff]  ;;  %v5746_v10 = vld [vmem:[#allocation13_spill] sm:$0xff] }
 0x661   :  { %2065 = vmatmul.mubr.bf16.vlgmr.msra.gmra.mxu0 %v4535_v58  ;;  %2106 = vmatmul.mubr.bf16.vlgmr.msra.gmra.mxu1 %v4535_v58  ;;  %v5748_v58 = vld [vmem:[#allocation15_spill] sm:$0xff] }
 0x662   :  { %2180 = vmatpush1.bf16.msra.mxu0 %v5738_v21  ;;  %2221 = vmatpush1.bf16.msra.mxu1 %v5739_v6  ;;  %v5749_v21 = vld [vmem:[#allocation16_spill] sm:$0xff]  ;;  %v5750_v6 = vld [vmem:[#allocation17_spill] sm:$0xff] }
 0x663   :  { %2181 = vmatprep.subr.bf16.mxu0 %v5740_v9  ;;  %2222 = vmatprep.subr.bf16.mxu1 %v5741_v2  ;;  %v5751_v9 = vld [vmem:[#allocation18_spill] sm:$0xff]  ;;  %v5752_v2 = vld [vmem:[#allocation19_spill] sm:$0xff] }
 0x666   :  { %2182 = vmatpush1.bf16.msra.mxu0 %v5742_v3  ;;  %2223 = vmatpush1.bf16.msra.mxu1 %v5743_v5  ;;  %v5753_v3 = vld [vmem:[#allocation20_spill] sm:$0xff]  ;;  %v5754_v5 = vld [vmem:[#allocation21_spill] sm:$0xff] }
 0x667   :  { %2183 = vmatprep.subr.bf16.mxu0 %v5744_v34  ;;  %2224 = vmatprep.subr.bf16.mxu1 %v5745_v37  ;;  %v5755_v34 = vld [vmem:[#allocation22_spill] sm:$0xff]  ;;  %v5756_v37 = vld [vmem:[#allocation23_spill] sm:$0xff] }
 0x66a   :  { %2184 = vmatpush1.bf16.msra.mxu0 %v5746_v10  ;;  %2225 = vmatpush1.bf16.msra.mxu1 %v5747_v59  ;;  %v5757_v10 = vld [vmem:[#allocation24_spill] sm:$0xff]  ;;  %v5758_v59 = vld [vmem:[#allocation25_spill] sm:$0xff] }
 0x66b   :  { %2185 = vmatprep.subr.bf16.mxu0 %v5748_v58  ;;  %2226 = vmatprep.subr.bf16.mxu1 %v5749_v21  ;;  %v5759_v58 = vld [vmem:[#allocation26_spill] sm:$0xff]  ;;  %v5760_v21 = vld [vmem:[#allocation27_spill] sm:$0xff] }
 0x66e   :  { %2186 = vmatpush1.bf16.msra.mxu0 %v5750_v6  ;;  %2227 = vmatpush1.bf16.msra.mxu1 %v5751_v9  ;;  %v5761_v6 = vld [vmem:[#allocation28_spill] sm:$0xff]  ;;  %v5762_v9 = vld [vmem:[#allocation29_spill] sm:$0xff] }
 0x66f   :  { %2187 = vmatprep.subr.bf16.mxu0 %v5752_v2  ;;  %2228 = vmatprep.subr.bf16.mxu1 %v5753_v3  ;;  %v5763_v2 = vld [vmem:[#allocation30_spill] sm:$0xff]  ;;  %v5764_v3 = vld [vmem:[#allocation31_spill] sm:$0xff] }
 0x672   :  { %2188 = vmatpush1.bf16.msra.mxu0 %v5754_v5  ;;  %2229 = vmatpush1.bf16.msra.mxu1 %v5755_v34  ;;  %v5765_v5 = vld [vmem:[#allocation32_spill] sm:$0xff]  ;;  %v5766_v34 = vld [vmem:[#allocation33_spill] sm:$0xff] }
 0x673   :  { %2189 = vmatprep.subr.bf16.mxu0 %v5756_v37  ;;  %2230 = vmatprep.subr.bf16.mxu1 %v5757_v10  ;;  %v5767_v37 = vld [vmem:[#allocation34_spill] sm:$0xff]  ;;  %v5768_v10 = vld [vmem:[#allocation35_spill] sm:$0xff] }
 0x676   :  { %2190 = vmatpush1.bf16.msra.mxu0 %v5758_v59  ;;  %2231 = vmatpush1.bf16.msra.mxu1 %v5759_v58  ;;  %v5769_v59 = vld [vmem:[#allocation36_spill] sm:$0xff]  ;;  %v5770_v58 = vld [vmem:[#allocation37_spill] sm:$0xff] }
 0x677   :  { %2191 = vmatprep.subr.bf16.mxu0 %v5760_v21  ;;  %2232 = vmatprep.subr.bf16.mxu1 %v5761_v6  ;;  %v5771_v21 = vld [vmem:[#allocation38_spill] sm:$0xff]  ;;  %v5772_v6 = vld [vmem:[#allocation39_spill] sm:$0xff] }
 0x67a   :  { %2192 = vmatpush1.bf16.msra.mxu0 %v5762_v9  ;;  %2233 = vmatpush1.bf16.msra.mxu1 %v5763_v2  ;;  %v5773_v9 = vld [vmem:[#allocation40_spill] sm:$0xff]  ;;  %v5774_v2 = vld [vmem:[#allocation41_spill] sm:$0xff] }
 0x67b   :  { %2193 = vmatprep.subr.bf16.mxu0 %v5764_v3  ;;  %2234 = vmatprep.subr.bf16.mxu1 %v5765_v5  ;;  %v5775_v3 = vld [vmem:[#allocation42_spill] sm:$0xff]  ;;  %v5776_v5 = vld [vmem:[#allocation43_spill] sm:$0xff] }
 0x67e   :  { %2194 = vmatpush1.bf16.msra.mxu0 %v5766_v34  ;;  %2235 = vmatpush1.bf16.msra.mxu1 %v5767_v37  ;;  %v5777_v34 = vld [vmem:[#allocation44_spill] sm:$0xff]  ;;  %v5778_v37 = vld [vmem:[#allocation45_spill] sm:$0xff] }
 0x67f   :  { %2195 = vmatprep.subr.bf16.mxu0 %v5768_v10  ;;  %2236 = vmatprep.subr.bf16.mxu1 %v5769_v59  ;;  %v5779_v10 = vld [vmem:[#allocation46_spill] sm:$0xff]  ;;  %v5780_v59 = vld [vmem:[#allocation47_spill] sm:$0xff] }
 0x682   :  { %2196 = vmatpush2.bf16.msra.mxu0 %v5770_v58  ;;  %2237 = vmatpush2.bf16.msra.mxu1 %v5771_v21  ;;  %v5781_v58 = vld [vmem:[#allocation48_spill] sm:$0xff]  ;;  %v5782_v21 = vld [vmem:[#allocation49_spill] sm:$0xff] }
 0x683   :  { %2197 = vmatprep.subr.bf16.mxu0 %v5772_v6  ;;  %2238 = vmatprep.subr.bf16.mxu1 %v5773_v9  ;;  %v5783_v6 = vld [vmem:[#allocation50_spill] sm:$0xff]  ;;  %v5784_v9 = vld [vmem:[#allocation51_spill] sm:$0xff] }
 0x686   :  { %2198 = vmatpush2.bf16.msra.mxu0 %v5774_v2  ;;  %2239 = vmatpush2.bf16.msra.mxu1 %v5775_v3  ;;  %v5785_v2 = vld [vmem:[#allocation52_spill] sm:$0xff]  ;;  %v5786_v3 = vld [vmem:[#allocation53_spill] sm:$0xff] }
 0x687   :  { %2199 = vmatprep.subr.bf16.mxu0 %v5776_v5  ;;  %2240 = vmatprep.subr.bf16.mxu1 %v5777_v34  ;;  %v5787_v5 = vld [vmem:[#allocation54_spill] sm:$0xff]  ;;  %v5788_v34 = vld [vmem:[#allocation55_spill] sm:$0xff] }
 0x68a   :  { %2200 = vmatpush2.bf16.msra.mxu0 %v5778_v37  ;;  %2241 = vmatpush2.bf16.msra.mxu1 %v5779_v10  ;;  %v5789_v37 = vld [vmem:[#allocation56_spill] sm:$0xff]  ;;  %v5790_v10 = vld [vmem:[#allocation57_spill] sm:$0xff] }
 0x68b   :  { %2201 = vmatprep.subr.bf16.mxu0 %v5780_v59  ;;  %2242 = vmatprep.subr.bf16.mxu1 %v5781_v58  ;;  %v5791_v59 = vld [vmem:[#allocation58_spill] sm:$0xff]  ;;  %v5792_v58 = vld [vmem:[#allocation59_spill] sm:$0xff] }
 0x68e   :  { %2202 = vmatpush2.bf16.msra.mxu0 %v5782_v21  ;;  %2243 = vmatpush2.bf16.msra.mxu1 %v5783_v6  ;;  %v5793_v21 = vld [vmem:[#allocation60_spill] sm:$0xff]  ;;  %v5794_v6 = vld [vmem:[#allocation61_spill] sm:$0xff] }
 0x68f   :  { %2203 = vmatprep.subr.bf16.mxu0 %v5784_v9  ;;  %2244 = vmatprep.subr.bf16.mxu1 %v5785_v2  ;;  %v5795_v9 = vld [vmem:[#allocation62_spill] sm:$0xff]  ;;  %v5796_v2 = vld [vmem:[#allocation63_spill] sm:$0xff] }
 0x692   :  { %2204 = vmatpush2.bf16.msra.mxu0 %v5786_v3  ;;  %2245 = vmatpush2.bf16.msra.mxu1 %v5787_v5  ;;  %v5797_v3 = vld [vmem:[#allocation64_spill] sm:$0xff]  ;;  %v5798_v5 = vld [vmem:[#allocation65_spill] sm:$0xff] }
 0x693   :  { %2205 = vmatprep.subr.bf16.mxu0 %v5788_v34  ;;  %2246 = vmatprep.subr.bf16.mxu1 %v5789_v37  ;;  %v5799_v34 = vld [vmem:[#allocation66_spill] sm:$0xff]  ;;  %v5800_v37 = vld [vmem:[#allocation67_spill] sm:$0xff] }
 0x696   :  { %2206 = vmatpush2.bf16.msra.mxu0 %v5790_v10  ;;  %2247 = vmatpush2.bf16.msra.mxu1 %v5791_v59  ;;  %v5801_v10 = vld [vmem:[#allocation68_spill] sm:$0xff] }
 0x697   :  { %2207 = vmatprep.subr.bf16.mxu0 %v5792_v58  ;;  %2248 = vmatprep.subr.bf16.mxu1 %v5793_v21 }
 0x69a   :  { %2208 = vmatpush2.bf16.msra.mxu0 %v5794_v6  ;;  %2249 = vmatpush2.bf16.msra.mxu1 %v5795_v9 }
 0x69b   :  { %2209 = vmatprep.subr.bf16.mxu0 %v5796_v2  ;;  %2250 = vmatprep.subr.bf16.mxu1 %v5797_v3  ;;  %v2774_v3 = vld [vmem:[%s4932_s0 + $0xa0] sm:$0xff] }
 0x69c   :  { %v1941_v24 = vunpack.c.h.bf16 %v2774_v3 }
 0x69e   :  { %2210 = vmatpush2.bf16.msra.mxu0 %v5798_v5  ;;  %2251 = vmatpush2.bf16.msra.mxu1 %v5799_v34  ;;  %v2775_v34 = vld [vmem:[%s4932_s0 + $0xa8] sm:$0xff]  ;;  %v1940_v5 = vunpack.c.l.bf16 %v2774_v3 }
 0x69f   :  { %2261 = vmatprep.subr.bf16.mxu0 %v5800_v37  ;;  %2302 = vmatprep.subr.bf16.mxu1 %v5801_v10  ;;  %v1942_v37 = vunpack.c.l.bf16 %v2775_v34  ;;  %v1943_v2 = vunpack.c.h.bf16 %v2775_v34  ;;  %v2776_v34 = vld [vmem:[%s4932_s0 + $0xb0] sm:$0xff] }
 0x6e1   :  { %v1984_v59 = vpop.f32.mrf.mxu0  ;;  %v2025_v58 = vpop.f32.mrf.mxu1 }
 0x6e2   :  { %v2114_v10 = vadd.f32 %v1984_v59, %v1940_v5  ;;  %v2116_v47 = vadd.f32 %v2025_v58, %v1942_v37 }
 0x6e3   :  { %v1986_v31 = vpop.f32.mrf.mxu0  ;;  %v2027_v21 = vpop.f32.mrf.mxu1 }
 0x6e4   :  { %v2117_v26 = vadd.f32 %v2027_v21, %v1943_v2  ;;  %v2122_v25 = vsub.f32 0.0, %v2114_v10  ;;  %v1944_v10 = vunpack.c.l.bf16 %v2776_v34 }
 0x6e5   :  { %v1988_v48 = vpop.f32.mrf.mxu0  ;;  %v2029_v6 = vpop.f32.mrf.mxu1 }
 0x6e6   :  { %v2115_v48 = vadd.f32 %v1986_v31, %v1941_v24  ;;  %v2124_v6 = vsub.f32 0.0, %v2116_v47  ;;  %v2777_v47 = vld [vmem:[%s4932_s0 + $0xb8] sm:$0xff] }
 0x6e7   :  { %v1989_v57 = vpop.f32.mrf.mxu0  ;;  %v2030_v9 = vpop.f32.mrf.mxu1  ;;  %v1946_v31 = vunpack.c.l.bf16 %v2777_v47 }
 0x6e8   :  { %v2125_v57 = vsub.f32 0.0, %v2117_v26  ;;  %v2128_v9 = vmul.f32 1.442695, %v2122_v25  ;;  %v2123_v43 = vsub.f32 0.0, %v2115_v48  ;;  %v2132_v56 = vmul.f32 1.442695, %v2124_v6 }
 0x6ea   :  { %v2134_v50 = vmul.f32 1.442695, %v2125_v57  ;;  %2947 = vpow2.f32 %v2128_v9  ;;  %v2130_v39 = vmul.f32 1.442695, %v2123_v43 }
 0x6eb   :  { %2949 = vpow2.f32 %v2132_v56  ;;  %v1945_v56 = vunpack.c.h.bf16 %v2776_v34 }
 0x6ec   :  { %2951 = vpow2.f32 %v2134_v50  ;;  %v1947_v50 = vunpack.c.h.bf16 %v2777_v47 }
 0x6ed   :  { %2953 = vpow2.f32 %v2130_v39 }
 0x6f7   :  { %v2948_v41 = vpop.eup %2947 }
 0x6f8   :  { %v2950_v27 = vpop.eup %2949  ;;  %v2140_v25 = vadd.f32 1.0, %v2948_v41 }
 0x6f9   :  { %v2952_v26 = vpop.eup %2951  ;;  %v2142_v37 = vadd.f32 1.0, %v2950_v27 }
 0x6fa   :  { %v2954_v24 = vpop.eup %2953  ;;  %v2143_v43 = vadd.f32 1.0, %v2952_v26  ;;  %2955 = vrcp.f32 %v2140_v25 }
 0x6fb   :  { %v2141_v39 = vadd.f32 1.0, %v2954_v24  ;;  %2957 = vrcp.f32 %v2142_v37 }
 0x6fc   :  { %2959 = vrcp.f32 %v2143_v43 }
 0x707   :  { %v2956_v24 = vpop.eup %2955 }
 0x708   :  { %v2958_v37 = vpop.eup %2957 }
 0x721   :  { %v2066_v59 = vpop.f32.mrf.mxu0  ;;  %v2107_v21 = vpop.f32.mrf.mxu1 }
 0x722   :  { %v2118_v2 = vadd.f32 %v2066_v59, %v1944_v10  ;;  %v2120_v3 = vadd.f32 %v2107_v21, %v1946_v31  ;;  %v2960_v10 = vpop.eup %2959  ;;  %v2154_v59 = vmul.f32 %v2958_v37, %v4528_v14  ;;  %v5805_v37 = vld [vmem:[#allocation110_spill] sm:$0xff] }
 0x723   :  { %v2068_v5 = vpop.f32.mrf.mxu0  ;;  %v2109_v58 = vpop.f32.mrf.mxu1  ;;  %v2155_v21 = vmul.f32 %v2960_v10, %v4531_v1  ;;  %v5806_v10 = vld [vmem:[#allocation111_spill] sm:$0xff] }
 0x724   :  { %v2126_v48 = vsub.f32 0.0, %v2118_v2  ;;  %2961 = vtanh.f32 %v2120_v3  ;;  %v2119_v41 = vadd.f32 %v2068_v5, %v1945_v56  ;;  %v2121_v6 = vadd.f32 %v2109_v58, %v1947_v50 }
 0x725   :  { %2963 = vrcp.f32 %v2141_v39  ;;  %v2070_v27 = vpop.f32.mrf.mxu0  ;;  %v2111_v57 = vpop.f32.mrf.mxu1 }
 0x726   :  { %v2136_v9 = vmul.f32 1.442695, %v2126_v48  ;;  %v2127_v34 = vsub.f32 0.0, %v2119_v41  ;;  %2965 = vtanh.f32 %v2121_v6 }
 0x727   :  { %v2071_v47 = vpop.f32.mrf.mxu0  ;;  %v2112_v26 = vpop.f32.mrf.mxu1 }
 0x728   :  { %2967 = vpow2.f32 %v2136_v9  ;;  %v2138_v25 = vmul.f32 1.442695, %v2127_v34  ;;  %v5802_v26 = vld [vmem:[#allocation107_spill] sm:$0xff] }
 0x72a   :  { %2969 = vpow2.f32 %v2138_v25  ;;  %v5803_v25 = vld [vmem:[#allocation108_spill] sm:$0xff] }
 0x731   :  { %v2962_v31 = vpop.eup %2961 }
 0x732   :  { %v2964_v43 = vpop.eup %2963  ;;  %v2156_v56 = vmul.f32 %v2962_v31, %v2956_v24  ;;  %v5804_v24 = vld [vmem:[#allocation109_spill] sm:$0xff]  ;;  %v5807_v31 = vld [vmem:[#allocation112_spill] sm:$0xff] }
 0x733   :  { %v2966_v50 = vpop.eup %2965 }
 0x734   :  { %v4682_v39 = vadd.f32 %v2156_v56, %v2154_v59  ;;  %v2157_v2 = vmul.f32 %v2966_v50, %v2964_v43  ;;  %v5808_v43 = vld [vmem:[#allocation113_spill] sm:$0xff]  ;;  %v5809_v59 = vld [vmem:[#allocation114_spill] sm:$0xff]  ;;  %v5810_v56 = vld [vmem:[#allocation115_spill] sm:$0xff] }
 0x735   :  { %v2968_v3 = vpop.eup %2967  ;;  %v5811_v50 = vld [vmem:[#allocation116_spill] sm:$0xff] }
 0x736   :  { %v2144_v5 = vadd.f32 1.0, %v2968_v3  ;;  %v4685_v58 = vadd.f32 %v2157_v2, %v2155_v21  ;;  %2971 = vtanh.f32 %v4682_v39  ;;  %v5812_v21 = vld [vmem:[#allocation117_spill] sm:$0xff]  ;;  %v5813_v2 = vld [vmem:[#allocation118_spill] sm:$0xff]  ;;  %v5814_v3 = vld [vmem:[#allocation119_spill] sm:$0xff] }
 0x737   :  { %v2970_v48 = vpop.eup %2969 }
 0x738   :  { %2973 = vrcp.f32 %v2144_v5  ;;  %v2145_v41 = vadd.f32 1.0, %v2970_v48  ;;  %v5815_v5 = vld [vmem:[#allocation120_spill] sm:$0xff]  ;;  %v5816_v48 = vld [vmem:[#allocation121_spill] sm:$0xff] }
 0x739   :  { %2975 = vtanh.f32 %v4685_v58 }
 0x73a   :  { %2977 = vrcp.f32 %v2145_v41  ;;  %v5817_v41 = vld [vmem:[#allocation122_spill] sm:$0xff] }
 0x743   :  { %v2972_v14 = vpop.eup %2971 }
 0x745   :  { %v2974_v6 = vpop.eup %2973 }
 0x746   :  { %v2976_v27 = vpop.eup %2975  ;;  %v2162_v9 = vmul.f32 %v2974_v6, %v2972_v14  ;;  %v5818_v14 = vld [vmem:[#allocation123_spill] sm:$0xff]  ;;  %v5819_v6 = vld [vmem:[#allocation124_spill] sm:$0xff] }
 0x747   :  { %v2978_v57 = vpop.eup %2977 }
 0x748   :  { %v2163_v34 = vmul.f32 %v2978_v57, %v2976_v27  ;;  %v4689_v47 = vpack.c.bf16 %v2162_v9, %v2162_v9  ;;  %v5820_v27 = vld [vmem:[#allocation125_spill] sm:$0xff]  ;;  %v5821_v57 = vld [vmem:[#allocation126_spill] sm:$0xff]  ;;  %v5822_v9 = vld [vmem:[#allocation127_spill] sm:$0xff] }
 0x74a   :  { %v2178_v1 = vpack.c.bf16 %v2163_v34, %v2163_v34  ;;  %v5823_v34 = vld [vmem:[#allocation128_spill] sm:$0xff] }
 0x74c   :  { %2211 = vmatprep.mubr.bf16.mxu0 %v2178_v1  ;;  %2252 = vmatprep.mubr.bf16.mxu1 %v2178_v1 }
 0x74d   :  { %2212 = vmatmul.mubr.bf16.vlgmr.msra.gmra.mxu0 %v4689_v47  ;;  %2253 = vmatmul.mubr.bf16.vlgmr.msra.gmra.mxu1 %v4689_v47 }
 0x74e   :  { %2262 = vmatpush1.bf16.msra.mxu0 %v5355_v55  ;;  %2303 = vmatpush1.bf16.msra.mxu1 %v5356_v49 }
 0x74f   :  { %2293 = vmatprep.mubr.bf16.mxu0 %v2178_v1  ;;  %2334 = vmatprep.mubr.bf16.mxu1 %v2178_v1  ;;  %v5824_v1 = vld [vmem:[#allocation129_spill] sm:$0xff] }
 0x750   :  { %2263 = vmatprep.subr.bf16.mxu0 %v5357_v23  ;;  %2304 = vmatprep.subr.bf16.mxu1 %v5358_v11 }
 0x752   :  { %2264 = vmatpush1.bf16.msra.mxu0 %v5359_v18  ;;  %2305 = vmatpush1.bf16.msra.mxu1 %v5360_v17 }
 0x753   :  { %2265 = vmatprep.subr.bf16.mxu0 %v5361_v32  ;;  %2306 = vmatprep.subr.bf16.mxu1 %v5362_v7 }
 0x756   :  { %2266 = vmatpush1.bf16.msra.mxu0 %v5363_v33  ;;  %2307 = vmatpush1.bf16.msra.mxu1 %v5442_v36 }
 0x757   :  { %2267 = vmatprep.subr.bf16.mxu0 %v5443_v35  ;;  %2308 = vmatprep.subr.bf16.mxu1 %v5444_v38 }
 0x75a   :  { %2268 = vmatpush1.bf16.msra.mxu0 %v5445_v45  ;;  %2309 = vmatpush1.bf16.msra.mxu1 %v5446_v46 }
 0x75b   :  { %2269 = vmatprep.subr.bf16.mxu0 %v5447_v52  ;;  %2310 = vmatprep.subr.bf16.mxu1 %v5448_v30 }
 0x75e   :  { %2270 = vmatpush1.bf16.msra.mxu0 %v5449_v53  ;;  %2311 = vmatpush1.bf16.msra.mxu1 %v5450_v29 }
 0x75f   :  { %2271 = vmatprep.subr.bf16.mxu0 %v5451_v28  ;;  %2312 = vmatprep.subr.bf16.mxu1 %v5452_v60 }
 0x762   :  { %2272 = vmatpush1.bf16.msra.mxu0 %v5453_v61  ;;  %2313 = vmatpush1.bf16.msra.mxu1 %v5532_v8 }
 0x763   :  { %2273 = vmatprep.subr.bf16.mxu0 %v5533_v15  ;;  %2314 = vmatprep.subr.bf16.mxu1 %v5534_v19 }
 0x766   :  { %2274 = vmatpush1.bf16.msra.mxu0 %v5535_v20  ;;  %2315 = vmatpush1.bf16.msra.mxu1 %v5536_v13 }
 0x767   :  { %2275 = vmatprep.subr.bf16.mxu0 %v5537_v16  ;;  %2316 = vmatprep.subr.bf16.mxu1 %v5538_v42 }
 0x76a   :  { %2276 = vmatpush1.bf16.msra.mxu0 %v5539_v63  ;;  %2317 = vmatpush1.bf16.msra.mxu1 %v5540_v0 }
 0x76b   :  { %2277 = vmatprep.subr.bf16.mxu0 %v5463_v51  ;;  %2318 = vmatprep.subr.bf16.mxu1 %v5464_v40 }
 0x76e   :  { %2278 = vmatpush2.bf16.msra.mxu0 %v5465_v62  ;;  %2319 = vmatpush2.bf16.msra.mxu1 %v5466_v4 }
 0x76f   :  { %2279 = vmatprep.subr.bf16.mxu0 %v5467_v44  ;;  %2320 = vmatprep.subr.bf16.mxu1 %v5468_v22 }
 0x772   :  { %2280 = vmatpush2.bf16.msra.mxu0 %v5469_v12  ;;  %2321 = vmatpush2.bf16.msra.mxu1 %v5470_v54 }
 0x773   :  { %2281 = vmatprep.subr.bf16.mxu0 %v5802_v26  ;;  %2322 = vmatprep.subr.bf16.mxu1 %v5803_v25 }
 0x776   :  { %2282 = vmatpush2.bf16.msra.mxu0 %v5804_v24  ;;  %2323 = vmatpush2.bf16.msra.mxu1 %v5805_v37 }
 0x777   :  { %2283 = vmatprep.subr.bf16.mxu0 %v5806_v10  ;;  %2324 = vmatprep.subr.bf16.mxu1 %v5807_v31 }
 0x77a   :  { %2284 = vmatpush2.bf16.msra.mxu0 %v5808_v43  ;;  %2325 = vmatpush2.bf16.msra.mxu1 %v5809_v59 }
 0x77b   :  { %2285 = vmatprep.subr.bf16.mxu0 %v5810_v56  ;;  %2326 = vmatprep.subr.bf16.mxu1 %v5811_v50 }
 0x77e   :  { %2286 = vmatpush2.bf16.msra.mxu0 %v5812_v21  ;;  %2327 = vmatpush2.bf16.msra.mxu1 %v5813_v2 }
 0x77f   :  { %2287 = vmatprep.subr.bf16.mxu0 %v5814_v3  ;;  %2328 = vmatprep.subr.bf16.mxu1 %v5815_v5  ;;  %v5825_v3 = vld [vmem:[#allocation130_spill] sm:$0xff]  ;;  %v5826_v5 = vld [vmem:[#allocation3_spill] sm:$0xff] }
 0x782   :  { %2288 = vmatpush2.bf16.msra.mxu0 %v5816_v48  ;;  %2329 = vmatpush2.bf16.msra.mxu1 %v5817_v41  ;;  %v5827_v48 = vld [vmem:[#allocation5_spill] sm:$0xff] }
 0x783   :  { %2289 = vmatprep.subr.bf16.mxu0 %v5818_v14  ;;  %2330 = vmatprep.subr.bf16.mxu1 %v5819_v6  ;;  %v5828_v6 = vld [vmem:[#allocation4_spill] sm:$0xff]  ;;  %v5837_v14 = vld [vmem:[#allocation14_spill] sm:$0xff] }
 0x786   :  { %2290 = vmatpush2.bf16.msra.mxu0 %v5820_v27  ;;  %2331 = vmatpush2.bf16.msra.mxu1 %v5821_v57  ;;  %v5829_v27 = vld [vmem:[#allocation6_spill] sm:$0xff]  ;;  %v5830_v57 = vld [vmem:[#allocation7_spill] sm:$0xff] }
 0x787   :  { %2291 = vmatprep.subr.bf16.mxu0 %v5822_v9  ;;  %2332 = vmatprep.subr.bf16.mxu1 %v5823_v34  ;;  %v5831_v9 = vld [vmem:[#allocation8_spill] sm:$0xff]  ;;  %v5832_v34 = vld [vmem:[#allocation9_spill] sm:$0xff] }
 0x78a   :  { %2292 = vmatpush2.bf16.msra.mxu0 %v5824_v1  ;;  %2333 = vmatpush2.bf16.msra.mxu1 %v5825_v3  ;;  %v5833_v1 = vld [vmem:[#allocation10_spill] sm:$0xff]  ;;  %v5834_v3 = vld [vmem:[#allocation11_spill] sm:$0xff] }
 0x78b   :  { %2408 = vmatprep.subr.bf16.mxu0 %v5826_v5  ;;  %2449 = vmatprep.subr.bf16.mxu1 %v5827_v48  ;;  %v5835_v5 = vld [vmem:[#allocation12_spill] sm:$0xff]  ;;  %v5836_v48 = vld [vmem:[#allocation13_spill] sm:$0xff] }
 0x78d   :  { %2294 = vmatmul.mubr.bf16.vlgmr.msra.gmra.mxu0 %v4689_v47  ;;  %2335 = vmatmul.mubr.bf16.vlgmr.msra.gmra.mxu1 %v4689_v47  ;;  %v5838_v47 = vld [vmem:[#allocation15_spill] sm:$0xff] }
 0x78e   :  { %2409 = vmatpush1.bf16.msra.mxu0 %v5828_v6  ;;  %2450 = vmatpush1.bf16.msra.mxu1 %v5829_v27  ;;  %v5839_v6 = vld [vmem:[#allocation16_spill] sm:$0xff]  ;;  %v5840_v27 = vld [vmem:[#allocation17_spill] sm:$0xff] }
 0x78f   :  { %2410 = vmatprep.subr.bf16.mxu0 %v5830_v57  ;;  %2451 = vmatprep.subr.bf16.mxu1 %v5831_v9  ;;  %v5841_v57 = vld [vmem:[#allocation18_spill] sm:$0xff]  ;;  %v5842_v9 = vld [vmem:[#allocation19_spill] sm:$0xff] }
 0x792   :  { %2411 = vmatpush1.bf16.msra.mxu0 %v5832_v34  ;;  %2452 = vmatpush1.bf16.msra.mxu1 %v5833_v1  ;;  %v5843_v34 = vld [vmem:[#allocation20_spill] sm:$0xff]  ;;  %v5844_v1 = vld [vmem:[#allocation21_spill] sm:$0xff] }
 0x793   :  { %2412 = vmatprep.subr.bf16.mxu0 %v5834_v3  ;;  %2453 = vmatprep.subr.bf16.mxu1 %v5835_v5  ;;  %v5845_v3 = vld [vmem:[#allocation22_spill] sm:$0xff]  ;;  %v5846_v5 = vld [vmem:[#allocation23_spill] sm:$0xff] }
 0x796   :  { %2413 = vmatpush1.bf16.msra.mxu0 %v5836_v48  ;;  %2454 = vmatpush1.bf16.msra.mxu1 %v5837_v14  ;;  %v5847_v48 = vld [vmem:[#allocation24_spill] sm:$0xff]  ;;  %v5848_v14 = vld [vmem:[#allocation25_spill] sm:$0xff] }
 0x797   :  { %2414 = vmatprep.subr.bf16.mxu0 %v5838_v47  ;;  %2455 = vmatprep.subr.bf16.mxu1 %v5839_v6  ;;  %v5849_v47 = vld [vmem:[#allocation26_spill] sm:$0xff]  ;;  %v5850_v6 = vld [vmem:[#allocation27_spill] sm:$0xff] }
 0x79a   :  { %2415 = vmatpush1.bf16.msra.mxu0 %v5840_v27  ;;  %2456 = vmatpush1.bf16.msra.mxu1 %v5841_v57  ;;  %v5851_v27 = vld [vmem:[#allocation28_spill] sm:$0xff]  ;;  %v5852_v57 = vld [vmem:[#allocation29_spill] sm:$0xff] }
 0x79b   :  { %2416 = vmatprep.subr.bf16.mxu0 %v5842_v9  ;;  %2457 = vmatprep.subr.bf16.mxu1 %v5843_v34  ;;  %v5853_v9 = vld [vmem:[#allocation30_spill] sm:$0xff]  ;;  %v5854_v34 = vld [vmem:[#allocation31_spill] sm:$0xff] }
 0x79e   :  { %2417 = vmatpush1.bf16.msra.mxu0 %v5844_v1  ;;  %2458 = vmatpush1.bf16.msra.mxu1 %v5845_v3  ;;  %v5855_v1 = vld [vmem:[#allocation32_spill] sm:$0xff]  ;;  %v5856_v3 = vld [vmem:[#allocation33_spill] sm:$0xff] }
 0x79f   :  { %2418 = vmatprep.subr.bf16.mxu0 %v5846_v5  ;;  %2459 = vmatprep.subr.bf16.mxu1 %v5847_v48  ;;  %v5857_v5 = vld [vmem:[#allocation34_spill] sm:$0xff]  ;;  %v5858_v48 = vld [vmem:[#allocation35_spill] sm:$0xff] }
 0x7a2   :  { %2419 = vmatpush1.bf16.msra.mxu0 %v5848_v14  ;;  %2460 = vmatpush1.bf16.msra.mxu1 %v5849_v47  ;;  %v5859_v14 = vld [vmem:[#allocation36_spill] sm:$0xff]  ;;  %v5860_v47 = vld [vmem:[#allocation37_spill] sm:$0xff] }
 0x7a3   :  { %2420 = vmatprep.subr.bf16.mxu0 %v5850_v6  ;;  %2461 = vmatprep.subr.bf16.mxu1 %v5851_v27  ;;  %v5861_v6 = vld [vmem:[#allocation38_spill] sm:$0xff]  ;;  %v5862_v27 = vld [vmem:[#allocation39_spill] sm:$0xff] }
 0x7a6   :  { %2421 = vmatpush1.bf16.msra.mxu0 %v5852_v57  ;;  %2462 = vmatpush1.bf16.msra.mxu1 %v5853_v9  ;;  %v5863_v57 = vld [vmem:[#allocation40_spill] sm:$0xff]  ;;  %v5864_v9 = vld [vmem:[#allocation41_spill] sm:$0xff] }
 0x7a7   :  { %2422 = vmatprep.subr.bf16.mxu0 %v5854_v34  ;;  %2463 = vmatprep.subr.bf16.mxu1 %v5855_v1  ;;  %v5865_v34 = vld [vmem:[#allocation42_spill] sm:$0xff]  ;;  %v5866_v1 = vld [vmem:[#allocation43_spill] sm:$0xff] }
 0x7aa   :  { %2423 = vmatpush1.bf16.msra.mxu0 %v5856_v3  ;;  %2464 = vmatpush1.bf16.msra.mxu1 %v5857_v5  ;;  %v5867_v3 = vld [vmem:[#allocation44_spill] sm:$0xff]  ;;  %v5868_v5 = vld [vmem:[#allocation45_spill] sm:$0xff] }
 0x7ab   :  { %2424 = vmatprep.subr.bf16.mxu0 %v5858_v48  ;;  %2465 = vmatprep.subr.bf16.mxu1 %v5859_v14  ;;  %v5869_v48 = vld [vmem:[#allocation46_spill] sm:$0xff]  ;;  %v5870_v14 = vld [vmem:[#allocation47_spill] sm:$0xff] }
 0x7ae   :  { %2425 = vmatpush2.bf16.msra.mxu0 %v5860_v47  ;;  %2466 = vmatpush2.bf16.msra.mxu1 %v5861_v6  ;;  %v5871_v47 = vld [vmem:[#allocation48_spill] sm:$0xff]  ;;  %v5872_v6 = vld [vmem:[#allocation49_spill] sm:$0xff] }
 0x7af   :  { %2426 = vmatprep.subr.bf16.mxu0 %v5862_v27  ;;  %2467 = vmatprep.subr.bf16.mxu1 %v5863_v57  ;;  %v5873_v27 = vld [vmem:[#allocation50_spill] sm:$0xff]  ;;  %v5874_v57 = vld [vmem:[#allocation51_spill] sm:$0xff] }
 0x7b2   :  { %2427 = vmatpush2.bf16.msra.mxu0 %v5864_v9  ;;  %2468 = vmatpush2.bf16.msra.mxu1 %v5865_v34  ;;  %v5875_v9 = vld [vmem:[#allocation52_spill] sm:$0xff]  ;;  %v5876_v34 = vld [vmem:[#allocation53_spill] sm:$0xff] }
 0x7b3   :  { %2428 = vmatprep.subr.bf16.mxu0 %v5866_v1  ;;  %2469 = vmatprep.subr.bf16.mxu1 %v5867_v3  ;;  %v5877_v1 = vld [vmem:[#allocation54_spill] sm:$0xff]  ;;  %v5878_v3 = vld [vmem:[#allocation55_spill] sm:$0xff] }
 0x7b6   :  { %2429 = vmatpush2.bf16.msra.mxu0 %v5868_v5  ;;  %2470 = vmatpush2.bf16.msra.mxu1 %v5869_v48  ;;  %v5879_v5 = vld [vmem:[#allocation56_spill] sm:$0xff]  ;;  %v5880_v48 = vld [vmem:[#allocation57_spill] sm:$0xff] }
 0x7b7   :  { %2430 = vmatprep.subr.bf16.mxu0 %v5870_v14  ;;  %2471 = vmatprep.subr.bf16.mxu1 %v5871_v47  ;;  %v5881_v14 = vld [vmem:[#allocation58_spill] sm:$0xff]  ;;  %v5882_v47 = vld [vmem:[#allocation59_spill] sm:$0xff] }
 0x7ba   :  { %2431 = vmatpush2.bf16.msra.mxu0 %v5872_v6  ;;  %2472 = vmatpush2.bf16.msra.mxu1 %v5873_v27  ;;  %v5883_v6 = vld [vmem:[#allocation60_spill] sm:$0xff]  ;;  %v5884_v27 = vld [vmem:[#allocation61_spill] sm:$0xff] }
 0x7bb   :  { %2432 = vmatprep.subr.bf16.mxu0 %v5874_v57  ;;  %2473 = vmatprep.subr.bf16.mxu1 %v5875_v9  ;;  %v5885_v57 = vld [vmem:[#allocation62_spill] sm:$0xff]  ;;  %v5886_v9 = vld [vmem:[#allocation63_spill] sm:$0xff] }
 0x7be   :  { %2433 = vmatpush2.bf16.msra.mxu0 %v5876_v34  ;;  %2474 = vmatpush2.bf16.msra.mxu1 %v5877_v1  ;;  %v5887_v34 = vld [vmem:[#allocation64_spill] sm:$0xff]  ;;  %v5888_v1 = vld [vmem:[#allocation65_spill] sm:$0xff] }
 0x7bf   :  { %2434 = vmatprep.subr.bf16.mxu0 %v5878_v3  ;;  %2475 = vmatprep.subr.bf16.mxu1 %v5879_v5  ;;  %v5889_v3 = vld [vmem:[#allocation66_spill] sm:$0xff]  ;;  %v5890_v5 = vld [vmem:[#allocation67_spill] sm:$0xff] }
 0x7c2   :  { %2435 = vmatpush2.bf16.msra.mxu0 %v5880_v48  ;;  %2476 = vmatpush2.bf16.msra.mxu1 %v5881_v14  ;;  %v5891_v48 = vld [vmem:[#allocation68_spill] sm:$0xff] }
 0x7c3   :  { %2436 = vmatprep.subr.bf16.mxu0 %v5882_v47  ;;  %2477 = vmatprep.subr.bf16.mxu1 %v5883_v6 }
 0x7c6   :  { %2437 = vmatpush2.bf16.msra.mxu0 %v5884_v27  ;;  %2478 = vmatpush2.bf16.msra.mxu1 %v5885_v57 }
 0x7c7   :  { %2438 = vmatprep.subr.bf16.mxu0 %v5886_v9  ;;  %2479 = vmatprep.subr.bf16.mxu1 %v5887_v34  ;;  %v2778_v9 = vld [vmem:[%s4932_s0 + $0xc0] sm:$0xff]  ;;  %v2779_v34 = vld [vmem:[%s4932_s0 + $0xc8] sm:$0xff] }
 0x7c8   :  { %v2170_v50 = vunpack.c.h.bf16 %v2778_v9 }
 0x7ca   :  { %2439 = vmatpush2.bf16.msra.mxu0 %v5888_v1  ;;  %2480 = vmatpush2.bf16.msra.mxu1 %v5889_v3  ;;  %v2169_v1 = vunpack.c.l.bf16 %v2778_v9  ;;  %v2171_v3 = vunpack.c.l.bf16 %v2779_v34 }
 0x7cb   :  { %2490 = vmatprep.subr.bf16.mxu0 %v5890_v5  ;;  %2531 = vmatprep.subr.bf16.mxu1 %v5891_v48  ;;  %v2172_v5 = vunpack.c.h.bf16 %v2779_v34 }
 0x80d   :  { %v2213_v14 = vpop.f32.mrf.mxu0  ;;  %v2254_v47 = vpop.f32.mrf.mxu1 }
 0x80e   :  { %v2343_v48 = vadd.f32 %v2213_v14, %v2169_v1  ;;  %v2345_v56 = vadd.f32 %v2254_v47, %v2171_v3  ;;  %v2780_v14 = vld [vmem:[%s4932_s0 + $0xd0] sm:$0xff] }
 0x80f   :  { %v2215_v41 = vpop.f32.mrf.mxu0  ;;  %v2256_v6 = vpop.f32.mrf.mxu1  ;;  %v2173_v47 = vunpack.c.l.bf16 %v2780_v14 }
 0x810   :  { %v2346_v59 = vadd.f32 %v2256_v6, %v2172_v5  ;;  %v2351_v43 = vsub.f32 0.0, %v2343_v48 }
 0x811   :  { %v2217_v2 = vpop.f32.mrf.mxu0  ;;  %v2258_v27 = vpop.f32.mrf.mxu1 }
 0x812   :  { %v2344_v2 = vadd.f32 %v2215_v41, %v2170_v50  ;;  %v2353_v27 = vsub.f32 0.0, %v2345_v56  ;;  %v2781_v56 = vld [vmem:[%s4932_s0 + $0xd8] sm:$0xff] }
 0x813   :  { %v2218_v21 = vpop.f32.mrf.mxu0  ;;  %v2259_v57 = vpop.f32.mrf.mxu1  ;;  %v2175_v6 = vunpack.c.l.bf16 %v2781_v56 }
 0x814   :  { %v2354_v21 = vsub.f32 0.0, %v2346_v59  ;;  %v2357_v57 = vmul.f32 1.442695, %v2351_v43  ;;  %v2352_v31 = vsub.f32 0.0, %v2344_v2  ;;  %v2361_v10 = vmul.f32 1.442695, %v2353_v27 }
 0x816   :  { %v2363_v37 = vmul.f32 1.442695, %v2354_v21  ;;  %2979 = vpow2.f32 %v2357_v57  ;;  %v2359_v24 = vmul.f32 1.442695, %v2352_v31 }
 0x817   :  { %2981 = vpow2.f32 %v2361_v10  ;;  %v2174_v10 = vunpack.c.h.bf16 %v2780_v14 }
 0x818   :  { %2983 = vpow2.f32 %v2363_v37  ;;  %v2176_v37 = vunpack.c.h.bf16 %v2781_v56 }
 0x819   :  { %2985 = vpow2.f32 %v2359_v24 }
 0x823   :  { %v2980_v25 = vpop.eup %2979 }
 0x824   :  { %v2982_v26 = vpop.eup %2981  ;;  %v2369_v43 = vadd.f32 1.0, %v2980_v25 }
 0x825   :  { %v2984_v59 = vpop.eup %2983  ;;  %v2371_v41 = vadd.f32 1.0, %v2982_v26 }
 0x826   :  { %v2986_v50 = vpop.eup %2985  ;;  %v2372_v31 = vadd.f32 1.0, %v2984_v59  ;;  %2987 = vrcp.f32 %v2369_v43 }
 0x827   :  { %v2370_v24 = vadd.f32 1.0, %v2986_v50  ;;  %2989 = vrcp.f32 %v2371_v41 }
 0x828   :  { %2991 = vrcp.f32 %v2372_v31 }
 0x833   :  { %v2988_v50 = vpop.eup %2987 }
 0x834   :  { %v2990_v41 = vpop.eup %2989 }
 0x84d   :  { %v2295_v9 = vpop.f32.mrf.mxu0  ;;  %v2336_v34 = vpop.f32.mrf.mxu1 }
 0x84e   :  { %v2347_v1 = vadd.f32 %v2295_v9, %v2173_v47  ;;  %v2349_v3 = vadd.f32 %v2336_v34, %v2175_v6  ;;  %v2992_v47 = vpop.eup %2991  ;;  %v2383_v9 = vmul.f32 %v2990_v41, %v4682_v39 }
 0x84f   :  { %v2297_v5 = vpop.f32.mrf.mxu0  ;;  %v2338_v48 = vpop.f32.mrf.mxu1  ;;  %v2384_v34 = vmul.f32 %v2992_v47, %v4685_v58 }
 0x850   :  { %v2355_v2 = vsub.f32 0.0, %v2347_v1  ;;  %2993 = vtanh.f32 %v2349_v3  ;;  %v2348_v25 = vadd.f32 %v2297_v5, %v2174_v10  ;;  %v2350_v27 = vadd.f32 %v2338_v48, %v2176_v37 }
 0x851   :  { %2995 = vrcp.f32 %v2370_v24  ;;  %v2299_v26 = vpop.f32.mrf.mxu0  ;;  %v2340_v21 = vpop.f32.mrf.mxu1 }
 0x852   :  { %v2365_v57 = vmul.f32 1.442695, %v2355_v2  ;;  %v2356_v14 = vsub.f32 0.0, %v2348_v25  ;;  %2997 = vtanh.f32 %v2350_v27 }
 0x853   :  { %v2300_v56 = vpop.f32.mrf.mxu0  ;;  %v2341_v59 = vpop.f32.mrf.mxu1 }
 0x854   :  { %2999 = vpow2.f32 %v2365_v57  ;;  %v2367_v43 = vmul.f32 1.442695, %v2356_v14 }
 0x856   :  { %3001 = vpow2.f32 %v2367_v43 }
 0x85d   :  { %v2994_v6 = vpop.eup %2993 }
 0x85e   :  { %v2996_v31 = vpop.eup %2995  ;;  %v2385_v10 = vmul.f32 %v2994_v6, %v2988_v50 }
 0x85f   :  { %v2998_v37 = vpop.eup %2997 }
 0x860   :  { %v4836_v24 = vadd.f32 %v2385_v10, %v2383_v9  ;;  %v2386_v1 = vmul.f32 %v2998_v37, %v2996_v31 }
 0x861   :  { %v3000_v3 = vpop.eup %2999 }
 0x862   :  { %v2373_v5 = vadd.f32 1.0, %v3000_v3  ;;  %v4839_v48 = vadd.f32 %v2386_v1, %v2384_v34  ;;  %3003 = vtanh.f32 %v4836_v24 }
 0x863   :  { %v3002_v2 = vpop.eup %3001 }
 0x864   :  { %3005 = vrcp.f32 %v2373_v5  ;;  %v2374_v25 = vadd.f32 1.0, %v3002_v2  ;;  %v2784_v2 = vld [vmem:[%s4932_s0 + $0xf0] sm:$0xff] }
 0x865   :  { %3007 = vtanh.f32 %v4839_v48 }
 0x866   :  { %3009 = vrcp.f32 %v2374_v25  ;;  %v2785_v25 = vld [vmem:[%s4932_s0 + $0xf8] sm:$0xff] }
 0x86f   :  { %v3004_v39 = vpop.eup %3003 }
 0x871   :  { %v3006_v27 = vpop.eup %3005 }
 0x872   :  { %v3008_v26 = vpop.eup %3007  ;;  %v2391_v57 = vmul.f32 %v3006_v27, %v3004_v39 }
 0x873   :  { %v3010_v21 = vpop.eup %3009 }
 0x874   :  { %v2392_v14 = vmul.f32 %v3010_v21, %v3008_v26  ;;  %v4843_v56 = vpack.c.bf16 %v2391_v57, %v2391_v57  ;;  %v2402_v57 = vunpack.c.l.bf16 %v2784_v2 }
 0x876   :  { %v2407_v58 = vpack.c.bf16 %v2392_v14, %v2392_v14  ;;  %v2404_v14 = vunpack.c.l.bf16 %v2785_v25 }
 0x878   :  { %2440 = vmatprep.mubr.bf16.mxu0 %v2407_v58  ;;  %2481 = vmatprep.mubr.bf16.mxu1 %v2407_v58 }
 0x879   :  { %2441 = vmatmul.mubr.bf16.vlgmr.msra.gmra.mxu0 %v4843_v56  ;;  %2482 = vmatmul.mubr.bf16.vlgmr.msra.gmra.mxu1 %v4843_v56 }
 0x87a   :  { %2491 = vmatpush1.bf16.msra.mxu0 %v5355_v55  ;;  %2532 = vmatpush1.bf16.msra.mxu1 %v5356_v49  ;;  %v5892_v55 = vld [vmem:[#allocation107_spill] sm:$0xff]  ;;  %v5893_v49 = vld [vmem:[#allocation108_spill] sm:$0xff] }
 0x87b   :  { %2522 = vmatprep.mubr.bf16.mxu0 %v2407_v58  ;;  %2563 = vmatprep.mubr.bf16.mxu1 %v2407_v58 }
 0x87c   :  { %2492 = vmatprep.subr.bf16.mxu0 %v5357_v23  ;;  %2533 = vmatprep.subr.bf16.mxu1 %v5358_v11  ;;  %v5894_v23 = vld [vmem:[#allocation109_spill] sm:$0xff]  ;;  %v5895_v11 = vld [vmem:[#allocation110_spill] sm:$0xff] }
 0x87e   :  { %2493 = vmatpush1.bf16.msra.mxu0 %v5359_v18  ;;  %2534 = vmatpush1.bf16.msra.mxu1 %v5360_v17  ;;  %v5896_v18 = vld [vmem:[#allocation111_spill] sm:$0xff]  ;;  %v5897_v17 = vld [vmem:[#allocation112_spill] sm:$0xff] }
 0x87f   :  { %2494 = vmatprep.subr.bf16.mxu0 %v5361_v32  ;;  %2535 = vmatprep.subr.bf16.mxu1 %v5362_v7  ;;  %v5898_v32 = vld [vmem:[#allocation113_spill] sm:$0xff]  ;;  %v5899_v7 = vld [vmem:[#allocation114_spill] sm:$0xff] }
 0x882   :  { %2495 = vmatpush1.bf16.msra.mxu0 %v5363_v33  ;;  %2536 = vmatpush1.bf16.msra.mxu1 %v5442_v36  ;;  %v5900_v33 = vld [vmem:[#allocation115_spill] sm:$0xff]  ;;  %v5901_v36 = vld [vmem:[#allocation116_spill] sm:$0xff] }
 0x883   :  { %2496 = vmatprep.subr.bf16.mxu0 %v5443_v35  ;;  %2537 = vmatprep.subr.bf16.mxu1 %v5444_v38  ;;  %v5902_v35 = vld [vmem:[#allocation117_spill] sm:$0xff]  ;;  %v5903_v38 = vld [vmem:[#allocation118_spill] sm:$0xff] }
 0x886   :  { %2497 = vmatpush1.bf16.msra.mxu0 %v5445_v45  ;;  %2538 = vmatpush1.bf16.msra.mxu1 %v5446_v46  ;;  %v5904_v45 = vld [vmem:[#allocation119_spill] sm:$0xff]  ;;  %v5905_v46 = vld [vmem:[#allocation120_spill] sm:$0xff] }
 0x887   :  { %2498 = vmatprep.subr.bf16.mxu0 %v5447_v52  ;;  %2539 = vmatprep.subr.bf16.mxu1 %v5448_v30  ;;  %v5906_v52 = vld [vmem:[#allocation121_spill] sm:$0xff]  ;;  %v5907_v30 = vld [vmem:[#allocation122_spill] sm:$0xff] }
 0x88a   :  { %2499 = vmatpush1.bf16.msra.mxu0 %v5449_v53  ;;  %2540 = vmatpush1.bf16.msra.mxu1 %v5450_v29  ;;  %v5908_v53 = vld [vmem:[#allocation123_spill] sm:$0xff]  ;;  %v5909_v29 = vld [vmem:[#allocation124_spill] sm:$0xff] }
 0x88b   :  { %2500 = vmatprep.subr.bf16.mxu0 %v5451_v28  ;;  %2541 = vmatprep.subr.bf16.mxu1 %v5452_v60  ;;  %v5910_v28 = vld [vmem:[#allocation125_spill] sm:$0xff]  ;;  %v5911_v60 = vld [vmem:[#allocation126_spill] sm:$0xff] }
 0x88e   :  { %2501 = vmatpush1.bf16.msra.mxu0 %v5453_v61  ;;  %2542 = vmatpush1.bf16.msra.mxu1 %v5532_v8  ;;  %v5912_v61 = vld [vmem:[#allocation127_spill] sm:$0xff] }
 0x88f   :  { %2502 = vmatprep.subr.bf16.mxu0 %v5533_v15  ;;  %2543 = vmatprep.subr.bf16.mxu1 %v5534_v19 }
 0x892   :  { %2503 = vmatpush1.bf16.msra.mxu0 %v5535_v20  ;;  %2544 = vmatpush1.bf16.msra.mxu1 %v5536_v13  ;;  %v2782_v20 = vld [vmem:[%s4932_s0 + $0xe0] sm:$0xff]  ;;  %v2783_v13 = vld [vmem:[%s4932_s0 + $0xe8] sm:$0xff] }
 0x893   :  { %2504 = vmatprep.subr.bf16.mxu0 %v5537_v16  ;;  %2545 = vmatprep.subr.bf16.mxu1 %v5538_v42  ;;  %v2398_v16 = vunpack.c.l.bf16 %v2782_v20  ;;  %v2400_v42 = vunpack.c.l.bf16 %v2783_v13  ;;  %v2399_v59 = vunpack.c.h.bf16 %v2782_v20 }
 0x896   :  { %2505 = vmatpush1.bf16.msra.mxu0 %v5539_v63  ;;  %2546 = vmatpush1.bf16.msra.mxu1 %v5540_v0  ;;  %v2401_v63 = vunpack.c.h.bf16 %v2783_v13 }
 0x897   :  { %2506 = vmatprep.subr.bf16.mxu0 %v5463_v51  ;;  %2547 = vmatprep.subr.bf16.mxu1 %v5464_v40 }
 0x89a   :  { %2507 = vmatpush2.bf16.msra.mxu0 %v5465_v62  ;;  %2548 = vmatpush2.bf16.msra.mxu1 %v5466_v4  ;;  %v5913_v62 = vld [vmem:[#allocation128_spill] sm:$0xff]  ;;  %v5914_v4 = vld [vmem:[#allocation129_spill] sm:$0xff] }
 0x89b   :  { %2508 = vmatprep.subr.bf16.mxu0 %v5467_v44  ;;  %2549 = vmatprep.subr.bf16.mxu1 %v5468_v22  ;;  %v5915_v44 = vld [vmem:[#allocation130_spill] sm:$0xff] }
 0x89e   :  { %2509 = vmatpush2.bf16.msra.mxu0 %v5469_v12  ;;  %2550 = vmatpush2.bf16.msra.mxu1 %v5470_v54 }
 0x89f   :  { %2510 = vmatprep.subr.bf16.mxu0 %v5892_v55  ;;  %2551 = vmatprep.subr.bf16.mxu1 %v5893_v49  ;;  %v2405_v55 = vunpack.c.h.bf16 %v2785_v25 }
 0x8a2   :  { %2511 = vmatpush2.bf16.msra.mxu0 %v5894_v23  ;;  %2552 = vmatpush2.bf16.msra.mxu1 %v5895_v11 }
 0x8a3   :  { %2512 = vmatprep.subr.bf16.mxu0 %v5896_v18  ;;  %2553 = vmatprep.subr.bf16.mxu1 %v5897_v17 }
 0x8a6   :  { %2513 = vmatpush2.bf16.msra.mxu0 %v5898_v32  ;;  %2554 = vmatpush2.bf16.msra.mxu1 %v5899_v7 }
 0x8a7   :  { %2514 = vmatprep.subr.bf16.mxu0 %v5900_v33  ;;  %2555 = vmatprep.subr.bf16.mxu1 %v5901_v36 }
 0x8aa   :  { %2515 = vmatpush2.bf16.msra.mxu0 %v5902_v35  ;;  %2556 = vmatpush2.bf16.msra.mxu1 %v5903_v38 }
 0x8ab   :  { %2516 = vmatprep.subr.bf16.mxu0 %v5904_v45  ;;  %2557 = vmatprep.subr.bf16.mxu1 %v5905_v46 }
 0x8ae   :  { %2517 = vmatpush2.bf16.msra.mxu0 %v5906_v52  ;;  %2558 = vmatpush2.bf16.msra.mxu1 %v5907_v30 }
 0x8af   :  { %2518 = vmatprep.subr.bf16.mxu0 %v5908_v53  ;;  %2559 = vmatprep.subr.bf16.mxu1 %v5909_v29 }
 0x8b2   :  { %2519 = vmatpush2.bf16.msra.mxu0 %v5910_v28  ;;  %2560 = vmatpush2.bf16.msra.mxu1 %v5911_v60 }
 0x8b3   :  { %2520 = vmatprep.subr.bf16.mxu0 %v5912_v61  ;;  %2561 = vmatprep.subr.bf16.mxu1 %v5913_v62 }
 0x8b6   :  { %2521 = vmatpush2.bf16.msra.mxu0 %v5914_v4  ;;  %2562 = vmatpush2.bf16.msra.mxu1 %v5915_v44 }
 0x8b9   :  { %2523 = vmatmul.mubr.bf16.vlgmr.msra.gmra.mxu0 %v4843_v56  ;;  %2564 = vmatmul.mubr.bf16.vlgmr.msra.gmra.mxu1 %v4843_v56  ;;  %v2403_v56 = vunpack.c.h.bf16 %v2784_v2 }
 0x939   :  { %v2442_v22 = vpop.f32.mrf.mxu0  ;;  %v2483_v12 = vpop.f32.mrf.mxu1 }
 0x93a   :  { %v2572_v0 = vadd.f32 %v2442_v22, %v2398_v16  ;;  %v2574_v43 = vadd.f32 %v2483_v12, %v2400_v42 }
 0x93b   :  { %v2444_v54 = vpop.f32.mrf.mxu0  ;;  %v2485_v51 = vpop.f32.mrf.mxu1 }
 0x93c   :  { %v2575_v50 = vadd.f32 %v2485_v51, %v2401_v63  ;;  %v2580_v41 = vsub.f32 0.0, %v2572_v0  ;;  %v2573_v47 = vadd.f32 %v2444_v54, %v2399_v59  ;;  %v2582_v6 = vsub.f32 0.0, %v2574_v43 }
 0x93d   :  { %v2446_v40 = vpop.f32.mrf.mxu0  ;;  %v2487_v8 = vpop.f32.mrf.mxu1 }
 0x93e   :  { %v2583_v31 = vsub.f32 0.0, %v2575_v50  ;;  %v2586_v9 = vmul.f32 1.442695, %v2580_v41  ;;  %v2581_v10 = vsub.f32 0.0, %v2573_v47  ;;  %v2590_v37 = vmul.f32 1.442695, %v2582_v6 }
 0x93f   :  { %v2447_v15 = vpop.f32.mrf.mxu0  ;;  %v2488_v19 = vpop.f32.mrf.mxu1 }
 0x940   :  { %v2592_v34 = vmul.f32 1.442695, %v2583_v31  ;;  %3011 = vpow2.f32 %v2586_v9  ;;  %v2588_v1 = vmul.f32 1.442695, %v2581_v10 }
 0x941   :  { %3013 = vpow2.f32 %v2590_v37 }
 0x942   :  { %3015 = vpow2.f32 %v2592_v34 }
 0x943   :  { %3017 = vpow2.f32 %v2588_v1 }
 0x94d   :  { %v3012_v3 = vpop.eup %3011 }
 0x94e   :  { %v3014_v5 = vpop.eup %3013  ;;  %v2598_v27 = vadd.f32 1.0, %v3012_v3 }
 0x94f   :  { %v3016_v39 = vpop.eup %3015  ;;  %v2600_v21 = vadd.f32 1.0, %v3014_v5 }
 0x950   :  { %v3018_v26 = vpop.eup %3017  ;;  %v2601_v58 = vadd.f32 1.0, %v3016_v39  ;;  %3019 = vrcp.f32 %v2598_v27 }
 0x951   :  { %v2599_v49 = vadd.f32 1.0, %v3018_v26  ;;  %3021 = vrcp.f32 %v2600_v21 }
 0x952   :  { %3023 = vrcp.f32 %v2601_v58 }
 0x95d   :  { %v3020_v28 = vpop.eup %3019 }
 0x95e   :  { %v3022_v60 = vpop.eup %3021 }
 0x95f   :  { %v3024_v61 = vpop.eup %3023  ;;  %v2612_v44 = vmul.f32 %v3022_v60, %v4836_v24 }
 0x960   :  { %v2613_v51 = vmul.f32 %v3024_v61, %v4839_v48 }
 0x979   :  { %v2524_v23 = vpop.f32.mrf.mxu0  ;;  %v2565_v11 = vpop.f32.mrf.mxu1 }
 0x97a   :  { %v2576_v18 = vadd.f32 %v2524_v23, %v2402_v57  ;;  %v2578_v17 = vadd.f32 %v2565_v11, %v2404_v14 }
 0x97b   :  { %v2526_v32 = vpop.f32.mrf.mxu0  ;;  %v2567_v7 = vpop.f32.mrf.mxu1 }
 0x97c   :  { %v2584_v33 = vsub.f32 0.0, %v2576_v18  ;;  %3025 = vtanh.f32 %v2578_v17  ;;  %v2577_v36 = vadd.f32 %v2526_v32, %v2403_v56  ;;  %v2579_v35 = vadd.f32 %v2567_v7, %v2405_v55 }
 0x97d   :  { %3027 = vrcp.f32 %v2599_v49  ;;  %v2528_v38 = vpop.f32.mrf.mxu0  ;;  %v2569_v45 = vpop.f32.mrf.mxu1 }
 0x97e   :  { %v2594_v46 = vmul.f32 1.442695, %v2584_v33  ;;  %v2585_v52 = vsub.f32 0.0, %v2577_v36  ;;  %3029 = vtanh.f32 %v2579_v35 }
 0x97f   :  { %v2529_v30 = vpop.f32.mrf.mxu0  ;;  %v2570_v53 = vpop.f32.mrf.mxu1 }
 0x980   :  { %3031 = vpow2.f32 %v2594_v46  ;;  %v2596_v29 = vmul.f32 1.442695, %v2585_v52 }
 0x982   :  { %3033 = vpow2.f32 %v2596_v29 }
 0x989   :  { %v3026_v62 = vpop.eup %3025 }
 0x98a   :  { %v3028_v4 = vpop.eup %3027  ;;  %v2614_v22 = vmul.f32 %v3026_v62, %v3020_v28 }
 0x98b   :  { %v3030_v12 = vpop.eup %3029 }
 0x98c   :  { %v2616_v54 = vadd.f32 %v2614_v22, %v2612_v44  ;;  %v2615_v40 = vmul.f32 %v3030_v12, %v3028_v4 }
 0x98d   :  { %v3032_v8 = vpop.eup %3031 }
 0x98e   :  { %v2602_v15 = vadd.f32 1.0, %v3032_v8  ;;  %v2617_v19 = vadd.f32 %v2615_v40, %v2613_v51  ;;  %3035 = vtanh.f32 %v2616_v54 }
 0x98f   :  { %v3034_v20 = vpop.eup %3033 }
 0x990   :  { %3037 = vrcp.f32 %v2602_v15  ;;  %v2603_v13 = vadd.f32 1.0, %v3034_v20 }
 0x991   :  { %3039 = vtanh.f32 %v2617_v19 }
 0x992   :  { %3041 = vrcp.f32 %v2603_v13 }
 0x99b   :  { %v3036_v16 = vpop.eup %3035 }
 0x99d   :  { %v3038_v42 = vpop.eup %3037 }
 0x99e   :  { %v3040_v63 = vpop.eup %3039  ;;  %v2620_v0 = vmul.f32 %v3038_v42, %v3036_v16 }
 0x99f   :  { %v3042_v24 = vpop.eup %3041 }
 0x9a0   :  { %2622 = vst [vmem:[%s4933_s2] sm:$0xff] %v2620_v0  ;;  %v2621_v48 = vmul.f32 %v3042_v24, %v3040_v63 }
 0x9a2   :  { %2623 = vst [vmem:[%s4933_s2 + $0x8] sm:$0xff] %v2621_v48 }

</bundles_post_ra>
